<compile_context>
chip_gen: v6e
topology: v6e:2x2x1
jax: 0.10.0
libtpu: 0.0.40
codegen_flags: <defaults>
</compile_context>

<pallas_src>
import functools

import jax
import jax.numpy as jnp
from jax import lax
from jax.experimental import pallas as pl
from jax.experimental.pallas import tpu as pltpu


_MASK_VALUE = -1e30  # large finite negative (safer than -inf if reused w/ padding masks)
# Scoped-VMEM budget: fits v7x's 64 MiB physical VMEM with headroom; raise to
# 64-96 MiB on v5e/v6e (128 MiB parts) when scaling block sizes up.
_VMEM_LIMIT = 48 * 1024 * 1024


# ----------------------------- in-kernel helpers -----------------------------

def _layernorm(x, scale, shift, eps=1e-5):
    # matches Raschka LayerNorm: mean / biased var over last dim, eps=1e-5
    mean = jnp.mean(x, axis=-1, keepdims=True)
    var = jnp.mean((x - mean) ** 2, axis=-1, keepdims=True)
    return scale * ((x - mean) / jnp.sqrt(var + eps)) + shift


def _gelu_tanh(x):
    # GELU (tanh approximation) as used in the reference FeedForward
    return 0.5 * x * (1.0 + jnp.tanh(
        jnp.sqrt(2.0 / jnp.pi) * (x + 0.044715 * x * x * x)))


# ----------------------------- Pallas kernels --------------------------------

def gpt_blocks_kernel(x_ref,
                      ln1_s_ref, ln1_b_ref,
                      wqkv_ref, bqkv_ref, wo_ref, bo_ref,
                      ln2_s_ref, ln2_b_ref,
                      w1_ref, b1_ref, w2_ref, b2_ref,
                      fln_s_ref, fln_b_ref,
                      o_ref, res_ref, *, batch, num_heads):
    """One transformer layer per grid step; the full batch is processed per step.

    res_ref: (B*S, E) fp32 VMEM scratch carrying the residual stream across the
    layer axis.  o_ref: (B*S, E) bf16, written once at the last layer after the
    fused final LayerNorm.  Weight refs are the per-layer slices selected by the
    layer grid coordinate.
    """
    layer = pl.program_id(0)
    n_layers = pl.num_programs(0)

    @pl.when(layer == 0)
    def _():
        res_ref[...] = x_ref[...]          # load residual stream once

    x = res_ref[...]                       # (B*S, E) fp32, resident in VMEM
    BS, E = x.shape
    B = batch
    S = BS // B
    H = num_heads
    dh = E // H

    # ---- attention sub-block: shortcut -> norm1 -> MHA -> +shortcut ----
    h = _layernorm(x, ln1_s_ref[...], ln1_b_ref[...])
    # Fused lane-dense QKV projection: (B*S, E) @ (E, 3E), fp32 accumulation.
    # 1/sqrt(dh) is already folded into the Q columns of wqkv / bqkv.
    qkv = jnp.dot(h.astype(jnp.bfloat16), wqkv_ref[...],
                  preferred_element_type=jnp.float32) + bqkv_ref[...]
    qkvb = qkv.astype(jnp.bfloat16)        # (B*S, 3E)

    def split_heads(base):
        # Lane-slice head chunks (the matmul was already done lane-dense) and
        # stack them on a leading (head, batch) group axis: g = h * B + b.
        parts = [qkvb[:, base + hh * dh: base + (hh + 1) * dh].reshape(B, S, dh)
                 for hh in range(H)]
        return jnp.concatenate(parts, axis=0)        # (H*B, S, dh)

    q = split_heads(0)
    k = split_heads(E)
    v = split_heads(2 * E)

    # TODO(synk): flash-style online softmax over KV tiles before scaling S.
    sc = jnp.einsum('gqd,gkd->gqk', q, k,
                    preferred_element_type=jnp.float32)          # (H*B, S, S)

    causal = (lax.broadcasted_iota(jnp.int32, (S, S), 1)
              <= lax.broadcasted_iota(jnp.int32, (S, S), 0))     # (S, S) once
    sc = jnp.where(causal[None, :, :], sc, _MASK_VALUE)

    m = jnp.max(sc, axis=-1, keepdims=True)
    p = jnp.exp(sc - m)
    denom = jnp.sum(p, axis=-1, keepdims=True)
    w = p * pl.reciprocal(denom, approx=True)   # attention dropout = identity (eval)

    ctx = jnp.einsum('gqk,gkd->gqd', w.astype(jnp.bfloat16), v,
                     preferred_element_type=jnp.float32)         # (H*B, S, dh)
    ctxb = ctx.astype(jnp.bfloat16)

    # One-time relayout back to lane-concatenated heads, then a single
    # lane-dense (B*S, E) @ (E, E) output projection.
    ctx2d = jnp.concatenate(
        [ctxb[hh * B:(hh + 1) * B].reshape(BS, dh) for hh in range(H)], axis=-1)
    attn = jnp.dot(ctx2d, wo_ref[...],
                   preferred_element_type=jnp.float32) + bo_ref[...]

    x = x + attn                           # residual (shortcut-dropout = identity)

    # ---- feed-forward sub-block: shortcut -> norm2 -> FF -> +shortcut ----
    h2 = _layernorm(x, ln2_s_ref[...], ln2_b_ref[...])
    ff = jnp.dot(h2.astype(jnp.bfloat16), w1_ref[...],
                 preferred_element_type=jnp.float32) + b1_ref[...]
    ff = _gelu_tanh(ff)
    ff = jnp.dot(ff.astype(jnp.bfloat16), w2_ref[...],
                 preferred_element_type=jnp.float32) + b2_ref[...]

    x = x + ff
    res_ref[...] = x                       # carry residual to the next layer

    @pl.when(layer == n_layers - 1)
    def _():
        # Fused final LayerNorm; hand bf16 activations to the LM-head kernel.
        o_ref[...] = _layernorm(x, fln_s_ref[...],
                                fln_b_ref[...]).astype(jnp.bfloat16)


def lm_head_kernel(x_ref, w_ref, o_ref):
    """Pure matmul: (B*S, E) bf16 @ (E, tn) bf16 -> (B*S, tn) fp32 logits."""
    o_ref[...] = jnp.dot(x_ref[...], w_ref[...],
                         preferred_element_type=jnp.float32)


# ----------------------------- wrappers ---------------------------------------

_BLOCK_WEIGHT_ORDER = ("ln1_s", "ln1_b", "wqkv", "bqkv", "wo", "bo",
                       "ln2_s", "ln2_b", "w1", "b1", "w2", "b2")


def _stacked_weight_spec(a):
    """BlockSpec selecting layer `l` from an (L, ...) stacked weight."""
    nd = a.ndim
    # TODO(synk): sweep pipeline_mode=pl.Buffered(3) here if per-layer compute
    # does not hide the next layer's weight DMA at real model scale.
    return pl.BlockSpec((None,) + a.shape[1:],
                        lambda l, _nd=nd: (l,) + (0,) * (_nd - 1))


def gpt_blocks(x2d, blocks, final_ln_s, final_ln_b, *, batch, num_heads):
    """All transformer blocks + final LayerNorm fused into a single pallas_call."""
    BS, E = x2d.shape
    L = blocks["wqkv"].shape[0]
    weights = [blocks[k] for k in _BLOCK_WEIGHT_ORDER]
    kernel = functools.partial(gpt_blocks_kernel, batch=batch, num_heads=num_heads)
    return pl.pallas_call(
        kernel,
        out_shape=jax.ShapeDtypeStruct((BS, E), jnp.bfloat16),
        grid=(L,),
        in_specs=[pl.BlockSpec((BS, E), lambda l: (0, 0))]
                 + [_stacked_weight_spec(w) for w in weights]
                 + [pl.BlockSpec((1, E), lambda l: (0, 0)),
                    pl.BlockSpec((1, E), lambda l: (0, 0))],
        out_specs=pl.BlockSpec((BS, E), lambda l: (0, 0)),
        scratch_shapes=[pltpu.VMEM((BS, E), jnp.float32)],
        compiler_params=pltpu.CompilerParams(
            dimension_semantics=("arbitrary",),
            vmem_limit_bytes=_VMEM_LIMIT),
    )(x2d, *weights, final_ln_s, final_ln_b)


def lm_head(x2d, w_out, *, tn=None):
    """LM head tiled over the vocab dimension only (activations stay resident)."""
    BS, E = x2d.shape
    V = w_out.shape[1]
    if tn is None:
        tn = 256 if V % 256 == 0 else 128
    v_pad = ((V + tn - 1) // tn) * tn
    if v_pad != V:                         # keep output tiles lane-dense
        w_out = jnp.pad(w_out, ((0, 0), (0, v_pad - V)))
    n_tiles = v_pad // tn
    logits = pl.pallas_call(
        lm_head_kernel,
        out_shape=jax.ShapeDtypeStruct((BS, v_pad), jnp.float32),
        grid=(n_tiles,),
        in_specs=[pl.BlockSpec((BS, E), lambda j: (0, 0)),
                  pl.BlockSpec((E, tn), lambda j: (0, j))],
        out_specs=pl.BlockSpec((BS, tn), lambda j: (0, j)),
        compiler_params=pltpu.CompilerParams(
            dimension_semantics=("parallel",),
            vmem_limit_bytes=_VMEM_LIMIT),
    )(x2d, w_out)
    return logits[:, :V] if v_pad != V else logits


def gpt_forward(in_idx, params, cfg):
    B, S = in_idx.shape
    E = params["tok_emb"].shape[1]
    # Keeps the in-kernel head split/merge reshapes layout-preserving for bf16.
    # TODO(synk): pad S to a multiple of 16 for arbitrary sequence lengths.
    assert S % 16 == 0, "sequence length must be a multiple of 16"
    # Embedding lookups (gather) kept in plain JAX glue; drop_emb = identity.
    tok = jnp.take(params["tok_emb"], in_idx, axis=0)            # (B, S, E)
    pos = params["pos_emb"][:S]                                  # (S, E)
    x2d = (tok + pos[None, :, :]).astype(jnp.float32).reshape(B * S, E)
    x2d = gpt_blocks(x2d, params["blocks"], params["final_ln_s"],
                     params["final_ln_b"], batch=B, num_heads=cfg["n_heads"])
    logits = lm_head(x2d, params["w_out"])                       # (B*S, V) fp32
    return logits.reshape(B, S, -1)


# ----------------------------- parameter init ---------------------------------

def init_params(key, cfg):
    E = cfg["emb_dim"]
    V = cfg["vocab_size"]
    C = cfg["context_length"]
    H = cfg["n_heads"]
    L = cfg["n_layers"]
    assert E % H == 0
    dh = E // H
    F = 4 * E
    f32, bf16 = jnp.float32, jnp.bfloat16

    def nrm(k, shape, scale=0.02):
        return scale * jax.random.normal(k, shape, dtype=jnp.float32)

    ks = jax.random.split(key, 12)

    wq = nrm(ks[3], (L, E, E))
    wk = nrm(ks[4], (L, E, E))
    wv = nrm(ks[5], (L, E, E))
    wo = nrm(ks[6], (L, E, E))

    if cfg.get("qkv_bias", False):
        bq = nrm(ks[7], (L, E))
        bk = nrm(ks[8], (L, E))
        bv = nrm(ks[9], (L, E))
    else:
        bq = bk = bv = jnp.zeros((L, E), f32)

    att_scale = dh ** -0.5   # fold 1/sqrt(dh) into Q weights/bias (host-side, once)
    wqkv = jnp.concatenate([wq * att_scale, wk, wv], axis=-1).astype(bf16)   # (L, E, 3E)
    bqkv = jnp.concatenate([bq * att_scale, bk, bv],
                           axis=-1).reshape(L, 1, 3 * E).astype(f32)

    blocks = {
        "ln1_s": jnp.ones((L, 1, E), f32), "ln1_b": jnp.zeros((L, 1, E), f32),
        "wqkv": wqkv, "bqkv": bqkv,
        "wo": wo.astype(bf16), "bo": jnp.zeros((L, 1, E), f32),
        "ln2_s": jnp.ones((L, 1, E), f32), "ln2_b": jnp.zeros((L, 1, E), f32),
        "w1": nrm(ks[10], (L, E, F)).astype(bf16), "b1": jnp.zeros((L, 1, F), f32),
        "w2": nrm(ks[11], (L, F, E)).astype(bf16), "b2": jnp.zeros((L, 1, E), f32),
    }

    params = {
        "tok_emb": nrm(ks[0], (V, E)),
        "pos_emb": nrm(ks[1], (C, E)),
        "final_ln_s": jnp.ones((1, E), f32),
        "final_ln_b": jnp.zeros((1, E), f32),
        "w_out": nrm(ks[2], (E, V)).astype(bf16),
        "blocks": blocks,
    }
    return params


# ----------------------------- main --------------------------------------------

if __name__ == "__main__":
    cfg = {
        "vocab_size": 512,       # lane-dense: multiple of 128 (tiled in 256-wide chunks)
        "context_length": 64,
        "emb_dim": 128,          # lane-dense embedding dim
        "n_heads": 4,            # dh = 32
        "n_layers": 2,
        "drop_rate": 0.0,        # inference: dropout is identity anyway
        "qkv_bias": True,
    }
    B, S = 2, 48

    key = jax.random.PRNGKey(0)
    k_param, k_tok = jax.random.split(key)
    params = init_params(k_param, cfg)
    in_idx = jax.random.randint(k_tok, (B, S), 0, cfg["vocab_size"], dtype=jnp.int32)

    logits = gpt_forward(in_idx, params, cfg)
    logits = jax.block_until_ready(logits)
    assert logits.shape == (B, S, cfg["vocab_size"])
    assert bool(jnp.all(jnp.isfinite(logits)))
    print("KERNEL_OK")
</pallas_src>

<mosaic_0001>
module attributes {stable_mosaic.version = 11 : i64} {
  func.func @gpt_blocks_kernel(%arg0: i32, %arg1: memref<96x128xf32, #tpu.memory_space<vmem>>, %arg2: memref<1x1x128xf32, #tpu.memory_space<vmem>>, %arg3: memref<1x1x128xf32, #tpu.memory_space<vmem>>, %arg4: memref<1x128x384xbf16, #tpu.memory_space<vmem>>, %arg5: memref<1x1x384xf32, #tpu.memory_space<vmem>>, %arg6: memref<1x128x128xbf16, #tpu.memory_space<vmem>>, %arg7: memref<1x1x128xf32, #tpu.memory_space<vmem>>, %arg8: memref<1x1x128xf32, #tpu.memory_space<vmem>>, %arg9: memref<1x1x128xf32, #tpu.memory_space<vmem>>, %arg10: memref<1x128x512xbf16, #tpu.memory_space<vmem>>, %arg11: memref<1x1x512xf32, #tpu.memory_space<vmem>>, %arg12: memref<1x512x128xbf16, #tpu.memory_space<vmem>>, %arg13: memref<1x1x128xf32, #tpu.memory_space<vmem>>, %arg14: memref<1x128xf32, #tpu.memory_space<vmem>>, %arg15: memref<1x128xf32, #tpu.memory_space<vmem>>, %arg16: memref<96x128xbf16, #tpu.memory_space<vmem>>, %arg17: memref<96x128xf32, #tpu.memory_space<vmem>>) attributes {dimension_semantics = [#tpu.dimension_semantics<arbitrary>], iteration_bounds = array<i64: 2>, scalar_prefetch = 0 : i64, scratch_operands = 1 : i64, tpu.core_type = #tpu.core_type<tc>, window_params = [{pipeline_mode = #tpu.pipeline_mode<synchronous>, transform_indices = @transform_0, window_bounds = array<i64: 96, 128>}, {transform_indices = @transform_1, window_bounds = array<i64: 1, 1, 128>}, {transform_indices = @transform_2, window_bounds = array<i64: 1, 1, 128>}, {transform_indices = @transform_3, window_bounds = array<i64: 1, 128, 384>}, {transform_indices = @transform_4, window_bounds = array<i64: 1, 1, 384>}, {transform_indices = @transform_5, window_bounds = array<i64: 1, 128, 128>}, {transform_indices = @transform_6, window_bounds = array<i64: 1, 1, 128>}, {transform_indices = @transform_7, window_bounds = array<i64: 1, 1, 128>}, {transform_indices = @transform_8, window_bounds = array<i64: 1, 1, 128>}, {transform_indices = @transform_9, window_bounds = array<i64: 1, 128, 512>}, {transform_indices = @transform_10, window_bounds = array<i64: 1, 1, 512>}, {transform_indices = @transform_11, window_bounds = array<i64: 1, 512, 128>}, {transform_indices = @transform_12, window_bounds = array<i64: 1, 1, 128>}, {pipeline_mode = #tpu.pipeline_mode<synchronous>, transform_indices = @transform_13, window_bounds = array<i64: 1, 128>}, {pipeline_mode = #tpu.pipeline_mode<synchronous>, transform_indices = @transform_14, window_bounds = array<i64: 1, 128>}, {pipeline_mode = #tpu.pipeline_mode<synchronous>, transform_indices = @transform_15, window_bounds = array<i64: 96, 128>}]} {
    %c0_i32 = arith.constant 0 : i32
    %0 = arith.cmpi eq, %arg0, %c0_i32 : i32
    %1 = arith.extui %0 : i1 to i32
    %c0_i32_0 = arith.constant 0 : i32
    %2 = arith.cmpi ne, %1, %c0_i32_0 : i32
    scf.if %2 {
      %c0_63 = arith.constant 0 : index
      %c0_64 = arith.constant 0 : index
      %166 = vector.load %arg1[%c0_63, %c0_64] : memref<96x128xf32, #tpu.memory_space<vmem>>, vector<96x128xf32>
      %c0_65 = arith.constant 0 : index
      %c0_66 = arith.constant 0 : index
      %167 = vector.load %arg17[%c0_65, %c0_66] : memref<96x128xf32, #tpu.memory_space<vmem>>, vector<96x128xf32>
      tpu.vector_store %arg17[%c0_65, %c0_66], %166 {strides = array<i32>} : memref<96x128xf32, #tpu.memory_space<vmem>>, vector<96x128xf32>,
    } else {
    }
    %c0 = arith.constant 0 : index
    %c0_1 = arith.constant 0 : index
    %3 = vector.load %arg17[%c0, %c0_1] : memref<96x128xf32, #tpu.memory_space<vmem>>, vector<96x128xf32>
    %c0_2 = arith.constant 0 : index
    %c0_3 = arith.constant 0 : index
    %c0_4 = arith.constant 0 : index
    %4 = vector.load %arg2[%c0_2, %c0_3, %c0_4] : memref<1x1x128xf32, #tpu.memory_space<vmem>>, vector<1x1x128xf32>
    %5 = vector.shape_cast %4 : vector<1x1x128xf32> to vector<1x128xf32>
    %c0_5 = arith.constant 0 : index
    %c0_6 = arith.constant 0 : index
    %c0_7 = arith.constant 0 : index
    %6 = vector.load %arg3[%c0_5, %c0_6, %c0_7] : memref<1x1x128xf32, #tpu.memory_space<vmem>>, vector<1x1x128xf32>
    %7 = vector.shape_cast %6 : vector<1x1x128xf32> to vector<1x128xf32>
    %cst = arith.constant dense<0.000000e+00> : vector<96xf32>
    %8 = vector.multi_reduction <add>, %3, %cst [1] : vector<96x128xf32> to vector<96xf32>
    %9 = vector.shape_cast %8 : vector<96xf32> to vector<96x1xf32>
    %cst_8 = arith.constant 1.280000e+02 : f32
    %10 = vector.broadcast %cst_8 : f32 to vector<96x1xf32>
    %11 = arith.divf %9, %10 : vector<96x1xf32>
    %12 = vector.broadcast %11 : vector<96x1xf32> to vector<96x128xf32>
    %13 = arith.subf %3, %12 : vector<96x128xf32>
    %14 = arith.mulf %13, %13 : vector<96x128xf32>
    %cst_9 = arith.constant dense<0.000000e+00> : vector<96xf32>
    %15 = vector.multi_reduction <add>, %14, %cst_9 [1] : vector<96x128xf32> to vector<96xf32>
    %16 = vector.shape_cast %15 : vector<96xf32> to vector<96x1xf32>
    %cst_10 = arith.constant 1.280000e+02 : f32
    %17 = vector.broadcast %cst_10 : f32 to vector<96x1xf32>
    %18 = arith.divf %16, %17 : vector<96x1xf32>
    %19 = vector.broadcast %11 : vector<96x1xf32> to vector<96x128xf32>
    %20 = arith.subf %3, %19 : vector<96x128xf32>
    %cst_11 = arith.constant 9.99999974E-6 : f32
    %21 = vector.broadcast %cst_11 : f32 to vector<96x1xf32>
    %22 = arith.addf %18, %21 : vector<96x1xf32>
    %23 = math.sqrt %22 : vector<96x1xf32>
    %24 = vector.broadcast %23 : vector<96x1xf32> to vector<96x128xf32>
    %25 = arith.divf %20, %24 : vector<96x128xf32>
    %26 = vector.broadcast %5 : vector<1x128xf32> to vector<96x128xf32>
    %27 = arith.mulf %26, %25 : vector<96x128xf32>
    %28 = vector.broadcast %7 : vector<1x128xf32> to vector<96x128xf32>
    %29 = arith.addf %27, %28 : vector<96x128xf32>
    %30 = arith.truncf %29 : vector<96x128xf32> to vector<96x128xbf16>
    %c0_12 = arith.constant 0 : index
    %c0_13 = arith.constant 0 : index
    %c0_14 = arith.constant 0 : index
    %31 = vector.load %arg4[%c0_12, %c0_13, %c0_14] : memref<1x128x384xbf16, #tpu.memory_space<vmem>>, vector<1x128x384xbf16>
    %32 = vector.shape_cast %31 : vector<1x128x384xbf16> to vector<128x384xbf16>
    %cst_15 = arith.constant dense<0.000000e+00> : vector<96x384xf32>
    %33 = tpu.matmul %30, %32, %cst_15 {dimension_numbers = #tpu.dot_dimension_numbers<[1], [0], [0], [1], [0, 0, 1, 1], [], []>} : vector<96x128xbf16>, vector<128x384xbf16>, vector<96x384xf32> -> vector<96x384xf32>
    %c0_16 = arith.constant 0 : index
    %c0_17 = arith.constant 0 : index
    %c0_18 = arith.constant 0 : index
    %34 = vector.load %arg5[%c0_16, %c0_17, %c0_18] : memref<1x1x384xf32, #tpu.memory_space<vmem>>, vector<1x1x384xf32>
    %35 = vector.shape_cast %34 : vector<1x1x384xf32> to vector<1x384xf32>
    %36 = vector.broadcast %35 : vector<1x384xf32> to vector<96x384xf32>
    %37 = arith.addf %33, %36 : vector<96x384xf32>
    %38 = arith.truncf %37 : vector<96x384xf32> to vector<96x384xbf16>
    %39 = vector.extract_strided_slice %38 {offsets = [0, 0], sizes = [96, 32], strides = [1, 1]} : vector<96x384xbf16> to vector<96x32xbf16>
    %40 = vector.shape_cast %39 : vector<96x32xbf16> to vector<2x48x32xbf16>
    %41 = vector.extract_strided_slice %38 {offsets = [0, 32], sizes = [96, 32], strides = [1, 1]} : vector<96x384xbf16> to vector<96x32xbf16>
    %42 = vector.shape_cast %41 : vector<96x32xbf16> to vector<2x48x32xbf16>
    %43 = vector.extract_strided_slice %38 {offsets = [0, 64], sizes = [96, 32], strides = [1, 1]} : vector<96x384xbf16> to vector<96x32xbf16>
    %44 = vector.shape_cast %43 : vector<96x32xbf16> to vector<2x48x32xbf16>
    %45 = vector.extract_strided_slice %38 {offsets = [0, 96], sizes = [96, 32], strides = [1, 1]} : vector<96x384xbf16> to vector<96x32xbf16>
    %46 = vector.shape_cast %45 : vector<96x32xbf16> to vector<2x48x32xbf16>
    %47 = tpu.concatenate %40, %42, %44, %46 in 0 : vector<2x48x32xbf16>, vector<2x48x32xbf16>, vector<2x48x32xbf16>, vector<2x48x32xbf16> -> vector<8x48x32xbf16>
    %48 = vector.extract_strided_slice %38 {offsets = [0, 128], sizes = [96, 32], strides = [1, 1]} : vector<96x384xbf16> to vector<96x32xbf16>
    %49 = vector.shape_cast %48 : vector<96x32xbf16> to vector<2x48x32xbf16>
    %50 = vector.extract_strided_slice %38 {offsets = [0, 160], sizes = [96, 32], strides = [1, 1]} : vector<96x384xbf16> to vector<96x32xbf16>
    %51 = vector.shape_cast %50 : vector<96x32xbf16> to vector<2x48x32xbf16>
    %52 = vector.extract_strided_slice %38 {offsets = [0, 192], sizes = [96, 32], strides = [1, 1]} : vector<96x384xbf16> to vector<96x32xbf16>
    %53 = vector.shape_cast %52 : vector<96x32xbf16> to vector<2x48x32xbf16>
    %54 = vector.extract_strided_slice %38 {offsets = [0, 224], sizes = [96, 32], strides = [1, 1]} : vector<96x384xbf16> to vector<96x32xbf16>
    %55 = vector.shape_cast %54 : vector<96x32xbf16> to vector<2x48x32xbf16>
    %56 = tpu.concatenate %49, %51, %53, %55 in 0 : vector<2x48x32xbf16>, vector<2x48x32xbf16>, vector<2x48x32xbf16>, vector<2x48x32xbf16> -> vector<8x48x32xbf16>
    %57 = vector.extract_strided_slice %38 {offsets = [0, 256], sizes = [96, 32], strides = [1, 1]} : vector<96x384xbf16> to vector<96x32xbf16>
    %58 = vector.shape_cast %57 : vector<96x32xbf16> to vector<2x48x32xbf16>
    %59 = vector.extract_strided_slice %38 {offsets = [0, 288], sizes = [96, 32], strides = [1, 1]} : vector<96x384xbf16> to vector<96x32xbf16>
    %60 = vector.shape_cast %59 : vector<96x32xbf16> to vector<2x48x32xbf16>
    %61 = vector.extract_strided_slice %38 {offsets = [0, 320], sizes = [96, 32], strides = [1, 1]} : vector<96x384xbf16> to vector<96x32xbf16>
    %62 = vector.shape_cast %61 : vector<96x32xbf16> to vector<2x48x32xbf16>
    %63 = vector.extract_strided_slice %38 {offsets = [0, 352], sizes = [96, 32], strides = [1, 1]} : vector<96x384xbf16> to vector<96x32xbf16>
    %64 = vector.shape_cast %63 : vector<96x32xbf16> to vector<2x48x32xbf16>
    %65 = tpu.concatenate %58, %60, %62, %64 in 0 : vector<2x48x32xbf16>, vector<2x48x32xbf16>, vector<2x48x32xbf16>, vector<2x48x32xbf16> -> vector<8x48x32xbf16>
    "tpu.trace_start"() <{level = 10 : i32, message = "gqd,gkd->gqk"}> : () -> ()
    %cst_19 = arith.constant dense<0.000000e+00> : vector<8x48x48xf32>
    %66 = tpu.matmul %47, %56, %cst_19 {dimension_numbers = #tpu.dot_dimension_numbers<[2], [2], [1], [1], [0, 0, 0, 1, 1, 1], [0], [0]>} : vector<8x48x32xbf16>, vector<8x48x32xbf16>, vector<8x48x48xf32> -> vector<8x48x48xf32>
    "tpu.trace_stop"() : () -> ()
    %67 = tpu.iota {dimensions = array<i32: 1>} : vector<48x48xi32>
    %68 = tpu.iota {dimensions = array<i32: 0>} : vector<48x48xi32>
    %69 = arith.cmpi sle, %67, %68 : vector<48x48xi32>
    %70 = vector.shape_cast %69 : vector<48x48xi1> to vector<1x48x48xi1>
    %cst_20 = arith.constant -1.000000e+30 : f32
    %71 = vector.shape_cast %70 : vector<1x48x48xi1> to vector<1x48x48xi1>
    %72 = vector.broadcast %71 : vector<1x48x48xi1> to vector<8x48x48xi1>
    %73 = vector.broadcast %cst_20 : f32 to vector<8x48x48xf32>
    %74 = arith.select %72, %66, %73 : vector<8x48x48xi1>, vector<8x48x48xf32>
    %cst_21 = arith.constant dense<0xFF800000> : vector<8x48xf32>
    %75 = vector.multi_reduction <maximumf>, %74, %cst_21 [2] : vector<8x48x48xf32> to vector<8x48xf32>
    %76 = vector.shape_cast %75 : vector<8x48xf32> to vector<8x48x1xf32>
    %77 = vector.broadcast %76 : vector<8x48x1xf32> to vector<8x48x48xf32>
    %78 = arith.subf %74, %77 : vector<8x48x48xf32>
    %79 = math.exp %78 : vector<8x48x48xf32>
    %cst_22 = arith.constant dense<0.000000e+00> : vector<8x48xf32>
    %80 = vector.multi_reduction <add>, %79, %cst_22 [2] : vector<8x48x48xf32> to vector<8x48xf32>
    %81 = vector.shape_cast %80 : vector<8x48xf32> to vector<8x48x1xf32>
    %82 = tpu.reciprocal %81 {approx = true} : vector<8x48x1xf32> -> vector<8x48x1xf32>
    %83 = vector.broadcast %82 : vector<8x48x1xf32> to vector<8x48x48xf32>
    %84 = arith.mulf %79, %83 : vector<8x48x48xf32>
    %85 = arith.truncf %84 : vector<8x48x48xf32> to vector<8x48x48xbf16>
    "tpu.trace_start"() <{level = 10 : i32, message = "gqk,gkd->gqd"}> : () -> ()
    %cst_23 = arith.constant dense<0.000000e+00> : vector<8x48x32xf32>
    %86 = tpu.matmul %85, %65, %cst_23 {dimension_numbers = #tpu.dot_dimension_numbers<[2], [1], [1], [2], [0, 0, 0, 1, 1, 2], [0], [0]>} : vector<8x48x48xbf16>, vector<8x48x32xbf16>, vector<8x48x32xf32> -> vector<8x48x32xf32>
    "tpu.trace_stop"() : () -> ()
    %87 = arith.truncf %86 : vector<8x48x32xf32> to vector<8x48x32xbf16>
    %88 = vector.extract_strided_slice %87 {offsets = [0, 0, 0], sizes = [2, 48, 32], strides = [1, 1, 1]} : vector<8x48x32xbf16> to vector<2x48x32xbf16>
    %89 = vector.shape_cast %88 : vector<2x48x32xbf16> to vector<96x32xbf16>
    %90 = vector.extract_strided_slice %87 {offsets = [2, 0, 0], sizes = [2, 48, 32], strides = [1, 1, 1]} : vector<8x48x32xbf16> to vector<2x48x32xbf16>
    %91 = vector.shape_cast %90 : vector<2x48x32xbf16> to vector<96x32xbf16>
    %92 = vector.extract_strided_slice %87 {offsets = [4, 0, 0], sizes = [2, 48, 32], strides = [1, 1, 1]} : vector<8x48x32xbf16> to vector<2x48x32xbf16>
    %93 = vector.shape_cast %92 : vector<2x48x32xbf16> to vector<96x32xbf16>
    %94 = vector.extract_strided_slice %87 {offsets = [6, 0, 0], sizes = [2, 48, 32], strides = [1, 1, 1]} : vector<8x48x32xbf16> to vector<2x48x32xbf16>
    %95 = vector.shape_cast %94 : vector<2x48x32xbf16> to vector<96x32xbf16>
    %96 = tpu.concatenate %89, %91, %93, %95 in 1 : vector<96x32xbf16>, vector<96x32xbf16>, vector<96x32xbf16>, vector<96x32xbf16> -> vector<96x128xbf16>
    %c0_24 = arith.constant 0 : index
    %c0_25 = arith.constant 0 : index
    %c0_26 = arith.constant 0 : index
    %97 = vector.load %arg6[%c0_24, %c0_25, %c0_26] : memref<1x128x128xbf16, #tpu.memory_space<vmem>>, vector<1x128x128xbf16>
    %98 = vector.shape_cast %97 : vector<1x128x128xbf16> to vector<128x128xbf16>
    %cst_27 = arith.constant dense<0.000000e+00> : vector<96x128xf32>
    %99 = tpu.matmul %96, %98, %cst_27 {dimension_numbers = #tpu.dot_dimension_numbers<[1], [0], [0], [1], [0, 0, 1, 1], [], []>} : vector<96x128xbf16>, vector<128x128xbf16>, vector<96x128xf32> -> vector<96x128xf32>
    %c0_28 = arith.constant 0 : index
    %c0_29 = arith.constant 0 : index
    %c0_30 = arith.constant 0 : index
    %100 = vector.load %arg7[%c0_28, %c0_29, %c0_30] : memref<1x1x128xf32, #tpu.memory_space<vmem>>, vector<1x1x128xf32>
    %101 = vector.shape_cast %100 : vector<1x1x128xf32> to vector<1x128xf32>
    %102 = vector.broadcast %101 : vector<1x128xf32> to vector<96x128xf32>
    %103 = arith.addf %99, %102 : vector<96x128xf32>
    %104 = arith.addf %3, %103 : vector<96x128xf32>
    %c0_31 = arith.constant 0 : index
    %c0_32 = arith.constant 0 : index
    %c0_33 = arith.constant 0 : index
    %105 = vector.load %arg8[%c0_31, %c0_32, %c0_33] : memref<1x1x128xf32, #tpu.memory_space<vmem>>, vector<1x1x128xf32>
    %106 = vector.shape_cast %105 : vector<1x1x128xf32> to vector<1x128xf32>
    %c0_34 = arith.constant 0 : index
    %c0_35 = arith.constant 0 : index
    %c0_36 = arith.constant 0 : index
    %107 = vector.load %arg9[%c0_34, %c0_35, %c0_36] : memref<1x1x128xf32, #tpu.memory_space<vmem>>, vector<1x1x128xf32>
    %108 = vector.shape_cast %107 : vector<1x1x128xf32> to vector<1x128xf32>
    %cst_37 = arith.constant dense<0.000000e+00> : vector<96xf32>
    %109 = vector.multi_reduction <add>, %104, %cst_37 [1] : vector<96x128xf32> to vector<96xf32>
    %110 = vector.shape_cast %109 : vector<96xf32> to vector<96x1xf32>
    %cst_38 = arith.constant 1.280000e+02 : f32
    %111 = vector.broadcast %cst_38 : f32 to vector<96x1xf32>
    %112 = arith.divf %110, %111 : vector<96x1xf32>
    %113 = vector.broadcast %112 : vector<96x1xf32> to vector<96x128xf32>
    %114 = arith.subf %104, %113 : vector<96x128xf32>
    %115 = arith.mulf %114, %114 : vector<96x128xf32>
    %cst_39 = arith.constant dense<0.000000e+00> : vector<96xf32>
    %116 = vector.multi_reduction <add>, %115, %cst_39 [1] : vector<96x128xf32> to vector<96xf32>
    %117 = vector.shape_cast %116 : vector<96xf32> to vector<96x1xf32>
    %cst_40 = arith.constant 1.280000e+02 : f32
    %118 = vector.broadcast %cst_40 : f32 to vector<96x1xf32>
    %119 = arith.divf %117, %118 : vector<96x1xf32>
    %120 = vector.broadcast %112 : vector<96x1xf32> to vector<96x128xf32>
    %121 = arith.subf %104, %120 : vector<96x128xf32>
    %cst_41 = arith.constant 9.99999974E-6 : f32
    %122 = vector.broadcast %cst_41 : f32 to vector<96x1xf32>
    %123 = arith.addf %119, %122 : vector<96x1xf32>
    %124 = math.sqrt %123 : vector<96x1xf32>
    %125 = vector.broadcast %124 : vector<96x1xf32> to vector<96x128xf32>
    %126 = arith.divf %121, %125 : vector<96x128xf32>
    %127 = vector.broadcast %106 : vector<1x128xf32> to vector<96x128xf32>
    %128 = arith.mulf %127, %126 : vector<96x128xf32>
    %129 = vector.broadcast %108 : vector<1x128xf32> to vector<96x128xf32>
    %130 = arith.addf %128, %129 : vector<96x128xf32>
    %131 = arith.truncf %130 : vector<96x128xf32> to vector<96x128xbf16>
    %c0_42 = arith.constant 0 : index
    %c0_43 = arith.constant 0 : index
    %c0_44 = arith.constant 0 : index
    %132 = vector.load %arg10[%c0_42, %c0_43, %c0_44] : memref<1x128x512xbf16, #tpu.memory_space<vmem>>, vector<1x128x512xbf16>
    %133 = vector.shape_cast %132 : vector<1x128x512xbf16> to vector<128x512xbf16>
    %cst_45 = arith.constant dense<0.000000e+00> : vector<96x512xf32>
    %134 = tpu.matmul %131, %133, %cst_45 {dimension_numbers = #tpu.dot_dimension_numbers<[1], [0], [0], [1], [0, 0, 1, 1], [], []>} : vector<96x128xbf16>, vector<128x512xbf16>, vector<96x512xf32> -> vector<96x512xf32>
    %c0_46 = arith.constant 0 : index
    %c0_47 = arith.constant 0 : index
    %c0_48 = arith.constant 0 : index
    %135 = vector.load %arg11[%c0_46, %c0_47, %c0_48] : memref<1x1x512xf32, #tpu.memory_space<vmem>>, vector<1x1x512xf32>
    %136 = vector.shape_cast %135 : vector<1x1x512xf32> to vector<1x512xf32>
    %137 = vector.broadcast %136 : vector<1x512xf32> to vector<96x512xf32>
    %138 = arith.addf %134, %137 : vector<96x512xf32>
    %cst_49 = arith.constant 5.000000e-01 : f32
    %139 = vector.broadcast %cst_49 : f32 to vector<96x512xf32>
    %140 = arith.mulf %139, %138 : vector<96x512xf32>
    %cst_50 = arith.constant 0.636619746 : f32
    %141 = math.sqrt %cst_50 : f32
    %cst_51 = arith.constant 4.471500e-02 : f32
    %142 = vector.broadcast %cst_51 : f32 to vector<96x512xf32>
    %143 = arith.mulf %142, %138 : vector<96x512xf32>
    %144 = arith.mulf %143, %138 : vector<96x512xf32>
    %145 = arith.mulf %144, %138 : vector<96x512xf32>
    %146 = arith.addf %138, %145 : vector<96x512xf32>
    %147 = vector.broadcast %141 : f32 to vector<96x512xf32>
    %148 = arith.mulf %147, %146 : vector<96x512xf32>
    %149 = math.tanh %148 : vector<96x512xf32>
    %cst_52 = arith.constant 1.000000e+00 : f32
    %150 = vector.broadcast %cst_52 : f32 to vector<96x512xf32>
    %151 = arith.addf %150, %149 : vector<96x512xf32>
    %152 = arith.mulf %140, %151 : vector<96x512xf32>
    %153 = arith.truncf %152 : vector<96x512xf32> to vector<96x512xbf16>
    %c0_53 = arith.constant 0 : index
    %c0_54 = arith.constant 0 : index
    %c0_55 = arith.constant 0 : index
    %154 = vector.load %arg12[%c0_53, %c0_54, %c0_55] : memref<1x512x128xbf16, #tpu.memory_space<vmem>>, vector<1x512x128xbf16>
    %155 = vector.shape_cast %154 : vector<1x512x128xbf16> to vector<512x128xbf16>
    %cst_56 = arith.constant dense<0.000000e+00> : vector<96x128xf32>
    %156 = tpu.matmul %153, %155, %cst_56 {dimension_numbers = #tpu.dot_dimension_numbers<[1], [0], [0], [1], [0, 0, 1, 1], [], []>} : vector<96x512xbf16>, vector<512x128xbf16>, vector<96x128xf32> -> vector<96x128xf32>
    %c0_57 = arith.constant 0 : index
    %c0_58 = arith.constant 0 : index
    %c0_59 = arith.constant 0 : index
    %157 = vector.load %arg13[%c0_57, %c0_58, %c0_59] : memref<1x1x128xf32, #tpu.memory_space<vmem>>, vector<1x1x128xf32>
    %158 = vector.shape_cast %157 : vector<1x1x128xf32> to vector<1x128xf32>
    %159 = vector.broadcast %158 : vector<1x128xf32> to vector<96x128xf32>
    %160 = arith.addf %156, %159 : vector<96x128xf32>
    %161 = arith.addf %104, %160 : vector<96x128xf32>
    %c0_60 = arith.constant 0 : index
    %c0_61 = arith.constant 0 : index
    %162 = vector.load %arg17[%c0_60, %c0_61] : memref<96x128xf32, #tpu.memory_space<vmem>>, vector<96x128xf32>
    tpu.vector_store %arg17[%c0_60, %c0_61], %161 {strides = array<i32>} : memref<96x128xf32, #tpu.memory_space<vmem>>, vector<96x128xf32>,
    %c1_i32 = arith.constant 1 : i32
    %163 = arith.cmpi eq, %arg0, %c1_i32 : i32
    %164 = arith.extui %163 : i1 to i32
    %c0_i32_62 = arith.constant 0 : i32
    %165 = arith.cmpi ne, %164, %c0_i32_62 : i32
    scf.if %165 {
      %c0_63 = arith.constant 0 : index
      %c0_64 = arith.constant 0 : index
      %166 = vector.load %arg14[%c0_63, %c0_64] : memref<1x128xf32, #tpu.memory_space<vmem>>, vector<1x128xf32>
      %c0_65 = arith.constant 0 : index
      %c0_66 = arith.constant 0 : index
      %167 = vector.load %arg15[%c0_65, %c0_66] : memref<1x128xf32, #tpu.memory_space<vmem>>, vector<1x128xf32>
      %cst_67 = arith.constant dense<0.000000e+00> : vector<96xf32>
      %168 = vector.multi_reduction <add>, %161, %cst_67 [1] : vector<96x128xf32> to vector<96xf32>
      %169 = vector.shape_cast %168 : vector<96xf32> to vector<96x1xf32>
      %cst_68 = arith.constant 1.280000e+02 : f32
      %170 = vector.broadcast %cst_68 : f32 to vector<96x1xf32>
      %171 = arith.divf %169, %170 : vector<96x1xf32>
      %172 = vector.broadcast %171 : vector<96x1xf32> to vector<96x128xf32>
      %173 = arith.subf %161, %172 : vector<96x128xf32>
      %174 = arith.mulf %173, %173 : vector<96x128xf32>
      %cst_69 = arith.constant dense<0.000000e+00> : vector<96xf32>
      %175 = vector.multi_reduction <add>, %174, %cst_69 [1] : vector<96x128xf32> to vector<96xf32>
      %176 = vector.shape_cast %175 : vector<96xf32> to vector<96x1xf32>
      %cst_70 = arith.constant 1.280000e+02 : f32
      %177 = vector.broadcast %cst_70 : f32 to vector<96x1xf32>
      %178 = arith.divf %176, %177 : vector<96x1xf32>
      %179 = vector.broadcast %171 : vector<96x1xf32> to vector<96x128xf32>
      %180 = arith.subf %161, %179 : vector<96x128xf32>
      %cst_71 = arith.constant 9.99999974E-6 : f32
      %181 = vector.broadcast %cst_71 : f32 to vector<96x1xf32>
      %182 = arith.addf %178, %181 : vector<96x1xf32>
      %183 = math.sqrt %182 : vector<96x1xf32>
      %184 = vector.broadcast %183 : vector<96x1xf32> to vector<96x128xf32>
      %185 = arith.divf %180, %184 : vector<96x128xf32>
      %186 = vector.broadcast %166 : vector<1x128xf32> to vector<96x128xf32>
      %187 = arith.mulf %186, %185 : vector<96x128xf32>
      %188 = vector.broadcast %167 : vector<1x128xf32> to vector<96x128xf32>
      %189 = arith.addf %187, %188 : vector<96x128xf32>
      %190 = arith.truncf %189 : vector<96x128xf32> to vector<96x128xbf16>
      %c0_72 = arith.constant 0 : index
      %c0_73 = arith.constant 0 : index
      %191 = vector.load %arg16[%c0_72, %c0_73] : memref<96x128xbf16, #tpu.memory_space<vmem>>, vector<96x128xbf16>
      tpu.vector_store %arg16[%c0_72, %c0_73], %190 {strides = array<i32>} : memref<96x128xbf16, #tpu.memory_space<vmem>>, vector<96x128xbf16>,
    } else {
    }
    return
  }
  func.func @transform_0(%arg0: i32) -> (i32, i32) {
    %c0_i32 = arith.constant 0 : i32
    %c0_i32_0 = arith.constant 0 : i32
    %c0_i32_1 = arith.constant 0 : i32
    return %c0_i32, %c0_i32_0 : i32, i32
  }
  func.func @transform_1(%arg0: i32) -> (i32, i32, i32) {
    %c0_i32 = arith.constant 0 : i32
    %c0_i32_0 = arith.constant 0 : i32
    %c0_i32_1 = arith.constant 0 : i32
    return %arg0, %c0_i32, %c0_i32_0 : i32, i32, i32
  }
  func.func @transform_2(%arg0: i32) -> (i32, i32, i32) {
    %c0_i32 = arith.constant 0 : i32
    %c0_i32_0 = arith.constant 0 : i32
    %c0_i32_1 = arith.constant 0 : i32
    return %arg0, %c0_i32, %c0_i32_0 : i32, i32, i32
  }
  func.func @transform_3(%arg0: i32) -> (i32, i32, i32) {
    %c0_i32 = arith.constant 0 : i32
    %c0_i32_0 = arith.constant 0 : i32
    %c0_i32_1 = arith.constant 0 : i32
    return %arg0, %c0_i32, %c0_i32_0 : i32, i32, i32
  }
  func.func @transform_4(%arg0: i32) -> (i32, i32, i32) {
    %c0_i32 = arith.constant 0 : i32
    %c0_i32_0 = arith.constant 0 : i32
    %c0_i32_1 = arith.constant 0 : i32
    return %arg0, %c0_i32, %c0_i32_0 : i32, i32, i32
  }
  func.func @transform_5(%arg0: i32) -> (i32, i32, i32) {
    %c0_i32 = arith.constant 0 : i32
    %c0_i32_0 = arith.constant 0 : i32
    %c0_i32_1 = arith.constant 0 : i32
    return %arg0, %c0_i32, %c0_i32_0 : i32, i32, i32
  }
  func.func @transform_6(%arg0: i32) -> (i32, i32, i32) {
    %c0_i32 = arith.constant 0 : i32
    %c0_i32_0 = arith.constant 0 : i32
    %c0_i32_1 = arith.constant 0 : i32
    return %arg0, %c0_i32, %c0_i32_0 : i32, i32, i32
  }
  func.func @transform_7(%arg0: i32) -> (i32, i32, i32) {
    %c0_i32 = arith.constant 0 : i32
    %c0_i32_0 = arith.constant 0 : i32
    %c0_i32_1 = arith.constant 0 : i32
    return %arg0, %c0_i32, %c0_i32_0 : i32, i32, i32
  }
  func.func @transform_8(%arg0: i32) -> (i32, i32, i32) {
    %c0_i32 = arith.constant 0 : i32
    %c0_i32_0 = arith.constant 0 : i32
    %c0_i32_1 = arith.constant 0 : i32
    return %arg0, %c0_i32, %c0_i32_0 : i32, i32, i32
  }
  func.func @transform_9(%arg0: i32) -> (i32, i32, i32) {
    %c0_i32 = arith.constant 0 : i32
    %c0_i32_0 = arith.constant 0 : i32
    %c0_i32_1 = arith.constant 0 : i32
    return %arg0, %c0_i32, %c0_i32_0 : i32, i32, i32
  }
  func.func @transform_10(%arg0: i32) -> (i32, i32, i32) {
    %c0_i32 = arith.constant 0 : i32
    %c0_i32_0 = arith.constant 0 : i32
    %c0_i32_1 = arith.constant 0 : i32
    return %arg0, %c0_i32, %c0_i32_0 : i32, i32, i32
  }
  func.func @transform_11(%arg0: i32) -> (i32, i32, i32) {
    %c0_i32 = arith.constant 0 : i32
    %c0_i32_0 = arith.constant 0 : i32
    %c0_i32_1 = arith.constant 0 : i32
    return %arg0, %c0_i32, %c0_i32_0 : i32, i32, i32
  }
  func.func @transform_12(%arg0: i32) -> (i32, i32, i32) {
    %c0_i32 = arith.constant 0 : i32
    %c0_i32_0 = arith.constant 0 : i32
    %c0_i32_1 = arith.constant 0 : i32
    return %arg0, %c0_i32, %c0_i32_0 : i32, i32, i32
  }
  func.func @transform_13(%arg0: i32) -> (i32, i32) {
    %c0_i32 = arith.constant 0 : i32
    %c0_i32_0 = arith.constant 0 : i32
    %c0_i32_1 = arith.constant 0 : i32
    return %c0_i32, %c0_i32_0 : i32, i32
  }
  func.func @transform_14(%arg0: i32) -> (i32, i32) {
    %c0_i32 = arith.constant 0 : i32
    %c0_i32_0 = arith.constant 0 : i32
    %c0_i32_1 = arith.constant 0 : i32
    return %c0_i32, %c0_i32_0 : i32, i32
  }
  func.func @transform_15(%arg0: i32) -> (i32, i32) {
    %c0_i32 = arith.constant 0 : i32
    %c0_i32_0 = arith.constant 0 : i32
    %c0_i32_1 = arith.constant 0 : i32
    return %c0_i32, %c0_i32_0 : i32, i32
  }
}

</mosaic_0001>

<bundles_post_ra>
// kernel: tpu_custom_call.1
= control target key start
LH: loop header
LB: loop body
LE: loop exit
PB: predicated region body
PF: predicated region fallthrough
CT: control target
= control target key end

     0   :  { %s10787_s0 = inlined_call_operand.hbm [shape: f32[96,128], index: 0, kind: input, shape index: {}]   ;;  %s10788_s1 = inlined_call_operand.hbm [shape: f32[2,1,128], index: 1, kind: input, shape index: {}]   ;;  %s10789_s2 = inlined_call_operand.hbm [shape: f32[2,1,128], index: 2, kind: input, shape index: {}]   ;;  %s10790_s3 = inlined_call_operand.hbm [shape: bf16[2,128,384], index: 3, kind: input, shape index: {}]   ;;  %s10791_s4 = inlined_call_operand.vmem [shape: f32[2,1,384], index: 4, kind: input, shape index: {}]   ;;  %s10792_s5 = inlined_call_operand.hbm [shape: bf16[2,128,128], index: 5, kind: input, shape index: {}]   ;;  %s10793_s6 = inlined_call_operand.vmem [shape: f32[2,1,128], index: 6, kind: input, shape index: {}]   ;;  %s10794_s7 = inlined_call_operand.hbm [shape: f32[2,1,128], index: 7, kind: input, shape index: {}]   ;;  %s10795_s8 = inlined_call_operand.hbm [shape: f32[2,1,128], index: 8, kind: input, shape index: {}]   ;;  %s10796_s9 = inlined_call_operand.hbm [shape: bf16[2,128,512], index: 9, kind: input, shape index: {}]   ;;  %s10797_s10 = inlined_call_operand.vmem [shape: f32[2,1,512], index: 10, kind: input, shape index: {}]   ;;  %s10798_s11 = inlined_call_operand.hbm [shape: bf16[2,512,128], index: 11, kind: input, shape index: {}]   ;;  %s10799_s12 = inlined_call_operand.vmem [shape: f32[2,1,128], index: 12, kind: input, shape index: {}]   ;;  %s10800_s13 = inlined_call_operand.vmem [shape: f32[1,128], index: 13, kind: input, shape index: {}]   ;;  %s10801_s14 = inlined_call_operand.vmem [shape: f32[1,128], index: 14, kind: input, shape index: {}]   ;;  %s10802_s15 = inlined_call_operand.hbm [shape: bf16[96,128], index: 15, kind: output, shape index: {}]  }
   0x1   :  { %10874 = sst [smem:[#allocation74_spill]] %s10787_s0 }
   0x2   :  { %10875 = sst [smem:[#allocation75_spill]] %s10788_s1 }
   0x3   :  { %10876 = sst [smem:[#allocation76_spill]] %s10790_s3 }
   0x4   :  { %10877 = sst [smem:[#allocation77_spill]] %s10791_s4 }
   0x5   :  { %10878 = sst [smem:[#allocation78_spill]] %s10793_s6 }
   0x6   :  { %10879 = sst [smem:[#allocation79_spill]] %s10794_s7 }
   0x7   :  { %10880 = sst [smem:[#allocation80_spill]] %s10796_s9 }
   0x8   :  { %10881 = sst [smem:[#allocation81_spill]] %s10797_s10 }
   0x9   :  { %10882 = sst [smem:[#allocation82_spill]] %s10799_s12 }
   0xa   :  { %10883 = sst [smem:[#allocation83_spill]] %s10800_s13 }
   0xb   :  { %10884 = sst [smem:[#allocation84_spill]] %s10801_s14 }
   0xc   :  { %10885 = sst [smem:[#allocation85_spill]] %s10802_s15 }
   0xd   :  { %20 = vsyncpa [#allocation4], 0 }
   0xe   :  { %21 = vsyncpa [#allocation7], 0 }
   0xf   :  { %23 = vsyncpa [#allocation7 + $0x1], 0 }
  0x10   :  { %24 = vsyncpa [#allocation10], 0 }
  0x11   :  { %26 = vsyncpa [#allocation10 + $0x1], 0 }
  0x12   :  { %27 = vsyncpa [#allocation13], 0 }
  0x13   :  { %29 = vsyncpa [#allocation13 + $0x1], 0 }
  0x14   :  { %30 = vsyncpa [#allocation16], 0 }
  0x15   :  { %32 = vsyncpa [#allocation16 + $0x1], 0 }
  0x16   :  { %33 = vsyncpa [#allocation5], 0  ;;  %s7745_s18 = smov 0   ;;  %s7747_s19 = smov 0  }
  0x17   :  { %s7749_s20 = smov 0   ;;  %s7751_s21 = smov 0  }
  0x18 LB: > { %10886 = sst [smem:[#allocation25_spill]] %s7634_s20  ;;  %s7766_s22 = sadd.s32 1, %s7638_s21   ;;  %s7638_s21 = sphi %s7751_s21, %s11092_s21   ;;  %s7634_s20 = sphi %s7749_s20, %s11097_s20   ;;  %s7630_s19 = sphi %s7747_s19, %s11096_s19   ;;  %s7626_s18 = sphi %s7745_s18, %s11095_s18  }
  0x19   : > { %10887 = sst [smem:[#allocation26_spill]] %s7766_s22  ;;  %s67_s23 = sadd.s32 1, %s7634_s20 }
  0x1a   : > { %s64_s24 = ssub.s32 %s7638_s21, %s7766_s22  ;;  %p74_p0 = scmp.ne.s32.totalorder %s7634_s20, %s7630_s19 }
  0x1b   : > { %p65_p1 = scmp.eq.s32.totalorder %s64_s24, 0  ;;  %p75_p2 = scmp.eq.s32.totalorder %s7638_s21, 0 }
  0x1c   : > { %p6693_p3 = scmp.lt.s32.totalorder %s7638_s21, 2  ;;  %s7779_s26 = sand.u32 1, %s7638_s21  }
  0x1d   : > { %s7776_s25 = scalar_select %p65_p1, %s7634_s20, %s67_s23  }
  0x1e   : > { %p76_p4 = por %p75_p2, %p74_p0  ;;  %s7782_s27 = sand.u32 1, %s7634_s20  }
  0x1f   : > { %10888 = sst [smem:[#allocation27_spill]] %s7776_s25  ;;  %s7785_s28 = sshll.u32 %s7638_s21, 4 }
  0x20   : > { %s10889_s1 = sld [smem:[#allocation75_spill]]  ;;  %s475_s17 = scalar_lea.vmem [#allocation6], %s7782_s27 }
  0x21   : > { %s482_s23 = sshll.u32 %s475_s17, 4  ;;  %p7796_p5 = pnand %p6693_p3, %p76_p4  ;;  %s7794_s23 = int_to_ptr.vmem [resolvable:$true] %s482_s23 }
  0x22   : > { %s6636_s20 = smul.u32 3072, %s7638_s21 }
  0x23   : > { %p7807_p7 = pneg %p7796_p5 }
  0x26   : > { %s7791_s16 = scalar_lea.hbm %s10889_s1, %s7785_s28  ;;  %s7315_s14 = scalar_lea.hbm %s10889_s1, 32 }
  0x27   : > { %s7310_s15 = scalar_lea.hbm %s7791_s16, 16  ;;  %p7316_p10 = scmp.lt.s32.totalorder %s7791_s16, %s10889_s1 }
  0x28   : > { %p7311_p6 = scmp.ne.s32.totalorder %s7791_s16, %s7310_s15  ;;  %p7317_p11 = scmp.lt.s32.totalorder %s7315_s14, %s7310_s15 }
  0x2a   : > { %p7313_p8 = pnand %p7807_p7, %p7311_p6  ;;  %p7318_p12 = por %p7317_p11, %p7316_p10 }
  0x2c   : > { %p7314_p9 = pneg %p7313_p8 }
  0x2e   : > { %p7319_p13 = pnand %p7318_p12, %p7314_p9 }
  0x30   : > { %7322 = shalt.err (!%p7319_p13)
}
  0x31   : > { %s7323_s25 = scalar_lea.vmem %s7794_s23, 16  ;;  %s7640_s22 = smov [#allocation6]  }
  0x32   : > { %p7324_p0 = scmp.ne.s32.totalorder %s7794_s23, %s7323_s25  ;;  %s7328_s30 = sshll.u32 %s7640_s22, 4  ;;  %s7329_s30 = int_to_ptr.vmem [resolvable:$false] %s7328_s30 }
  0x33   : > { %s7330_s17 = scalar_lea.vmem %s7329_s30, 32  ;;  %p7331_p3 = scmp.lt.s32.totalorder %s7794_s23, %s7329_s30 }
  0x34   : > { %p7326_p1 = pnand %p7324_p0, %p7807_p7  ;;  %p7332_p4 = scmp.lt.s32.totalorder %s7330_s17, %s7323_s25 }
  0x36   : > { %p7327_p2 = pneg %p7326_p1  ;;  %p7333_p6 = por %p7332_p4, %p7331_p3 }
  0x38   : > { %p7334_p8 = pnand %p7333_p6, %p7327_p2 }
  0x3a   : > { %7337 = shalt.err (!%p7334_p8)
}
  0x3b   : > { %s10892_s10 = scalar_lea.sflag [#allocation7], %s7779_s26  ;;  %s10893_s3 = sld [smem:[#allocation76_spill]] }
  0x3c   : > { %6670 = dma.hbm_to_vmem [thread:$0]  (!%p7796_p5), %s7791_s16, 16, %s7794_s23, %s10892_s10  }
  0x3d   : > { %s10894_s22 = smul.u32 192, %s7782_s27  ;;  %s10809_s17 = scalar_lea.sflag [#allocation10], %s7779_s26 }
  0x3f   : > { %s510_s25 = scalar_lea.vmem [#allocation9], %s10894_s22 }
  0x40   : > { %s517_s30 = sshll.u32 %s510_s25, 4  ;;  %s7838_s30 = int_to_ptr.vmem [resolvable:$true] %s517_s30 }
  0x41   : > { %s7834_s15 = scalar_lea.hbm %s10893_s3, %s6636_s20  ;;  %s7343_s10 = scalar_lea.hbm %s10893_s3, 6144 }
  0x42   : > { %s7338_s1 = scalar_lea.hbm %s7834_s15, 3072  ;;  %p7344_p12 = scmp.lt.s32.totalorder %s7834_s15, %s10893_s3 }
  0x43   : > { %p7339_p9 = scmp.ne.s32.totalorder %s7834_s15, %s7338_s1  ;;  %p7345_p13 = scmp.lt.s32.totalorder %s7343_s10, %s7338_s1 }
  0x45   : > { %p7341_p10 = pnand %p7339_p9, %p7807_p7  ;;  %p7346_p0 = por %p7345_p13, %p7344_p12 }
  0x47   : > { %p7342_p11 = pneg %p7341_p10 }
  0x49   : > { %p7347_p1 = pnand %p7346_p0, %p7342_p11 }
  0x4b   : > { %7350 = shalt.err (!%p7347_p1)
}
  0x4c   : > { %s7351_s14 = scalar_lea.vmem %s7838_s30, 3072  ;;  %s7641_s22 = smov [#allocation9]  }
  0x4d   : > { %p7352_p2 = scmp.ne.s32.totalorder %s7838_s30, %s7351_s14  ;;  %s7356_s25 = sshll.u32 %s7641_s22, 4  ;;  %s7357_s25 = int_to_ptr.vmem [resolvable:$false] %s7356_s25 }
  0x4e   : > { %s7358_s16 = scalar_lea.vmem %s7357_s25, 6144  ;;  %p7359_p6 = scmp.lt.s32.totalorder %s7838_s30, %s7357_s25 }
  0x4f   : > { %p7354_p3 = pnand %p7352_p2, %p7807_p7  ;;  %p7360_p8 = scmp.lt.s32.totalorder %s7358_s16, %s7351_s14 }
  0x51   : > { %p7355_p4 = pneg %p7354_p3  ;;  %p7361_p9 = por %p7360_p8, %p7359_p6 }
  0x53   : > { %p7362_p10 = pnand %p7361_p9, %p7355_p4 }
  0x55   : > { %7365 = shalt.err (!%p7362_p10)
}
  0x56   : > { %s7642_s1 = smov 192   ;;  %s7643_s23 = smov 12  }
  0x57   : > { %6676 = dma.hbm_to_vmem [thread:$0]  (!%p7796_p5), %s7834_s15, 3072, %s7838_s30, %s10809_s17, %s7642_s1, %s7642_s1, %s7643_s23  }
  0x58   : > { %s10895_s7 = sld [smem:[#allocation79_spill]]  ;;  %s564_s14 = scalar_lea.vmem [#allocation12], %s7782_s27 }
  0x59   : > { %s571_s22 = sshll.u32 %s564_s14, 4  ;;  %s10806_s25 = scalar_lea.sflag [#allocation13], %s7779_s26  ;;  %s572_s22 = int_to_ptr.vmem [resolvable:$true] %s571_s22 }
  0x5e   : > { %s7867_s13 = scalar_lea.hbm %s10895_s7, %s7785_s28  ;;  %s7371_s15 = scalar_lea.hbm %s10895_s7, 32 }
  0x5f   : > { %s7366_s16 = scalar_lea.hbm %s7867_s13, 16  ;;  %p7372_p0 = scmp.lt.s32.totalorder %s7867_s13, %s10895_s7 }
  0x60   : > { %p7367_p11 = scmp.ne.s32.totalorder %s7867_s13, %s7366_s16  ;;  %p7373_p1 = scmp.lt.s32.totalorder %s7371_s15, %s7366_s16 }
  0x62   : > { %p7369_p12 = pnand %p7367_p11, %p7807_p7  ;;  %p7374_p2 = por %p7373_p1, %p7372_p0 }
  0x64   : > { %p7370_p13 = pneg %p7369_p12 }
  0x66   : > { %p7375_p3 = pnand %p7374_p2, %p7370_p13 }
  0x68   : > { %7378 = shalt.err (!%p7375_p3)
}
  0x69   : > { %s7379_s23 = scalar_lea.vmem %s572_s22, 16  ;;  %s7644_s10 = smov [#allocation12]  }
  0x6a   : > { %p7380_p4 = scmp.ne.s32.totalorder %s572_s22, %s7379_s23  ;;  %s7384_s20 = sshll.u32 %s7644_s10, 4  ;;  %s7385_s20 = int_to_ptr.vmem [resolvable:$false] %s7384_s20 }
  0x6b   : > { %s7386_s14 = scalar_lea.vmem %s7385_s20, 32  ;;  %p7387_p9 = scmp.lt.s32.totalorder %s572_s22, %s7385_s20 }
  0x6c   : > { %p7382_p6 = pnand %p7380_p4, %p7807_p7  ;;  %p7388_p10 = scmp.lt.s32.totalorder %s7386_s14, %s7379_s23 }
  0x6e   : > { %p7383_p8 = pneg %p7382_p6  ;;  %p7389_p11 = por %p7388_p10, %p7387_p9 }
  0x70   : > { %p7390_p12 = pnand %p7389_p11, %p7383_p8 }
  0x72   : > { %7393 = shalt.err (!%p7390_p12)
}
  0x73   : > { %6682 = dma.hbm_to_vmem [thread:$0]  (!%p7796_p5), %s7867_s13, 16, %s572_s22, %s10806_s25  }
  0x74   : > { %s5831_s3 = sshll.u32 %s7782_s27, 8  ;;  %s6014_s4 = sshll.u32 %s7638_s21, 12 }
  0x75   : > { %s10896_s9 = sld [smem:[#allocation80_spill]]  ;;  %s599_s1 = scalar_lea.vmem [#allocation15], %s5831_s3 }
  0x76   : > { %s606_s23 = sshll.u32 %s599_s1, 4  ;;  %s10807_s10 = scalar_lea.sflag [#allocation16], %s7779_s26  ;;  %s7900_s23 = int_to_ptr.vmem [resolvable:$true] %s606_s23 }
  0x7b   : > { %s7896_s30 = scalar_lea.hbm %s10896_s9, %s6014_s4  ;;  %s7399_s14 = scalar_lea.hbm %s10896_s9, 8192 }
  0x7c   : > { %s7394_s20 = scalar_lea.hbm %s7896_s30, 4096  ;;  %p7400_p2 = scmp.lt.s32.totalorder %s7896_s30, %s10896_s9 }
  0x7d   : > { %p7395_p13 = scmp.ne.s32.totalorder %s7896_s30, %s7394_s20  ;;  %p7401_p3 = scmp.lt.s32.totalorder %s7399_s14, %s7394_s20 }
  0x7f   : > { %p7397_p0 = pnand %p7395_p13, %p7807_p7  ;;  %p7402_p4 = por %p7401_p3, %p7400_p2 }
  0x81   : > { %p7398_p1 = pneg %p7397_p0 }
  0x83   : > { %p7403_p6 = pnand %p7402_p4, %p7398_p1 }
  0x85   : > { %7406 = shalt.err (!%p7403_p6)
}
  0x86   : > { %s7407_s1 = scalar_lea.vmem %s7900_s23, 4096  ;;  %s7645_s25 = smov [#allocation15]  }
  0x87   : > { %p7408_p8 = scmp.ne.s32.totalorder %s7900_s23, %s7407_s1  ;;  %s7412_s13 = sshll.u32 %s7645_s25, 4  ;;  %s7413_s13 = int_to_ptr.vmem [resolvable:$false] %s7412_s13 }
  0x88   : > { %s7414_s22 = scalar_lea.vmem %s7413_s13, 8192  ;;  %p7415_p11 = scmp.lt.s32.totalorder %s7900_s23, %s7413_s13 }
  0x89   : > { %p7410_p9 = pnand %p7408_p8, %p7807_p7  ;;  %p7416_p12 = scmp.lt.s32.totalorder %s7414_s22, %s7407_s1 }
  0x8b   : > { %p7411_p10 = pneg %p7410_p9  ;;  %p7417_p13 = por %p7416_p12, %p7415_p11 }
  0x8d   : > { %p7418_p0 = pnand %p7417_p13, %p7411_p10 }
  0x8f   : > { %7421 = shalt.err (!%p7418_p0)
}
  0x90   : > { %s7646_s20 = smov 256   ;;  %s7647_s25 = smov 16  }
  0x91   : > { %6688 = dma.hbm_to_vmem [thread:$0]  (!%p7796_p5), %s7896_s30, 4096, %s7900_s23, %s10807_s10, %s7646_s20, %s7646_s20, %s7647_s25  }
  0x92   : > { %s7930_s15 = scalar_lea.hbm %s10798_s11, %s6014_s4  ;;  %s7934_s1 = scalar_lea.vmem [#allocation17], %s5831_s3 }
  0x93   : > { %s7938_s22 = sadd.s32 4294967295, %s7638_s21   ;;  %p80_p1 = scmp.ne.s32.totalorder %s7630_s19, %s7626_s18 }
  0x94   : > { %p10810_p2 = scmp.eq.s32.totalorder %s7938_s22, 0  ;;  %p5820_p3 = scmp.ge.s32.totalorder %s7638_s21, 1 }
  0x95   : > { %p440_p4 = scmp.lt.s32.totalorder %s7638_s21, 3  ;;  %s7648_s30 = smov [#allocation3]  }
  0x96   : > { %p7948_p8 = por %p10810_p2, %p80_p1  ;;  %s452_s23 = sshll.u32 %s7648_s30, 4  ;;  %s453_s23 = int_to_ptr.vmem [resolvable:$true] %s452_s23 }
  0x97   : > { %p7952_p9 = pnand %p5820_p3, %p440_p4  ;;  %s7962_s25 = scalar_lea.hbm %s10789_s2, %s7785_s28 }
  0x98   : > { %s10897_s4 = scalar_select %p7948_p8, 1, 0 }
  0x99   : > { %s10898_s3 = scalar_select %p7952_p9, 1, 0 }
  0x9a   : > { %p6663_p10 = pneg %p7952_p9  ;;  %s492_s16 = scalar_lea.vmem [#allocation8], %s7782_s27 }
  0x9b   : > { %s499_s10 = sshll.u32 %s492_s16, 4  ;;  %s7433_s30 = scalar_lea.vmem %s453_s23, 1536  ;;  %s7971_s10 = int_to_ptr.vmem [resolvable:$true] %s499_s10 }
  0x9c   : > { %p7966_p11 = pnand %p6663_p10, %p10810_p2  ;;  %p7434_p13 = scmp.ne.s32.totalorder %s453_s23, %s7433_s30 }
  0x9d   : > { %p7441_p3 = scmp.lt.s32.totalorder %s453_s23, %s453_s23  ;;  %p7442_p4 = scmp.lt.s32.totalorder %s7433_s30, %s7433_s30 }
  0x9e   : > { %p7424_p12 = pneg %p7966_p11 }
  0x9f   : > { %p7443_p6 = por %p7442_p4, %p7441_p3 }
  0xa0   : > { %p7436_p0 = pnand %p7434_p13, %p7424_p12 }
  0xa2   : > { %p7437_p1 = pneg %p7436_p0 }
  0xa4   : > { %p7444_p8 = pnand %p7443_p6, %p7437_p1 }
  0xa6   : > { %7447 = shalt.err (!%p7444_p8)
}
  0xa7   : > { %s7649_s18 = smov 128   ;;  %s7650_s20 = smov 8  }
  0xa8   : > { %s10900_s0 = sld [smem:[#allocation74_spill]]  ;;  %s7448_s13 = scalar_lea.hbm %s7962_s25, 16 }
  0xa9   : > { %p7449_p10 = scmp.ne.s32.totalorder %s7962_s25, %s7448_s13  ;;  %s7453_s9 = scalar_lea.hbm %s10789_s2, 32 }
  0xaa   : > { %p7454_p6 = scmp.lt.s32.totalorder %s7962_s25, %s10789_s2  ;;  %p7455_p8 = scmp.lt.s32.totalorder %s7453_s9, %s7448_s13 }
  0xab   : > { %p7451_p12 = pnand %p7449_p10, %p7807_p7 }
  0xac   : > { %p7456_p0 = por %p7455_p8, %p7454_p6 }
  0xad   : > { %p7452_p13 = pneg %p7451_p12 }
  0xae   : > { %6666 = dma.hbm_to_vmem [thread:$0]  (!%p7966_p11), %s10900_s0, 1536, %s453_s23, [#allocation4], %s7649_s18, %s7649_s18, %s7650_s20  }
  0xaf   : > { %p7457_p1 = pnand %p7456_p0, %p7452_p13 }
  0xb1   : > { %7460 = shalt.err (!%p7457_p1)
}
  0xb2   : > { %s7461_s17 = scalar_lea.vmem %s7971_s10, 16  ;;  %s7651_s23 = smov [#allocation8]  }
  0xb3   : > { %p7462_p11 = scmp.ne.s32.totalorder %s7971_s10, %s7461_s17  ;;  %s7466_s7 = sshll.u32 %s7651_s23, 4  ;;  %s7467_s7 = int_to_ptr.vmem [resolvable:$false] %s7466_s7 }
  0xb4   : > { %s7468_s14 = scalar_lea.vmem %s7467_s7, 32  ;;  %p7469_p10 = scmp.lt.s32.totalorder %s7971_s10, %s7467_s7 }
  0xb5   : > { %p7464_p3 = pnand %p7462_p11, %p7807_p7  ;;  %p7470_p12 = scmp.lt.s32.totalorder %s7468_s14, %s7461_s17 }
  0xb7   : > { %p7465_p4 = pneg %p7464_p3  ;;  %p7471_p2 = por %p7470_p12, %p7469_p10 }
  0xb9   : > { %p7472_p9 = pnand %p7471_p2, %p7465_p4 }
  0xbb   : > { %7475 = shalt.err (!%p7472_p9)
}
  0xbc   : > { %s10901_s6 = scalar_lea.sflag [#allocation7], %s7779_s26  ;;  %s6013_s9 = sshll.u32 %s7638_s21, 10 }
  0xbd   : > { %6673 = dma.hbm_to_vmem [thread:$0]  (!%p7796_p5), %s7962_s25, 16, %s7971_s10, %s10901_s6  }
  0xbe   : > { %s10902_s12 = sshll.u32 %s7782_s27, 6  ;;  %s8009_s30 = scalar_lea.hbm %s10792_s5, %s6013_s9 }
  0xbf   : > { %s538_s13 = scalar_lea.vmem [#allocation11], %s10902_s12  ;;  %s7476_s17 = scalar_lea.hbm %s8009_s30, 1024 }
  0xc0   : > { %s545_s18 = sshll.u32 %s538_s13, 4  ;;  %p7477_p2 = scmp.ne.s32.totalorder %s8009_s30, %s7476_s17  ;;  %s8011_s18 = int_to_ptr.vmem [resolvable:$true] %s545_s18 }
  0xc1   : > { %s7481_s25 = scalar_lea.hbm %s10792_s5, 2048  ;;  %p7482_p6 = scmp.lt.s32.totalorder %s8009_s30, %s10792_s5 }
  0xc2   : > { %p7479_p9 = pnand %p7477_p2, %p7807_p7  ;;  %p7483_p8 = scmp.lt.s32.totalorder %s7481_s25, %s7476_s17 }
  0xc4   : > { %p7480_p13 = pneg %p7479_p9  ;;  %p7484_p0 = por %p7483_p8, %p7482_p6 }
  0xc6   : > { %p7485_p1 = pnand %p7484_p0, %p7480_p13 }
  0xc8   : > { %7488 = shalt.err (!%p7485_p1)
}
  0xc9   : > { %s7489_s14 = scalar_lea.vmem %s8011_s18, 1024  ;;  %s7652_s6 = smov [#allocation11]  }
  0xca   : > { %p7490_p11 = scmp.ne.s32.totalorder %s8011_s18, %s7489_s14  ;;  %s7494_s9 = sshll.u32 %s7652_s6, 4  ;;  %s7495_s9 = int_to_ptr.vmem [resolvable:$false] %s7494_s9 }
  0xcb   : > { %s7496_s12 = scalar_lea.vmem %s7495_s9, 2048  ;;  %p7497_p10 = scmp.lt.s32.totalorder %s8011_s18, %s7495_s9 }
  0xcc   : > { %p7492_p3 = pnand %p7490_p11, %p7807_p7  ;;  %p7498_p12 = scmp.lt.s32.totalorder %s7496_s12, %s7489_s14 }
  0xce   : > { %p7493_p4 = pneg %p7492_p3  ;;  %p7499_p2 = por %p7498_p12, %p7497_p10 }
  0xd0   : > { %p7500_p9 = pnand %p7499_p2, %p7493_p4 }
  0xd2   : > { %7503 = shalt.err (!%p7500_p9)
}
  0xd3   : > { %s7653_s13 = smov 64   ;;  %s7654_s20 = smov 4  }
  0xd4   : > { %s10903_s16 = scalar_lea.sflag [#allocation10], %s7779_s26  ;;  %s8042_s21 = scalar_lea.hbm %s10795_s8, %s7785_s28 }
  0xd5   : > { %6679 = dma.hbm_to_vmem [thread:$0]  (!%p7796_p5), %s8009_s30, 1024, %s8011_s18, %s10903_s16, %s7653_s13, %s7653_s13, %s7654_s20  }
  0xd6   : > { %s10904_s25 = sshll.u32 %s7934_s1, 4  ;;  %s581_s23 = scalar_lea.vmem [#allocation14], %s7782_s27  ;;  %s8046_s25 = int_to_ptr.vmem [resolvable:$true] %s10904_s25 }
  0xd7   : > { %s588_s7 = sshll.u32 %s581_s23, 4  ;;  %s7504_s14 = scalar_lea.hbm %s8042_s21, 16  ;;  %s589_s7 = int_to_ptr.vmem [resolvable:$true] %s588_s7 }
  0xd8   : > { %p7505_p13 = scmp.ne.s32.totalorder %s8042_s21, %s7504_s14  ;;  %s7509_s6 = scalar_lea.hbm %s10795_s8, 32 }
  0xd9   : > { %p7510_p0 = scmp.lt.s32.totalorder %s8042_s21, %s10795_s8  ;;  %p7511_p1 = scmp.lt.s32.totalorder %s7509_s6, %s7504_s14 }
  0xda   : > { %p7507_p6 = pnand %p7505_p13, %p7807_p7 }
  0xdb   : > { %p7512_p11 = por %p7511_p1, %p7510_p0 }
  0xdc   : > { %p7508_p8 = pneg %p7507_p6 }
  0xde   : > { %p7513_p3 = pnand %p7512_p11, %p7508_p8 }
  0xe0   : > { %7516 = shalt.err (!%p7513_p3)
}
  0xe1   : > { %s7517_s27 = scalar_lea.vmem %s589_s7, 16  ;;  %s7655_s1 = smov [#allocation14]  }
  0xe2   : > { %p7518_p4 = scmp.ne.s32.totalorder %s589_s7, %s7517_s27  ;;  %s7522_s12 = sshll.u32 %s7655_s1, 4  ;;  %s7523_s12 = int_to_ptr.vmem [resolvable:$false] %s7522_s12 }
  0xe3   : > { %s7524_s16 = scalar_lea.vmem %s7523_s12, 32  ;;  %p7525_p2 = scmp.lt.s32.totalorder %s589_s7, %s7523_s12 }
  0xe4   : > { %p7520_p10 = pnand %p7518_p4, %p7807_p7  ;;  %p7526_p9 = scmp.lt.s32.totalorder %s7524_s16, %s7517_s27 }
  0xe6   : > { %p7521_p12 = pneg %p7520_p10  ;;  %p7527_p13 = por %p7526_p9, %p7525_p2 }
  0xe8   : > { %p7528_p6 = pnand %p7527_p13, %p7521_p12 }
  0xea   : > { %7531 = shalt.err (!%p7528_p6)
}
  0xeb   : > { %s10905_s17 = scalar_lea.sflag [#allocation13], %s7779_s26  ;;  %s7532_s10 = scalar_lea.hbm %s7930_s15, 4096 }
  0xec   : > { %6685 = dma.hbm_to_vmem [thread:$0]  (!%p7796_p5), %s8042_s21, 16, %s589_s7, %s10905_s17  }
  0xed   : > { %p7533_p8 = scmp.ne.s32.totalorder %s7930_s15, %s7532_s10  ;;  %s7537_s18 = scalar_lea.hbm %s10798_s11, 8192 }
  0xee   : > { %p7538_p11 = scmp.lt.s32.totalorder %s7930_s15, %s10798_s11  ;;  %p7539_p3 = scmp.lt.s32.totalorder %s7537_s18, %s7532_s10 }
  0xef   : > { %p7535_p0 = pnand %p7533_p8, %p7807_p7 }
  0xf0   : > { %p7540_p4 = por %p7539_p3, %p7538_p11 }
  0xf1   : > { %p7536_p1 = pneg %p7535_p0 }
  0xf3   : > { %p7541_p10 = pnand %p7540_p4, %p7536_p1 }
  0xf5   : > { %7544 = shalt.err (!%p7541_p10)
}
  0xf6   : > { %s7545_s21 = scalar_lea.vmem %s8046_s25, 4096  ;;  %s7656_s7 = smov [#allocation17]  }
  0xf7   : > { %p7546_p12 = scmp.ne.s32.totalorder %s8046_s25, %s7545_s21  ;;  %s7550_s28 = sshll.u32 %s7656_s7, 4  ;;  %s7551_s28 = int_to_ptr.vmem [resolvable:$false] %s7550_s28 }
  0xf8   : > { %s7552_s9 = scalar_lea.vmem %s7551_s28, 8192  ;;  %p7553_p13 = scmp.lt.s32.totalorder %s8046_s25, %s7551_s28 }
  0xf9   : > { %p7548_p2 = pnand %p7546_p12, %p7807_p7  ;;  %p7554_p6 = scmp.lt.s32.totalorder %s7552_s9, %s7545_s21 }
  0xfb   : > { %p7549_p9 = pneg %p7548_p2  ;;  %p7555_p8 = por %p7554_p6, %p7553_p13 }
  0xfd   : > { %p7556_p0 = pnand %p7555_p8, %p7549_p9 }
  0xff   : > { %7559 = shalt.err (!%p7556_p0)
}
 0x100   : > { %s10906_s27 = scalar_lea.sflag [#allocation16], %s7779_s26  ;;  %p10907_p7 = scmp.ne.s32.totalorder %s10898_s3, 0 }
 0x101   : > { %6691 = dma.hbm_to_vmem [thread:$0]  (!%p7796_p5), %s7930_s15, 4096, %s8046_s25, %s10906_s27, %s7653_s13, %s7653_s13, %s7654_s20  }
 0x102   : > { %652 = sbr.rel (%p10907_p7) target bundleno = 3384 (0xd38), region = 80 }
 0x107   : > { %p10908_p1 = scmp.eq.s32.totalorder %s7938_s22, 0 }
 0x109   : > { %7601 = dma.done.wait (%p10908_p1), [#allocation4], 1536   ;;  %p10909_p11 = pmov %p10908_p1 }
 0x10a   : > { %s658_s24 = sand.u32 1, %s7938_s22   ;;  %s8100_s29 = sand.u32 1, %s7630_s19  }
 0x10b   : > { %7603 = vsyncadd (%p10909_p11), [#allocation4], 4294965760  ;;  %s659_s26 = scalar_lea.sflag [#allocation7], %s658_s24  ;;  %p10910_p3 = scmp.ne.s32.totalorder %s10897_s4, 0 }
 0x10d   : > { %7605 = dma.done.wait (%p10910_p3), %s659_s26, 32  }
 0x10e   : > { %7607 = vsyncadd (%p10910_p3), %s659_s26, 4294967264  ;;  %s6637_s15 = smul.u32 192, %s8100_s29  ;;  %s675_s13 = scalar_lea.sflag [#allocation10], %s658_s24 }
 0x110   : > { %s8109_s20 = scalar_lea.vmem [#allocation9], %s6637_s15 }
 0x111   : > { %7609 = dma.done.wait (%p10910_p3), %s675_s13, 4096  }
 0x112   : > { %7611 = vsyncadd (%p10910_p3), %s675_s13, 4294963200  ;;  %s5839_s25 = sshll.u32 %s8100_s29, 6  ;;  %s693_s16 = scalar_lea.sflag [#allocation13], %s658_s24 }
 0x113   : > { %s8116_s12 = scalar_lea.vmem [#allocation11], %s5839_s25 }
 0x114   : > { %7613 = dma.done.wait (%p10910_p3), %s693_s16, 32  }
 0x115   : > { %7615 = vsyncadd (%p10910_p3), %s693_s16, 4294967264  ;;  %s5840_s10 = sshll.u32 %s8100_s29, 8  ;;  %s709_s14 = scalar_lea.sflag [#allocation16], %s658_s24 }
 0x116   : > { %s8125_s18 = scalar_lea.vmem [#allocation15], %s5840_s10 }
 0x117   : > { %7617 = dma.done.wait (%p10910_p3), %s709_s14, 8192  }
 0x118   : > { %7619 = vsyncadd (%p10910_p3), %s709_s14, 4294959104  ;;  %p808_p5 = scmp.lt.s32.totalorder %s7938_s22, 1  ;;  %s10911_s28 = sld [smem:[#allocation78_spill]] }
 0x119   : > { %s10912_s15 = sld [smem:[#allocation82_spill]]  ;;  %s8155_s0 = scalar_lea.vmem [#allocation17], %s5840_s10 }
 0x11a   : > { %s8133_s30 = scalar_select %p808_p5, %s7938_s22, 1 }
 0x11b   : > { %s10913_s16 = sld [smem:[#allocation77_spill]]  ;;  %p10915_p4 = scmp.ne.s32.totalorder %s7938_s22, 0 }
 0x11c   : > { %s6638_s6 = smul.u32 3, %s8133_s30  ;;  %s5842_s27 = sshll.u32 %s8133_s30, 2 }
 0x11d   : > { %s10914_s3 = sld [smem:[#allocation81_spill]] }
 0x11e   : > { %s814_s9 = scalar_lea.vmem %s10911_s28, %s8133_s30 }
 0x11f   : > { %s821_s4 = scalar_lea.vmem %s10912_s15, %s8133_s30  ;;  %826 = sbr.rel (%p10915_p4) target bundleno = 299 (0x12b), region = 120 }
 0x121   : > { %s8148_s14 = scalar_lea.vmem %s10913_s16, %s6638_s6 }
 0x123   : > { %s8153_s1 = scalar_lea.vmem %s10914_s3, %s5842_s27 }
 0x124   : > { %v827_v0 = vld [vmem:[#allocation3] sm:$0xff]  ;;  %v828_v1 = vld [vmem:[#allocation3 + $0x8] sm:$0xff]  ;;  %v829_v2 = vld [vmem:[#allocation3 + $0x10] sm:$0xff] }
 0x125   : > { %839 = vst [vmem:[#allocation2 + $0x30] sm:$0xff] %v827_v0  ;;  %840 = vst [vmem:[#allocation2] sm:$0xff] %v828_v1  ;;  %v830_v3 = vld [vmem:[#allocation3 + $0x18] sm:$0xff]  ;;  %v831_v4 = vld [vmem:[#allocation3 + $0x20] sm:$0xff] }
 0x126   : > { %841 = vst [vmem:[#allocation2 + $0x58] sm:$0xff] %v829_v2  ;;  %v832_v5 = vld [vmem:[#allocation3 + $0x28] sm:$0xff]  ;;  %842 = vst [vmem:[#allocation2 + $0x18] sm:$0xff] %v830_v3  ;;  %v833_v6 = vld [vmem:[#allocation3 + $0x30] sm:$0xff] }
 0x127   : > { %843 = vst [vmem:[#allocation2 + $0x50] sm:$0xff] %v831_v4  ;;  %844 = vst [vmem:[#allocation2 + $0x20] sm:$0xff] %v832_v5  ;;  %v834_v7 = vld [vmem:[#allocation3 + $0x38] sm:$0xff]  ;;  %v835_v8 = vld [vmem:[#allocation3 + $0x40] sm:$0xff] }
 0x128   : > { %845 = vst [vmem:[#allocation2 + $0x8] sm:$0xff] %v833_v6  ;;  %846 = vst [vmem:[#allocation2 + $0x38] sm:$0xff] %v834_v7  ;;  %v836_v9 = vld [vmem:[#allocation3 + $0x48] sm:$0xff]  ;;  %v837_v10 = vld [vmem:[#allocation3 + $0x50] sm:$0xff] }
 0x129   : > { %847 = vst [vmem:[#allocation2 + $0x28] sm:$0xff] %v835_v8  ;;  %v838_v11 = vld [vmem:[#allocation3 + $0x58] sm:$0xff]  ;;  %848 = vst [vmem:[#allocation2 + $0x48] sm:$0xff] %v836_v9 }
 0x12a   : > { %849 = vst [vmem:[#allocation2 + $0x10] sm:$0xff] %v837_v10  ;;  %850 = vst [vmem:[#allocation2 + $0x40] sm:$0xff] %v838_v11 }
 0x12b PF: > { %v6746_v8 = vld [vmem:[%s8109_s20 + $0xac] ss:$12 sps:$4 sm:$0xff]   ;;  %v6748_v9 = vld [vmem:[%s8109_s20 + $0xa8] ss:$12 sps:$4 sm:$0xff]   ;;  %v6751_v11 = vld [vmem:[%s8109_s20 + $0xb0] ss:$12 sps:$4 sm:$0xff]  }
 0x12c   : > { %v851_v12 = vld [vmem:[#allocation2 + $0x30] sm:$0xff]  ;;  %v852_v14 = vld [vmem:[#allocation2] sm:$0xff]  ;;  %1301 = vmatprep.subr.bf16.mxu0 %v6746_v8  ;;  %6291 = vmatprep.subr.bf16.mxu1 %v6751_v11  ;;  %s10916_s3 = scalar_lea.vmem [#allocation6], %s8100_s29  ;;  %s7660_s17 = smov 96  }
 0x12d   : > { %v853_v13 = vld [vmem:[#allocation2 + $0x58] sm:$0xff]  ;;  %865 = vadd.xlane.f32.xlu0 %v851_v12  ;;  %1302 = vmatpush1.bf16.msra.mxu0 %v6748_v9  ;;  %s7661_s10 = smov 64   ;;  %s7662_s23 = smov 32  }
 0x12e   : > { %869 = vadd.xlane.f32.xlu1 %v853_v13  ;;  %v854_v15 = vld [vmem:[#allocation2 + $0x18] sm:$0xff]  ;;  %v855_v16 = vld [vmem:[#allocation2 + $0x50] sm:$0xff]  ;;  %v856_v17 = vld [vmem:[#allocation2 + $0x20] sm:$0xff]  ;;  %6292 = vmatpush3.bf16.msra.mxu1 %v6751_v11  ;;  %s11001_s7 = scalar_lea.vmem [#allocation14], %s8100_s29  ;;  %p5994_p10 = scmp.ne.s32.totalorder %s7938_s22, 1 }
 0x12f   : > { %v857_v18 = vld [vmem:[#allocation2 + $0x8] sm:$0xff]  ;;  %v858_v19 = vld [vmem:[#allocation2 + $0x38] sm:$0xff]  ;;  %s11090_s26 = sld [smem:[#allocation84_spill]] (!%p5994_p10) }
 0x130   : > { %v859_v20 = vld [vmem:[#allocation2 + $0x28] sm:$0xff]  ;;  %v6749_v10 = vld [vmem:[%s8109_s20 + $0x94] ss:$12 sps:$4 sm:$0xff]  }
 0x131   : > { %867 = vadd.xlane.f32.xlu0 %v852_v14  ;;  %v860_v21 = vld [vmem:[#allocation2 + $0x48] sm:$0xff]  ;;  %v861_v22 = vld [vmem:[#allocation2 + $0x10] sm:$0xff]  ;;  %v862_v23 = vld [vmem:[#allocation2 + $0x40] sm:$0xff]  ;;  %1303 = vmatprep.subr.bf16.mxu0 %v6749_v10 }
 0x132   : > { %871 = vadd.xlane.f32.xlu1 %v854_v15 }
 0x135   : > { %873 = vadd.xlane.f32.xlu0 %v855_v16 }
 0x136   : > { %875 = vadd.xlane.f32.xlu1 %v856_v17 }
 0x139   : > { %877 = vadd.xlane.f32.xlu0 %v857_v18 }
 0x13a   : > { %879 = vadd.xlane.f32.xlu1 %v858_v19 }
 0x13d   : > { %881 = vadd.xlane.f32.xlu0 %v859_v20 }
 0x13e   : > { %883 = vadd.xlane.f32.xlu1 %v860_v21 }
 0x141   : > { %885 = vadd.xlane.f32.xlu0 %v861_v22 }
 0x142   : > { %887 = vadd.xlane.f32.xlu1 %v862_v23 }
 0x1b6   : > { %v866_v24 = vpop.xlane.xlu0 %865 }
 0x1b7   : > { %v870_v25 = vpop.xlane.xlu1 %869  ;;  %v890_v26 = vmul.f32 0.0078125, %v866_v24  ;;  %v6768_v24 = vld [vmem:[%s8109_s20 + $0x30] ss:$12 sps:$4 sm:$0xff]  }
 0x1b8   : > { %v892_v27 = vmul.f32 0.0078125, %v870_v25  ;;  %v6769_v25 = vld [vmem:[%s8109_s20 + $0x1c] ss:$12 sps:$4 sm:$0xff]  }
 0x1b9   : > { %v8159_v28 = vsub.f32 %v851_v12, %v890_v26  ;;  %v6752_v12 = vld [vmem:[%s8109_s20 + $0x90] ss:$12 sps:$4 sm:$0xff]   ;;  %v6771_v26 = vld [vmem:[%s8109_s20 + $0x38] ss:$12 sps:$4 sm:$0xff]  }
 0x1ba   : > { %v8161_v29 = vsub.f32 %v853_v13, %v892_v27  ;;  %v868_v30 = vpop.xlane.xlu0 %867  ;;  %1304 = vmatpush1.bf16.msra.mxu0 %v6752_v12  ;;  %v6753_v13 = vld [vmem:[%s8109_s20 + $0x7c] ss:$12 sps:$4 sm:$0xff]   ;;  %v6772_v27 = vld [vmem:[%s8109_s20 + $0x18] ss:$12 sps:$4 sm:$0xff]  }
 0x1bb   : > { %v872_v31 = vpop.xlane.xlu1 %871  ;;  %v891_v32 = vmul.f32 0.0078125, %v868_v30  ;;  %v914_v33 = vmul.f32 %v8159_v28, %v8159_v28  ;;  %1305 = vmatprep.subr.bf16.mxu0 %v6753_v13  ;;  %v6773_v30 = vld [vmem:[%s8109_s20 + $0x4] ss:$12 sps:$4 sm:$0xff]  }
 0x1bc   : > { %v893_v34 = vmul.f32 0.0078125, %v872_v31  ;;  %v916_v35 = vmul.f32 %v8161_v29, %v8161_v29  ;;  %v6775_v31 = vld [vmem:[%s8109_s20 + $0x20] ss:$12 sps:$4 sm:$0xff]  }
 0x1bd   : > { %926 = vadd.xlane.f32.xlu0 %v914_v33  ;;  %v8167_v36 = vsub.f32 %v852_v14, %v891_v32  ;;  %v6755_v14 = vld [vmem:[%s8109_s20 + $0x98] ss:$12 sps:$4 sm:$0xff]   ;;  %v6776_v32 = vld [vmem:[%s8109_s20] ss:$12 sps:$4 sm:$0xff]   ;;  %v6777_v33 = vld [vmem:[%s8109_s20 + $0x8] ss:$12 sps:$4 sm:$0xff]  }
 0x1be   : > { %v8169_v37 = vsub.f32 %v854_v15, %v893_v34  ;;  %v874_v38 = vpop.xlane.xlu0 %873  ;;  %v6756_v15 = vld [vmem:[%s8109_s20 + $0x78] ss:$12 sps:$4 sm:$0xff]   ;;  %6293 = vmatprep.subr.bf16.mxu1 %v6755_v14  ;;  %v10815_v34 = vmov 0  }
 0x1bf   : > { %v876_v39 = vpop.xlane.xlu1 %875  ;;  %v894_v40 = vmul.f32 0.0078125, %v874_v38  ;;  %v915_v41 = vmul.f32 %v8167_v36, %v8167_v36  ;;  %1306 = vmatpush1.bf16.msra.mxu0 %v6756_v15  ;;  %6294 = vmatpush3.bf16.msra.mxu1 %v6755_v14 }
 0x1c0   : > { %v895_v42 = vmul.f32 0.0078125, %v876_v39  ;;  %v917_v43 = vmul.f32 %v8169_v37, %v8169_v37  ;;  %1333 = vmatprep.mubr.bf16.mxu0 %v10815_v34 }
 0x1c1   : > { %930 = vadd.xlane.f32.xlu0 %v916_v35  ;;  %928 = vadd.xlane.f32.xlu1 %v915_v41  ;;  %v8175_v44 = vsub.f32 %v855_v16, %v894_v40  ;;  %v6757_v16 = vld [vmem:[%s8109_s20 + $0x64] ss:$12 sps:$4 sm:$0xff]  }
 0x1c2   : > { %v8177_v45 = vsub.f32 %v856_v17, %v895_v42  ;;  %v878_v46 = vpop.xlane.xlu0 %877  ;;  %v6759_v17 = vld [vmem:[%s8109_s20 + $0x80] ss:$12 sps:$4 sm:$0xff]   ;;  %1307 = vmatprep.subr.bf16.mxu0 %v6757_v16 }
 0x1c3   : > { %v880_v47 = vpop.xlane.xlu1 %879  ;;  %v896_v48 = vmul.f32 0.0078125, %v878_v46  ;;  %v918_v49 = vmul.f32 %v8175_v44, %v8175_v44  ;;  %6295 = vmatprep.subr.bf16.mxu1 %v6759_v17 }
 0x1c4   : > { %v897_v50 = vmul.f32 0.0078125, %v880_v47  ;;  %v919_v51 = vmul.f32 %v8177_v45, %v8177_v45  ;;  %6296 = vmatpush3.bf16.msra.mxu1 %v6759_v17 }
 0x1c5   : > { %932 = vadd.xlane.f32.xlu1 %v917_v43  ;;  %934 = vadd.xlane.f32.xlu0 %v918_v49  ;;  %v8183_v52 = vsub.f32 %v857_v18, %v896_v48  ;;  %v6760_v18 = vld [vmem:[%s8109_s20 + $0x60] ss:$12 sps:$4 sm:$0xff]  }
 0x1c6   : > { %v8185_v53 = vsub.f32 %v858_v19, %v897_v50  ;;  %v882_v54 = vpop.xlane.xlu0 %881  ;;  %1308 = vmatpush1.bf16.msra.mxu0 %v6760_v18  ;;  %v6761_v19 = vld [vmem:[%s8109_s20 + $0x4c] ss:$12 sps:$4 sm:$0xff]  }
 0x1c7   : > { %v884_v55 = vpop.xlane.xlu1 %883  ;;  %v898_v56 = vmul.f32 0.0078125, %v882_v54  ;;  %v920_v57 = vmul.f32 %v8183_v52, %v8183_v52  ;;  %1309 = vmatprep.subr.bf16.mxu0 %v6761_v19 }
 0x1c8   : > { %v899_v58 = vmul.f32 0.0078125, %v884_v55  ;;  %v921_v59 = vmul.f32 %v8185_v53, %v8185_v53 }
 0x1c9   : > { %936 = vadd.xlane.f32.xlu1 %v919_v51  ;;  %938 = vadd.xlane.f32.xlu0 %v920_v57  ;;  %v8191_v60 = vsub.f32 %v859_v20, %v898_v56  ;;  %v6763_v20 = vld [vmem:[%s8109_s20 + $0x68] ss:$12 sps:$4 sm:$0xff]  }
 0x1ca   : > { %v8193_v61 = vsub.f32 %v860_v21, %v899_v58  ;;  %v886_v62 = vpop.xlane.xlu0 %885  ;;  %v6764_v21 = vld [vmem:[%s8109_s20 + $0x48] ss:$12 sps:$4 sm:$0xff]   ;;  %6297 = vmatprep.subr.bf16.mxu1 %v6763_v20 }
 0x1cb   : > { %v888_v63 = vpop.xlane.xlu1 %887  ;;  %v900_v0 = vmul.f32 0.0078125, %v886_v62  ;;  %v922_v1 = vmul.f32 %v8191_v60, %v8191_v60  ;;  %1310 = vmatpush1.bf16.msra.mxu0 %v6764_v21  ;;  %6298 = vmatpush3.bf16.msra.mxu1 %v6763_v20 }
 0x1cc   : > { %v901_v2 = vmul.f32 0.0078125, %v888_v63  ;;  %v923_v3 = vmul.f32 %v8193_v61, %v8193_v61 }
 0x1cd   : > { %940 = vadd.xlane.f32.xlu1 %v921_v59  ;;  %942 = vadd.xlane.f32.xlu0 %v922_v1  ;;  %v8199_v4 = vsub.f32 %v861_v22, %v900_v0  ;;  %v6765_v22 = vld [vmem:[%s8109_s20 + $0x34] ss:$12 sps:$4 sm:$0xff]  }
 0x1ce   : > { %v8201_v5 = vsub.f32 %v862_v23, %v901_v2  ;;  %v6767_v23 = vld [vmem:[%s8109_s20 + $0x50] ss:$12 sps:$4 sm:$0xff]   ;;  %1311 = vmatprep.subr.bf16.mxu0 %v6765_v22  ;;  %s10917_s20 = scalar_lea.vmem [#allocation8], %s8100_s29 }
 0x1cf   : > { %v924_v6 = vmul.f32 %v8199_v4, %v8199_v4  ;;  %6299 = vmatprep.subr.bf16.mxu1 %v6767_v23  ;;  %1312 = vmatpush1.bf16.msra.mxu0 %v6768_v24 }
 0x1d0   : > { %v925_v7 = vmul.f32 %v8201_v5, %v8201_v5  ;;  %6300 = vmatpush3.bf16.msra.mxu1 %v6767_v23  ;;  %1313 = vmatprep.subr.bf16.mxu0 %v6769_v25 }
 0x1d1   : > { %944 = vadd.xlane.f32.xlu1 %v923_v3  ;;  %946 = vadd.xlane.f32.xlu0 %v924_v6 }
 0x1d2   : > { %6301 = vmatprep.subr.bf16.mxu1 %v6771_v26 }
 0x1d3   : > { %1314 = vmatpush1.bf16.msra.mxu0 %v6772_v27 }
 0x1d4   : > { %6302 = vmatpush3.bf16.msra.mxu1 %v6771_v26  ;;  %1315 = vmatprep.subr.bf16.mxu0 %v6773_v30 }
 0x1d5   : > { %948 = vadd.xlane.f32.xlu1 %v925_v7  ;;  %6303 = vmatprep.subr.bf16.mxu1 %v6775_v31 }
 0x1d7   : > { %1316 = vmatpush1.bf16.msra.mxu0 %v6776_v32 }
 0x1d8   : > { %6304 = vmatpush3.bf16.msra.mxu1 %v6775_v31 }
 0x1d9   : > { %6305 = vmatprep.subr.bf16.mxu1 %v6777_v33 }
 0x1dc   : > { %6306 = vmatpush3.bf16.msra.mxu1 %v6777_v33 }
 0x246   : > { %v927_v35 = vpop.xlane.xlu0 %926 }
 0x247   : > { %v950_v38 = vmul.f32 0.0078125, %v927_v35 }
 0x249   : > { %v962_v39 = vadd.f32 1e-05, %v950_v38 }
 0x24a   : > { %v929_v40 = vpop.xlane.xlu1 %928  ;;  %v931_v41 = vpop.xlane.xlu0 %930 }
 0x24b   : > { %6866 = vrsqrt.f32 %v962_v39  ;;  %v951_v42 = vmul.f32 0.0078125, %v929_v40  ;;  %v952_v43 = vmul.f32 0.0078125, %v931_v41  ;;  %vm976_vm0 = vcmp.eq.f32.partialorder %v962_v39, inf }
 0x24c   : > { %v979_v8 = vand.u32 2147483648, %v962_v39  ;;  %vm978_vm1 = vcmp.eq.f32.partialorder %v962_v39, 0.0 }
 0x24d   : > { %v963_v46 = vadd.f32 1e-05, %v951_v42  ;;  %v8232_v47 = vadd.f32 1e-05, %v952_v43 }
 0x24e   : > { %v933_v48 = vpop.xlane.xlu1 %932  ;;  %v935_v49 = vpop.xlane.xlu0 %934 }
 0x24f   : > { %v953_v50 = vmul.f32 0.0078125, %v933_v48  ;;  %v954_v51 = vmul.f32 0.0078125, %v935_v49  ;;  %6868 = vrsqrt.f32 %v963_v46  ;;  %vm983_vm2 = vcmp.eq.f32.partialorder %v963_v46, inf }
 0x250   : > { %6870 = vrsqrt.f32 %v8232_v47  ;;  %vm985_vm3 = vcmp.eq.f32.partialorder %v963_v46, 0.0  ;;  %v986_v20 = vand.u32 2147483648, %v963_v46  ;;  %vm990_vm4 = vcmp.eq.f32.partialorder %v8232_v47, inf }
 0x251   : > { %v8235_v54 = vadd.f32 1e-05, %v953_v50  ;;  %v8237_v55 = vadd.f32 1e-05, %v954_v51  ;;  %vm992_vm5 = vcmp.eq.f32.partialorder %v8232_v47, 0.0  ;;  %v993_v26 = vand.u32 2147483648, %v8232_v47 }
 0x252   : > { %v937_v56 = vpop.xlane.xlu1 %936  ;;  %v939_v57 = vpop.xlane.xlu0 %938 }
 0x253   : > { %v955_v58 = vmul.f32 0.0078125, %v937_v56  ;;  %v956_v59 = vmul.f32 0.0078125, %v939_v57  ;;  %6872 = vrsqrt.f32 %v8235_v54  ;;  %vm997_vm6 = vcmp.eq.f32.partialorder %v8235_v54, inf }
 0x254   : > { %6874 = vrsqrt.f32 %v8237_v55  ;;  %vm999_vm7 = vcmp.eq.f32.partialorder %v8235_v54, 0.0  ;;  %vm1004_vm8 = vcmp.eq.f32.partialorder %v8237_v55, inf  ;;  %vm1006_vm9 = vcmp.eq.f32.partialorder %v8237_v55, 0.0 }
 0x255   : > { %v8241_v62 = vadd.f32 1e-05, %v955_v58  ;;  %v8243_v63 = vadd.f32 1e-05, %v956_v59  ;;  %v1007_v42 = vand.u32 2147483648, %v8237_v55 }
 0x256   : > { %v941_v0 = vpop.xlane.xlu1 %940  ;;  %v943_v1 = vpop.xlane.xlu0 %942 }
 0x257   : > { %v957_v2 = vmul.f32 0.0078125, %v941_v0  ;;  %v958_v3 = vmul.f32 0.0078125, %v943_v1  ;;  %6876 = vrsqrt.f32 %v8241_v62  ;;  %vm1011_vm10 = vcmp.eq.f32.partialorder %v8241_v62, inf }
 0x258   : > { %v6867_v6 = vpop.eup %6866  ;;  %6878 = vrsqrt.f32 %v8243_v63  ;;  %vm1018_vm11 = vcmp.eq.f32.partialorder %v8243_v63, inf  ;;  %v1014_v56 = vand.u32 2147483648, %v8241_v62  ;;  %vm1020_vm12 = vcmp.eq.f32.partialorder %v8243_v63, 0.0 }
 0x259   : > { %v975_v7 = vmul.f32 %v6867_v6, %v962_v39  ;;  %v8247_v9 = vadd.f32 1e-05, %v957_v2  ;;  %v8249_v10 = vadd.f32 1e-05, %v958_v3  ;;  %vm1013_vm13 = vcmp.eq.f32.partialorder %v8241_v62, 0.0 }
 0x25a   : > { %v945_v11 = vpop.xlane.xlu1 %944  ;;  %v947_v12 = vpop.xlane.xlu0 %946 }
 0x25b   : > { %v977_v13 = vsel %vm976_vm0, %v962_v39, %v975_v7  ;;  %v959_v14 = vmul.f32 0.0078125, %v945_v11  ;;  %v960_v15 = vmul.f32 0.0078125, %v947_v12  ;;  %6880 = vrsqrt.f32 %v8247_v9 }
 0x25c   : > { %v980_v16 = vsel %vm978_vm1, %v979_v8, %v977_v13  ;;  %v6869_v17 = vpop.eup %6868  ;;  %v1000_v39 = vand.u32 2147483648, %v8235_v54  ;;  %vm1025_vm14 = vcmp.eq.f32.partialorder %v8247_v9, inf  ;;  %vm1027_vm15 = vcmp.eq.f32.partialorder %v8247_v9, 0.0 }
 0x25d   : > { %6882 = vrcp.f32 %v980_v16  ;;  %v6871_v18 = vpop.eup %6870  ;;  %v982_v19 = vmul.f32 %v6869_v17, %v963_v46  ;;  %v8253_v21 = vadd.f32 1e-05, %v959_v14  ;;  %v8258_v24 = vadd.f32 1e-05, %v960_v15  ;;  %v8306_v15 = vld [vmem:[%s10916_s3] ss:$0 sm:$0xff] }
 0x25e   : > { %6884 = vrsqrt.f32 %v8249_v10  ;;  %v949_v22 = vpop.xlane.xlu1 %948  ;;  %v989_v23 = vmul.f32 %v6871_v18, %v8232_v47  ;;  %v1028_v6 = vand.u32 2147483648, %v8247_v9  ;;  %vm1032_vm0 = vcmp.eq.f32.partialorder %v8249_v10, inf }
 0x25f   : > { %v984_v25 = vsel %vm983_vm2, %v963_v46, %v982_v19  ;;  %6886 = vrsqrt.f32 %v8253_v21  ;;  %v961_v27 = vmul.f32 0.0078125, %v949_v22  ;;  %vm1034_vm1 = vcmp.eq.f32.partialorder %v8249_v10, 0.0 }
 0x260   : > { %v6873_v30 = vpop.eup %6872  ;;  %v987_v31 = vsel %vm985_vm3, %v986_v20, %v984_v25  ;;  %v991_v32 = vsel %vm990_vm4, %v8232_v47, %v989_v23  ;;  %6888 = vrsqrt.f32 %v8258_v24  ;;  %vm1039_vm2 = vcmp.eq.f32.partialorder %v8253_v21, inf }
 0x261   : > { %v6875_v33 = vpop.eup %6874  ;;  %6890 = vrcp.f32 %v987_v31  ;;  %v994_v35 = vsel %vm992_vm5, %v993_v26, %v991_v32  ;;  %v996_v38 = vmul.f32 %v6873_v30, %v8235_v54  ;;  %v8274_v43 = vadd.f32 1e-05, %v961_v27  ;;  %v8327_v30 = vld [vmem:[%s10917_s20] ss:$0 sm:$0xff] }
 0x262   : > { %6892 = vrcp.f32 %v994_v35  ;;  %v1003_v40 = vmul.f32 %v6875_v33, %v8237_v55  ;;  %vm1041_vm3 = vcmp.eq.f32.partialorder %v8253_v21, 0.0  ;;  %v1042_v14 = vand.u32 2147483648, %v8253_v21 }
 0x263   : > { %v998_v41 = vsel %vm997_vm6, %v8235_v54, %v996_v38  ;;  %v1021_v54 = vand.u32 2147483648, %v8243_v63  ;;  %vm1046_vm4 = vcmp.eq.f32.partialorder %v8258_v24, inf  ;;  %v1049_v18 = vand.u32 2147483648, %v8258_v24 }
 0x264   : > { %v6877_v46 = vpop.eup %6876  ;;  %v1001_v47 = vsel %vm999_vm7, %v1000_v39, %v998_v41  ;;  %v1005_v48 = vsel %vm1004_vm8, %v8237_v55, %v1003_v40  ;;  %vm1048_vm5 = vcmp.eq.f32.partialorder %v8258_v24, 0.0  ;;  %vm1053_vm6 = vcmp.eq.f32.partialorder %v8274_v43, inf }
 0x265   : > { %v6879_v49 = vpop.eup %6878  ;;  %6894 = vrcp.f32 %v1001_v47  ;;  %v1008_v50 = vsel %vm1006_vm9, %v1007_v42, %v1005_v48  ;;  %v1010_v51 = vmul.f32 %v6877_v46, %v8241_v62  ;;  %vm1055_vm7 = vcmp.eq.f32.partialorder %v8274_v43, 0.0 }
 0x266   : > { %6896 = vrcp.f32 %v1008_v50  ;;  %v1017_v57 = vmul.f32 %v6879_v49, %v8243_v63  ;;  %vm7659_vm8 = vmmov 0   ;;  %vm1637_vm9 = vcmask 261120  }
 0x267   : > { %v1012_v55 = vsel %vm1011_vm10, %v8241_v62, %v1010_v51  ;;  %6898 = vrsqrt.f32 %v8274_v43  ;;  %v1035_v62 = vand.u32 2147483648, %v8249_v10 }
 0x268   : > { %v6881_v58 = vpop.eup %6880  ;;  %v1015_v59 = vsel %vm1013_vm13, %v1014_v56, %v1012_v55  ;;  %v1019_v0 = vsel %vm1018_vm11, %v8243_v63, %v1017_v57  ;;  %vm2313_vm11 = vcmask 392192  }
 0x269   : > { %6900 = vrcp.f32 %v1015_v59  ;;  %v1022_v2 = vsel %vm1020_vm12, %v1021_v54, %v1019_v0  ;;  %v1024_v3 = vmul.f32 %v6881_v58, %v8247_v9 }
 0x26a   : > { %v6883_v1 = vpop.eup %6882  ;;  %6902 = vrcp.f32 %v1022_v2 }
 0x26b   : > { %v6885_v7 = vpop.eup %6884  ;;  %v1026_v63 = vsel %vm1025_vm14, %v8247_v9, %v1024_v3  ;;  %v1059_v11 = vmul.f32 %v6883_v1, %v8159_v28 }
 0x26c   : > { %v1031_v8 = vmul.f32 %v6885_v7, %v8249_v10  ;;  %v6887_v12 = vpop.eup %6886  ;;  %v1029_v13 = vsel %vm1027_vm15, %v1028_v6, %v1026_v63 }
 0x26d   : > { %v6889_v16 = vpop.eup %6888  ;;  %6904 = vrcp.f32 %v1029_v13  ;;  %v1038_v28 = vmul.f32 %v6887_v12, %v8253_v21  ;;  %v1088_v26 = vmul.f32 %v8306_v15, %v1059_v11 }
 0x26e   : > { %v1033_v17 = vsel %vm1032_vm0, %v8249_v10, %v1031_v8  ;;  %v6891_v9 = vpop.eup %6890  ;;  %v1045_v20 = vmul.f32 %v6889_v16, %v8258_v24 }
 0x26f   : > { %v1036_v19 = vsel %vm1034_vm1, %v1035_v62, %v1033_v17  ;;  %v6893_v22 = vpop.eup %6892  ;;  %v1040_v23 = vsel %vm1039_vm2, %v8253_v21, %v1038_v28  ;;  %v1061_v25 = vmul.f32 %v6891_v9, %v8167_v36  ;;  %v1106_v21 = vadd.f32 %v8327_v30, %v1088_v26 }
 0x270   : > { %6906 = vrcp.f32 %v1036_v19  ;;  %v1043_v27 = vsel %vm1041_vm3, %v1042_v14, %v1040_v23  ;;  %v1047_v10 = vsel %vm1046_vm4, %v8258_v24, %v1045_v20  ;;  %v1063_v31 = vmul.f32 %v6893_v22, %v8161_v29 }
 0x271   : > { %6908 = vrcp.f32 %v1043_v27  ;;  %v1050_v32 = vsel %vm1048_vm5, %v1049_v18, %v1047_v10  ;;  %v1089_v33 = vmul.f32 %v8306_v15, %v1061_v25  ;;  %v1056_v29 = vand.u32 2147483648, %v8274_v43 }
 0x272   : > { %v6895_v35 = vpop.eup %6894  ;;  %v1090_v36 = vmul.f32 %v8306_v15, %v1063_v31  ;;  %6910 = vrcp.f32 %v1050_v32  ;;  %v1158_v23 = vlaneseq  ;;  %v8385_v32 = vld [vmem:[%s8148_s14] sm:$0x7]  ;;  %vm3490_vm1 = vcmask 523264  }
 0x273   : > { %v6897_v38 = vpop.eup %6896  ;;  %v1107_v39 = vadd.f32 %v8327_v30, %v1089_v33  ;;  %v1065_v24 = vmul.f32 %v6895_v35, %v8169_v37  ;;  %vm3503_vm2 = vcmask 785408  }
 0x274   : > { %v6899_v40 = vpop.eup %6898  ;;  %v1067_v41 = vmul.f32 %v6897_v38, %v8175_v44  ;;  %v1108_v49 = vadd.f32 %v8327_v30, %v1090_v36  ;;  %v8379_v27 = vshrl.u32 %v1158_v23, 7 }
 0x275   : > { %v1052_v42 = vmul.f32 %v6899_v40, %v8274_v43  ;;  %v1118_v46 = vpack.c.bf16 %v1107_v39, %v1106_v21  ;;  %v1091_v47 = vmul.f32 %v8306_v15, %v1065_v24 }
 0x276   : > { %v6901_v48 = vpop.eup %6900  ;;  %v1092_v50 = vmul.f32 %v8306_v15, %v1067_v41  ;;  %10918 = vst [vmem:[#allocation28_spill] sm:$0xff] %v8379_v27  ;;  %v10814_v38 = vsub.s32 0, %v8379_v27 }
 0x277   : > { %v6903_v37 = vpop.eup %6902  ;;  %v1054_v51 = vsel %vm1053_vm6, %v8274_v43, %v1052_v42  ;;  %1334 = vmatmul.mubr.bf16.vlgmr.msra.gmra.mxu0 %v1118_v46  ;;  %6307 = vmatprep.mubr.bf16.mxu1 %v1118_v46  ;;  %v1109_v54 = vadd.f32 %v8327_v30, %v1091_v47  ;;  %v1069_v44 = vmul.f32 %v6901_v48, %v8177_v45 }
 0x278   : > { %v1057_v56 = vsel %vm1055_vm7, %v1056_v29, %v1054_v51  ;;  %1343 = vmatprep.mubr.bf16.mxu0 %v10815_v34  ;;  %v1071_v57 = vmul.f32 %v6903_v37, %v8183_v52  ;;  %v1110_v43 = vadd.f32 %v8327_v30, %v1092_v50  ;;  %v8401_v42 = vrot.slane %v8385_v32, %v10814_v38 }
 0x279   : > { %6912 = vrcp.f32 %v1057_v56  ;;  %v1119_v55 = vpack.c.bf16 %v1109_v54, %v1108_v49  ;;  %v1093_v58 = vmul.f32 %v8306_v15, %v1069_v44 }
 0x27a   : > { %v6905_v59 = vpop.eup %6904  ;;  %v1094_v0 = vmul.f32 %v8306_v15, %v1071_v57 }
 0x27b   : > { %6308 = vmatmul.mubr.bf16.vlgmr.msra.gmra.mxu1 %v1119_v55  ;;  %v1111_v1 = vadd.f32 %v8327_v30, %v1093_v58  ;;  %v1073_v2 = vmul.f32 %v6905_v59, %v8185_v53 }
 0x27c   : > { %v1112_v62 = vadd.f32 %v8327_v30, %v1094_v0 }
 0x27d   : > { %v6907_v45 = vpop.eup %6906  ;;  %v1120_v3 = vpack.c.bf16 %v1111_v1, %v1110_v43  ;;  %v1095_v6 = vmul.f32 %v8306_v15, %v1073_v2 }
 0x27e   : > { %v1075_v52 = vmul.f32 %v6907_v45, %v8191_v60  ;;  %v6909_v7 = vpop.eup %6908 }
 0x27f   : > { %1344 = vmatmul.mubr.bf16.gmra.mxu0 %v1119_v55  ;;  %6311 = vmatprep.mubr.bf16.mxu1 %v1120_v3  ;;  %v1113_v63 = vadd.f32 %v8327_v30, %v1095_v6  ;;  %v1077_v8 = vmul.f32 %v6909_v7, %v8193_v61  ;;  %v6911_v12 = vpop.eup %6910 }
 0x280   : > { %v1096_v11 = vmul.f32 %v8306_v15, %v1075_v52  ;;  %1353 = vmatprep.mubr.bf16.mxu0 %v10815_v34  ;;  %v1079_v16 = vmul.f32 %v6911_v12, %v8199_v4  ;;  %v10817_v4 = vmov 0.0  }
 0x281   : > { %v1121_v53 = vpack.c.bf16 %v1113_v63, %v1112_v62  ;;  %v1097_v13 = vmul.f32 %v8306_v15, %v1077_v8  ;;  %6319 = vmatprep.subr.bf16.mxu1 %v10817_v4  ;;  %6337 = vmatprep.subr.bf16.mxu0 %v10817_v4 }
 0x282   : > { %v1114_v60 = vadd.f32 %v8327_v30, %v1096_v11  ;;  %v1098_v18 = vmul.f32 %v8306_v15, %v1079_v16 }
 0x283   : > { %6312 = vmatmul.mubr.bf16.gmra.mxu1 %v1121_v53  ;;  %v1115_v14 = vadd.f32 %v8327_v30, %v1097_v13 }
 0x284   : > { %v1116_v19 = vadd.f32 %v8327_v30, %v1098_v18 }
 0x285   : > { %v1122_v17 = vpack.c.bf16 %v1115_v14, %v1114_v60 }
 0x286   : > { %v6913_v28 = vpop.eup %6912 }
 0x287   : > { %1354 = vmatmul.mubr.bf16.gmra.mxu0 %v1120_v3  ;;  %6315 = vmatprep.mubr.bf16.mxu1 %v1122_v17  ;;  %v1081_v61 = vmul.f32 %v6913_v28, %v8201_v5 }
 0x288   : > { %1363 = vmatprep.mubr.bf16.mxu0 %v10815_v34 }
 0x289   : > { %v1099_v9 = vmul.f32 %v8306_v15, %v1081_v61 }
 0x28b   : > { %v1117_v20 = vadd.f32 %v8327_v30, %v1099_v9  ;;  %v10812_v30 = vsub.s32 1, %v8379_v27 }
 0x28d   : > { %v1123_v22 = vpack.c.bf16 %v1117_v20, %v1116_v19  ;;  %v8390_v35 = vrot.slane %v8385_v32, %v10812_v30 }
 0x28f   : > { %6316 = vmatmul.mubr.bf16.gmra.mxu1 %v1123_v22  ;;  %1364 = vmatmul.mubr.bf16.gmra.mxu0 %v1121_v53 }
 0x290   : > { %1373 = vmatprep.mubr.bf16.mxu0 %v10815_v34  ;;  %6325 = vmatprep.mubr.msk.bf16.mxu1 %vm7659_vm8, %v10817_v4 }
 0x297   : > { %1374 = vmatmul.mubr.bf16.gmra.mxu0 %v1122_v17 }
 0x298   : > { %1383 = vmatprep.mubr.bf16.mxu0 %v10815_v34 }
 0x29f   : > { %1384 = vmatmul.mubr.bf16.gmra.mxu0 %v1123_v22 }
 0x2a0   : > { %6343 = vmatprep.mubr.msk.bf16.mxu0 %vm7659_vm8, %v10817_v4 }
 0x337   : > { %v1335_v5 = vpop.f32.mrf.mxu0 }
 0x338   : > { %v1336_v37 = vadd.f32 %v1335_v5, %v8401_v42 }
 0x339   : > { %v1337_v15 = vpop.f32.mrf.mxu0 }
 0x33a   : > { %v1338_v46 = vadd.f32 %v1337_v15, %v8390_v35 }
 0x33b   : > { %v1339_v25 = vpop.f32.mrf.mxu0  ;;  %v8470_v19 = vpop.f32.mrf.mxu1 }
 0x33c   : > { %v1340_v48 = vadd.f32 %v1339_v25, %v8401_v42 }
 0x33d   : > { %v1341_v26 = vpop.f32.mrf.mxu0  ;;  %v8484_v15 = vpop.f32.mrf.mxu1 }
 0x33e   : > { %v1342_v40 = vadd.f32 %v1341_v26, %v8390_v35  ;;  %v8416_v56 = vpack.c.bf16 %v1340_v48, %v1336_v37 }
 0x33f   : > { %v8381_v10 = vpop.f32.mrf.mxu0 }
 0x340   : > { %v8407_v49 = vpack.c.bf16 %v1342_v40, %v1338_v46  ;;  %v1346_v18 = vadd.f32 %v8381_v10, %v8401_v42 }
 0x341   : > { %v1347_v31 = vpop.f32.mrf.mxu0 }
 0x342   : > { %v1348_v21 = vadd.f32 %v1347_v31, %v8390_v35  ;;  %v1648_v12 = vsel %vm1637_vm9, %v8407_v49, 0  ;;  %v6310_v31 = vpop.f32.mrf.mxu1 }
 0x343   : > { %v1349_v33 = vpop.f32.mrf.mxu0 }
 0x344   : > { %v1350_v28 = vadd.f32 %v1349_v33, %v8401_v42 }
 0x345   : > { %v1351_v36 = vpop.f32.mrf.mxu0 }
 0x346   : > { %v1352_v39 = vadd.f32 %v1351_v36, %v8390_v35  ;;  %v8464_v9 = vpack.c.bf16 %v1350_v28, %v1346_v18  ;;  %v1431_v36 = vpop.f32.mrf.mxu1 }
 0x347   : > { %v1355_v24 = vpop.f32.mrf.mxu0 }
 0x348   : > { %v8396_v29 = vpack.c.bf16 %v1352_v39, %v1348_v21  ;;  %v1356_v11 = vadd.f32 %v1355_v24, %v8401_v42  ;;  %v6313_v24 = vpop.f32.mrf.mxu1 }
 0x349   : > { %v1357_v41 = vpop.f32.mrf.mxu0 }
 0x34a   : > { %1543 = vrot.lane.b32.xlu1 %v8396_v29, %s7660_s17  ;;  %v1358_v51 = vadd.f32 %v1357_v41, %v8390_v35  ;;  %v1651_v2 = vsel %vm1637_vm9, %v8396_v29, 0 }
 0x34b   : > { %v1359_v47 = vpop.f32.mrf.mxu0 }
 0x34c   : > { %v1360_v62 = vadd.f32 %v1359_v47, %v8401_v42 }
 0x34d   : > { %v1361_v50 = vpop.f32.mrf.mxu0 }
 0x34e   : > { %v1362_v54 = vadd.f32 %v1361_v50, %v8390_v35  ;;  %1541 = vrot.lane.b32.xlu1 %v8407_v49, %s7660_s17  ;;  %v8441_v13 = vpack.c.bf16 %v1360_v62, %v1356_v11  ;;  %v10813_v50 = vsub.s32 2, %v8379_v27 }
 0x34f   : > { %v8414_v44 = vpop.f32.mrf.mxu0 }
 0x350   : > { %v1482_v57 = vpack.c.bf16 %v1362_v54, %v1358_v51  ;;  %v1366_v10 = vadd.f32 %v8414_v44, %v8401_v42  ;;  %v1169_v51 = vrot.slane %v8385_v32, %v10813_v50 }
 0x351   : > { %v1367_v55 = vpop.f32.mrf.mxu0 }
 0x352   : > { %1499 = vrot.lane.b32.xlu1 %v8416_v56, %s7660_s17  ;;  %1545 = vrot.lane.b32.xlu0 %v1482_v57, %s7660_s17  ;;  %v1654_v58 = vsel %vm1637_vm9, %v1482_v57, 0  ;;  %v1368_v5 = vadd.f32 %v1367_v55, %v8390_v35  ;;  %v1440_v54 = vadd.f32 %v6310_v31, %v1169_v51  ;;  %v1429_v62 = vadd.f32 %v8484_v15, %v1169_v51 }
 0x353   : > { %v1369_v59 = vpop.f32.mrf.mxu0  ;;  %6320 = vmatpush3.bf16.xpose.msra.mxu1 %v1654_v58 }
 0x354   : > { %6321 = vmatprep.subr.bf16.mxu1 %v10817_v4  ;;  %v1370_v25 = vadd.f32 %v1369_v59, %v8401_v42 }
 0x355   : > { %v1371_v0 = vpop.f32.mrf.mxu0 }
 0x356   : > { %1557 = vrot.lane.b32.xlu1 %v1482_v57, %s7661_s10  ;;  %v1372_v20 = vadd.f32 %v1371_v0, %v8390_v35  ;;  %v1484_v33 = vpack.c.bf16 %v1370_v25, %v1366_v10 }
 0x357   : > { %v8424_v43 = vpop.f32.mrf.mxu0 }
 0x358   : > { %v1485_v26 = vpack.c.bf16 %v1372_v20, %v1368_v5  ;;  %v1376_v39 = vadd.f32 %v8424_v43, %v8401_v42 }
 0x359   : > { %v1377_v1 = vpop.f32.mrf.mxu0 }
 0x35a   : > { %v1378_v6 = vadd.f32 %v1377_v1, %v8390_v35 }
 0x35b   : > { %v1379_v45 = vpop.f32.mrf.mxu0  ;;  %6322 = vmatpush3.bf16.xpose.msra.mxu1 %v1651_v2 }
 0x35c   : > { %6323 = vmatprep.subr.bf16.mxu1 %v10817_v4  ;;  %v1380_v21 = vadd.f32 %v1379_v45, %v8401_v42 }
 0x35d   : > { %v1381_v3 = vpop.f32.mrf.mxu0 }
 0x35e   : > { %v1382_v52 = vadd.f32 %v1381_v3, %v8390_v35  ;;  %v1487_v40 = vpack.c.bf16 %v1380_v21, %v1376_v39 }
 0x35f   : > { %v8431_v7 = vpop.f32.mrf.mxu0 }
 0x360   : > { %v8434_v63 = vpack.c.bf16 %v1382_v52, %v1378_v6  ;;  %v1386_v46 = vadd.f32 %v8431_v7, %v8401_v42  ;;  %v1432_v52 = vadd.f32 %v1431_v36, %v1169_v51  ;;  %v1453_v7 = vadd.f32 %v6313_v24, %v1169_v51 }
 0x361   : > { %v1387_v8 = vpop.f32.mrf.mxu0 }
 0x362   : > { %1549 = vrot.lane.b32.xlu1 %v8434_v63, %s7660_s17  ;;  %v1388_v14 = vadd.f32 %v1387_v8, %v8390_v35  ;;  %v1726_v22 = vsel %vm1637_vm9, %v8434_v63, 0  ;;  %v8570_v8 = vpack.c.bf16 %v1432_v52, %v1429_v62 }
 0x363   : > { %v1389_v53 = vpop.f32.mrf.mxu0  ;;  %6324 = vmatpush3.bf16.xpose.msra.mxu1 %v1648_v12 }
 0x364   : > { %6355 = vmatprep.subr.bf16.mxu1 %v10817_v4  ;;  %v1390_v41 = vadd.f32 %v1389_v53, %v8401_v42 }
 0x365   : > { %v1391_v60 = vpop.f32.mrf.mxu0 }
 0x366   : > { %v1392_v16 = vadd.f32 %v1391_v60, %v8390_v35  ;;  %1503 = vrot.lane.b32.xlu1 %v8441_v13, %s7660_s17  ;;  %v1723_v35 = vsel %vm1637_vm9, %v1485_v26, 0  ;;  %v1490_v48 = vpack.c.bf16 %v1390_v41, %v1386_v46 }
 0x368   : > { %v8448_v17 = vpack.c.bf16 %v1392_v16, %v1388_v14 }
 0x36a   : > { %1553 = vrot.lane.b32.xlu1 %v8407_v49, %s7661_s10  ;;  %6326 = vmatmul.mubr.msk.bf16.vlgmr.msra.gmra.mxu1 %vm1637_vm9, %v8416_v56  ;;  %v1729_v61 = vsel %vm1637_vm9, %v8448_v17, 0 }
 0x36b   : > { %1551 = vrot.lane.b32.xlu0 %v8448_v17, %s7660_s17  ;;  %6338 = vmatpush3.bf16.xpose.msra.mxu0 %v1729_v61 }
 0x36c   : > { %6329 = vmatprep.mubr.msk.bf16.mxu1 %vm7659_vm8, %v10817_v4  ;;  %6339 = vmatprep.subr.bf16.mxu0 %v10817_v4 }
 0x36e   : > { %1511 = vrot.lane.b32.xlu1 %v8416_v56, %s7661_s10 }
 0x36f   : > { %1501 = vrot.lane.b32.xlu0 %v8464_v9, %s7660_s17 }
 0x372   : > { %1569 = vrot.lane.b32.xlu1 %v1482_v57, %s7662_s23  ;;  %6330 = vmatmul.mubr.msk.bf16.gmra.mxu1 %vm1637_vm9, %v8464_v9 }
 0x373   : > { %1555 = vrot.lane.b32.xlu0 %v8396_v29, %s7661_s10  ;;  %6340 = vmatpush3.bf16.xpose.msra.mxu0 %v1726_v22 }
 0x374   : > { %6333 = vmatprep.mubr.msk.bf16.mxu1 %vm7659_vm8, %v10817_v4  ;;  %6341 = vmatprep.subr.bf16.mxu0 %v10817_v4 }
 0x376   : > { %1513 = vrot.lane.b32.xlu1 %v8464_v9, %s7661_s10 }
 0x377   : > { %1547 = vrot.lane.b32.xlu0 %v1485_v26, %s7660_s17 }
 0x37a   : > { %1567 = vrot.lane.b32.xlu1 %v8396_v29, %s7662_s23  ;;  %6334 = vmatmul.mubr.msk.bf16.gmra.mxu1 %vm1637_vm9, %v8441_v13  ;;  %v1444_v29 = vpop.f32.mrf.mxu1 }
 0x37b   : > { %1505 = vrot.lane.b32.xlu0 %v1484_v33, %s7660_s17  ;;  %6342 = vmatpush3.bf16.xpose.msra.mxu0 %v1723_v35  ;;  %v1445_v43 = vadd.f32 %v1444_v29, %v1169_v51 }
 0x37c   : > { %6361 = vmatprep.mubr.msk.bf16.mxu1 %vm7659_vm8, %v10817_v4  ;;  %6373 = vmatprep.subr.bf16.mxu0 %v10817_v4  ;;  %v6314_v47 = vpop.f32.mrf.mxu1 }
 0x37d   : > { %v1456_v3 = vadd.f32 %v6314_v47, %v1169_v51 }
 0x37e   : > { %1515 = vrot.lane.b32.xlu1 %v8441_v13, %s7661_s10 }
 0x37f   : > { %1563 = vrot.lane.b32.xlu0 %v8448_v17, %s7661_s10 }
 0x382   : > { %1565 = vrot.lane.b32.xlu1 %v8407_v49, %s7662_s23  ;;  %6344 = vmatmul.mubr.msk.bf16.vlgmr.msra.gmra.mxu0 %vm1637_vm9, %v1484_v33  ;;  %v1447_v49 = vpop.f32.mrf.mxu1 }
 0x383   : > { %1507 = vrot.lane.b32.xlu0 %v1487_v40, %s7660_s17  ;;  %6347 = vmatprep.mubr.msk.bf16.mxu0 %vm7659_vm8, %v10817_v4  ;;  %v1448_v32 = vadd.f32 %v1447_v49, %v1169_v51 }
 0x384   : > { %v6317_v42 = vpop.f32.mrf.mxu1 }
 0x385   : > { %v1469_v58 = vadd.f32 %v6317_v42, %v1169_v51  ;;  %v8556_v1 = vpack.c.bf16 %v1448_v32, %v1445_v43 }
 0x386   : > { %1523 = vrot.lane.b32.xlu1 %v8416_v56, %s7662_s23  ;;  %v1460_v37 = vpop.f32.mrf.mxu1  ;;  %v1437_v56 = vadd.f32 %v8470_v19, %v1169_v51 }
 0x387   : > { %1561 = vrot.lane.b32.xlu0 %v8434_v63, %s7661_s10  ;;  %v1461_v45 = vadd.f32 %v1460_v37, %v1169_v51 }
 0x388   : > { %v6318_v44 = vpop.f32.mrf.mxu1  ;;  %v8545_v57 = vpack.c.bf16 %v1440_v54, %v1437_v56 }
 0x389   : > { %v1472_v55 = vadd.f32 %v6318_v44, %v1169_v51 }
 0x38a   : > { %1519 = vrot.lane.b32.xlu1 %v1487_v40, %s7661_s10  ;;  %6348 = vmatmul.mubr.msk.bf16.gmra.mxu0 %vm1637_vm9, %v1487_v40  ;;  %v1463_v0 = vpop.f32.mrf.mxu1 }
 0x38b   : > { %1509 = vrot.lane.b32.xlu0 %v1490_v48, %s7660_s17  ;;  %6351 = vmatprep.mubr.msk.bf16.mxu0 %vm7659_vm8, %v10817_v4  ;;  %v8550_v59 = vpack.c.bf16 %v1472_v55, %v1469_v58  ;;  %v1464_v2 = vadd.f32 %v1463_v0, %v1169_v51 }
 0x38d   : > { %v8561_v6 = vpack.c.bf16 %v1464_v2, %v1461_v45 }
 0x38e   : > { %1573 = vrot.lane.b32.xlu1 %v8434_v63, %s7662_s23  ;;  %v8568_v63 = vpack.c.bf16 %v1456_v3, %v1453_v7  ;;  %v2239_v7 = vand.u32 127, %v1158_v23 }
 0x38f   : > { %1559 = vrot.lane.b32.xlu0 %v1485_v26, %s7661_s10  ;;  %10919 = vst [vmem:[#allocation29_spill] sm:$0xff] %v8561_v6 }
 0x390   : > { %10920 = vst [vmem:[#allocation30_spill] sm:$0xff] %v8568_v63  ;;  %vm8684_vm10 = vcmp.le.s32.totalorder %v2239_v7, %v8379_v27 }
 0x392   : > { %1571 = vrot.lane.b32.xlu1 %v1485_v26, %s7662_s23  ;;  %6352 = vmatmul.mubr.msk.bf16.gmra.mxu0 %vm1637_vm9, %v1490_v48 }
 0x393   : > { %1517 = vrot.lane.b32.xlu0 %v1484_v33, %s7661_s10  ;;  %6379 = vmatprep.mubr.msk.bf16.mxu0 %vm7659_vm8, %v10817_v4 }
 0x396   : > { %1529 = vrot.lane.b32.xlu1 %v1484_v33, %s7662_s23 }
 0x397   : > { %1575 = vrot.lane.b32.xlu0 %v8448_v17, %s7662_s23 }
 0x39a   : > { %1533 = vrot.lane.b32.xlu1 %v1490_v48, %s7662_s23 }
 0x39b   : > { %1525 = vrot.lane.b32.xlu0 %v8464_v9, %s7662_s23 }
 0x39e   : > { %1585 = vrot.lane.b32.xlu1 %v8545_v57, %s7660_s17 }
 0x39f   : > { %1521 = vrot.lane.b32.xlu0 %v1490_v48, %s7661_s10 }
 0x3a2   : > { %1593 = vrot.lane.b32.xlu1 %v8550_v59, %s7660_s17 }
 0x3a3   : > { %1527 = vrot.lane.b32.xlu0 %v8441_v13, %s7662_s23 }
 0x3a6   : > { %1605 = vrot.lane.b32.xlu1 %v8556_v1, %s7661_s10 }
 0x3a7   : > { %1531 = vrot.lane.b32.xlu0 %v1487_v40, %s7662_s23 }
 0x3aa   : > { %1591 = vrot.lane.b32.xlu1 %v8561_v6, %s7660_s17 }
 0x3ab   : > { %1587 = vrot.lane.b32.xlu0 %v8556_v1, %s7660_s17 }
 0x3ae   : > { %1589 = vrot.lane.b32.xlu1 %v8568_v63, %s7660_s17 }
 0x3af   : > { %1583 = vrot.lane.b32.xlu0 %v8570_v8, %s7660_s17 }
 0x3b2   : > { %1611 = vrot.lane.b32.xlu1 %v8550_v59, %s7661_s10 }
 0x3b3   : > { %1603 = vrot.lane.b32.xlu0 %v8545_v57, %s7661_s10 }
 0x3b6   : > { %1609 = vrot.lane.b32.xlu1 %v8561_v6, %s7661_s10 }
 0x3b7   : > { %1601 = vrot.lane.b32.xlu0 %v8570_v8, %s7661_s10 }
 0x3ba   : > { %1621 = vrot.lane.b32.xlu1 %v8545_v57, %s7662_s23 }
 0x3bb   : > { %1623 = vrot.lane.b32.xlu0 %v8556_v1, %s7662_s23 }
 0x3bc   : > { %v1544_v11 = vpop.permute.xlu1 %1543 }
 0x3bd   : > { %v1801_v14 = vsel %vm1637_vm9, %v1544_v11, 0 }
 0x3be   : > { %1607 = vrot.lane.b32.xlu1 %v8568_v63, %s7661_s10 }
 0x3c0   : > { %v1542_v12 = vpop.permute.xlu1 %1541 }
 0x3c1   : > { %v1798_v28 = vsel %vm1637_vm9, %v1542_v12, 0  ;;  %v2242_v12 = vadd.s32 8, %v8379_v27 }
 0x3c3   : > { %vm8697_vm12 = vcmp.le.s32.totalorder %v2239_v7, %v2242_v12 }
 0x3c4   : > { %v1546_v53 = vpop.permute.xlu0 %1545  ;;  %v1500_v60 = vpop.permute.xlu1 %1499 }
 0x3c5   : > { %v1804_v13 = vsel %vm1637_vm9, %v1546_v53, 0 }
 0x3c6   : > { %6356 = vmatpush3.bf16.xpose.msra.mxu1 %v1804_v13 }
 0x3c7   : > { %6357 = vmatprep.subr.bf16.mxu1 %v10817_v4 }
 0x3c8   : > { %v1558_v16 = vpop.permute.xlu1 %1557 }
 0x3c9   : > { %v1954_v18 = vsel %vm1637_vm9, %v1558_v16, 0  ;;  %v2243_v16 = vadd.s32 16, %v8379_v27 }
 0x3cb   : > { %vm8712_vm13 = vcmp.le.s32.totalorder %v2239_v7, %v2243_v16 }
 0x3ce   : > { %6358 = vmatpush3.bf16.xpose.msra.mxu1 %v1801_v14 }
 0x3cf   : > { %6359 = vmatprep.subr.bf16.mxu1 %v10817_v4 }
 0x3d4   : > { %v1550_v17 = vpop.permute.xlu1 %1549 }
 0x3d5   : > { %v1876_v25 = vsel %vm1637_vm9, %v1550_v17, 0 }
 0x3d6   : > { %6360 = vmatpush3.bf16.xpose.msra.mxu1 %v1798_v28 }
 0x3d7   : > { %6391 = vmatprep.subr.bf16.mxu1 %v10817_v4 }
 0x3d8   : > { %v1504_v61 = vpop.permute.xlu1 %1503 }
 0x3dc   : > { %v1554_v9 = vpop.permute.xlu1 %1553 }
 0x3dd   : > { %v1552_v19 = vpop.permute.xlu0 %1551  ;;  %6362 = vmatmul.mubr.msk.bf16.vlgmr.msra.gmra.mxu1 %vm1637_vm9, %v1500_v60  ;;  %v1948_v35 = vsel %vm1637_vm9, %v1554_v9, 0 }
 0x3de   : > { %v1879_v20 = vsel %vm1637_vm9, %v1552_v19, 0  ;;  %6392 = vmatpush3.bf16.xpose.msra.mxu1 %v1954_v18  ;;  %6365 = vmatprep.mubr.msk.bf16.mxu1 %vm7659_vm8, %v10817_v4 }
 0x3df   : > { %6374 = vmatpush3.bf16.xpose.msra.mxu0 %v1879_v20  ;;  %6393 = vmatprep.subr.bf16.mxu1 %v10817_v4  ;;  %v2244_v20 = vadd.s32 24, %v8379_v27 }
 0x3e0   : > { %6375 = vmatprep.subr.bf16.mxu0 %v10817_v4  ;;  %v1512_v5 = vpop.permute.xlu1 %1511 }
 0x3e1   : > { %v1502_v22 = vpop.permute.xlu0 %1501  ;;  %vm8724_vm14 = vcmp.le.s32.totalorder %v2239_v7, %v2244_v20 }
 0x3e4   : > { %v1570_v10 = vpop.permute.xlu1 %1569 }
 0x3e5   : > { %v1556_v15 = vpop.permute.xlu0 %1555  ;;  %6366 = vmatmul.mubr.msk.bf16.gmra.mxu1 %vm1637_vm9, %v1502_v22  ;;  %v2104_v29 = vsel %vm1637_vm9, %v1570_v10, 0  ;;  %v2245_v10 = vadd.s32 32, %v8379_v27 }
 0x3e6   : > { %v1951_v26 = vsel %vm1637_vm9, %v1556_v15, 0  ;;  %6369 = vmatprep.mubr.msk.bf16.mxu1 %vm7659_vm8, %v10817_v4 }
 0x3e7   : > { %6376 = vmatpush3.bf16.xpose.msra.mxu0 %v1876_v25  ;;  %6394 = vmatpush3.bf16.xpose.msra.mxu1 %v1951_v26  ;;  %vm8738_vm15 = vcmp.le.s32.totalorder %v2239_v7, %v2245_v10 }
 0x3e8   : > { %6377 = vmatprep.subr.bf16.mxu0 %v10817_v4  ;;  %6395 = vmatprep.subr.bf16.mxu1 %v10817_v4  ;;  %v1514_v21 = vpop.permute.xlu1 %1513 }
 0x3e9   : > { %v1548_v31 = vpop.permute.xlu0 %1547 }
 0x3ea   : > { %v1873_v36 = vsel %vm1637_vm9, %v1548_v31, 0 }
 0x3ec   : > { %v1568_v24 = vpop.permute.xlu1 %1567 }
 0x3ed   : > { %v1506_v33 = vpop.permute.xlu0 %1505  ;;  %6370 = vmatmul.mubr.msk.bf16.gmra.mxu1 %vm1637_vm9, %v1504_v61  ;;  %v2101_v49 = vsel %vm1637_vm9, %v1568_v24, 0  ;;  %v2246_v24 = vadd.s32 40, %v8379_v27 }
 0x3ee   : > { %6397 = vmatprep.mubr.msk.bf16.mxu1 %vm7659_vm8, %v10817_v4 }
 0x3ef   : > { %6378 = vmatpush3.bf16.xpose.msra.mxu0 %v1873_v36  ;;  %6396 = vmatpush3.bf16.xpose.msra.mxu1 %v1948_v35  ;;  %vm8749_vm0 = vcmp.le.s32.totalorder %v2239_v7, %v2246_v24 }
 0x3f0   : > { %6409 = vmatprep.subr.bf16.mxu0 %v10817_v4  ;;  %6427 = vmatprep.subr.bf16.mxu1 %v10817_v4  ;;  %v1516_v47 = vpop.permute.xlu1 %1515 }
 0x3f1   : > { %v1564_v39 = vpop.permute.xlu0 %1563 }
 0x3f2   : > { %v2029_v41 = vsel %vm1637_vm9, %v1564_v39, 0 }
 0x3f4   : > { %v1566_v37 = vpop.permute.xlu1 %1565 }
 0x3f5   : > { %v1508_v40 = vpop.permute.xlu0 %1507  ;;  %v2098_v44 = vsel %vm1637_vm9, %v1566_v37, 0 }
 0x3f6   : > { %6380 = vmatmul.mubr.msk.bf16.vlgmr.msra.gmra.mxu0 %vm1637_vm9, %v1506_v33  ;;  %6398 = vmatmul.mubr.msk.bf16.vlgmr.msra.gmra.mxu1 %vm1637_vm9, %v1512_v5 }
 0x3f7   : > { %6410 = vmatpush3.bf16.xpose.msra.mxu0 %v2029_v41  ;;  %6428 = vmatpush3.bf16.xpose.msra.mxu1 %v2104_v29 }
 0x3f8   : > { %6383 = vmatprep.mubr.msk.bf16.mxu0 %vm7659_vm8, %v10817_v4  ;;  %6401 = vmatprep.mubr.msk.bf16.mxu1 %vm7659_vm8, %v10817_v4  ;;  %v1524_v55 = vpop.permute.xlu1 %1523 }
 0x3f9   : > { %v1562_v46 = vpop.permute.xlu0 %1561  ;;  %6411 = vmatprep.subr.bf16.mxu0 %v10817_v4  ;;  %6429 = vmatprep.subr.bf16.mxu1 %v10817_v4 }
 0x3fa   : > { %v2026_v42 = vsel %vm1637_vm9, %v1562_v46, 0 }
 0x3fc   : > { %v1520_v32 = vpop.permute.xlu1 %1519 }
 0x3fd   : > { %v1510_v48 = vpop.permute.xlu0 %1509 }
 0x3fe   : > { %6384 = vmatmul.mubr.msk.bf16.gmra.mxu0 %vm1637_vm9, %v1508_v40  ;;  %6402 = vmatmul.mubr.msk.bf16.gmra.mxu1 %vm1637_vm9, %v1514_v21 }
 0x3ff   : > { %6412 = vmatpush3.bf16.xpose.msra.mxu0 %v2026_v42  ;;  %6430 = vmatpush3.bf16.xpose.msra.mxu1 %v2101_v49 }
 0x400   : > { %6387 = vmatprep.mubr.msk.bf16.mxu0 %vm7659_vm8, %v10817_v4  ;;  %6405 = vmatprep.mubr.msk.bf16.mxu1 %vm7659_vm8, %v10817_v4  ;;  %v1574_v2 = vpop.permute.xlu1 %1573 }
 0x401   : > { %v1560_v51 = vpop.permute.xlu0 %1559  ;;  %6413 = vmatprep.subr.bf16.mxu0 %v10817_v4  ;;  %6431 = vmatprep.subr.bf16.mxu1 %v10817_v4  ;;  %v2176_v45 = vsel %vm1637_vm9, %v1574_v2, 0 }
 0x402   : > { %v2023_v56 = vsel %vm1637_vm9, %v1560_v51, 0 }
 0x405   : > { %v1518_v54 = vpop.permute.xlu0 %1517 }
 0x406   : > { %6388 = vmatmul.mubr.msk.bf16.gmra.mxu0 %vm1637_vm9, %v1510_v48  ;;  %6406 = vmatmul.mubr.msk.bf16.gmra.mxu1 %vm1637_vm9, %v1516_v47 }
 0x407   : > { %6414 = vmatpush3.bf16.xpose.msra.mxu0 %v2023_v56  ;;  %6432 = vmatpush3.bf16.xpose.msra.mxu1 %v2098_v44 }
 0x408   : > { %6415 = vmatprep.mubr.msk.bf16.mxu0 %vm7659_vm8, %v10817_v4  ;;  %6433 = vmatprep.mubr.msk.bf16.mxu1 %vm7659_vm8, %v10817_v4 }
 0x409   : > { %6445 = vmatprep.subr.bf16.mxu0 %v10817_v4  ;;  %6463 = vmatprep.subr.bf16.mxu1 %v10817_v4  ;;  %v1576_v58 = vpop.permute.xlu0 %1575 }
 0x40a   : > { %v2179_v0 = vsel %vm1637_vm9, %v1576_v58, 0 }
 0x40d   : > { %v1526_v43 = vpop.permute.xlu0 %1525 }
 0x40e   : > { %6416 = vmatmul.mubr.msk.bf16.vlgmr.msra.gmra.mxu0 %vm1637_vm9, %v1518_v54  ;;  %6434 = vmatmul.mubr.msk.bf16.vlgmr.msra.gmra.mxu1 %vm1637_vm9, %v1524_v55 }
 0x40f   : > { %6446 = vmatpush3.bf16.xpose.msra.mxu0 %v2179_v0  ;;  %6464 = vmatpush3.bf16.msra.mxu1 %v8556_v1 }
 0x410   : > { %6465 = vmatprep.subr.bf16.mxu1 %v10817_v4  ;;  %6419 = vmatprep.mubr.msk.bf16.mxu0 %vm7659_vm8, %v10817_v4 }
 0x411   : > { %6437 = vmatprep.mubr.msk.bf16.mxu1 %vm7659_vm8, %v10817_v4  ;;  %6447 = vmatprep.subr.bf16.mxu0 %v10817_v4  ;;  %v1522_v1 = vpop.permute.xlu0 %1521 }
 0x413   : > { %6466 = vmatpush3.bf16.msra.mxu1 %v8545_v57  ;;  %v1572_v57 = vpop.permute.xlu1 %1571 }
 0x414   : > { %6467 = vmatprep.subr.bf16.mxu1 %v10817_v4  ;;  %v2173_v52 = vsel %vm1637_vm9, %v1572_v57, 0 }
 0x415   : > { %v1528_v3 = vpop.permute.xlu0 %1527 }
 0x416   : > { %6420 = vmatmul.mubr.msk.bf16.gmra.mxu0 %vm1637_vm9, %v1520_v32  ;;  %6438 = vmatmul.mubr.msk.bf16.gmra.mxu1 %vm1637_vm9, %v1526_v43 }
 0x417   : > { %6448 = vmatpush3.bf16.xpose.msra.mxu0 %v2176_v45  ;;  %6468 = vmatpush3.bf16.msra.mxu1 %v8570_v8  ;;  %v1530_v62 = vpop.permute.xlu1 %1529 }
 0x418   : > { %6423 = vmatprep.mubr.msk.bf16.mxu0 %vm7659_vm8, %v10817_v4  ;;  %6441 = vmatprep.mubr.msk.bf16.mxu1 %vm7659_vm8, %v10817_v4 }
 0x419   : > { %6449 = vmatprep.subr.bf16.mxu0 %v10817_v4  ;;  %6499 = vmatprep.subr.bf16.mxu1 %v10817_v4  ;;  %v1532_v17 = vpop.permute.xlu0 %1531 }
 0x41b   : > { %v1534_v31 = vpop.permute.xlu1 %1533 }
 0x41e   : > { %6424 = vmatmul.mubr.msk.bf16.gmra.mxu0 %vm1637_vm9, %v1522_v1  ;;  %6442 = vmatmul.mubr.msk.bf16.gmra.mxu1 %vm1637_vm9, %v1528_v3 }
 0x41f   : > { %6450 = vmatpush3.bf16.xpose.msra.mxu0 %v2173_v52  ;;  %6451 = vmatprep.mubr.msk.bf16.mxu0 %vm7659_vm8, %v10817_v4 }
 0x420   : > { %6481 = vmatprep.subr.bf16.mxu0 %v10817_v4  ;;  %6469 = vmatprep.mubr.msk.bf16.mxu1 %vm7659_vm8, %v10817_v4 }
 0x426   : > { %6452 = vmatmul.mubr.msk.bf16.vlgmr.msra.gmra.mxu0 %vm1637_vm9, %v1530_v62 }
 0x427   : > { %6482 = vmatpush3.bf16.msra.mxu0 %v8550_v59  ;;  %6455 = vmatprep.mubr.msk.bf16.mxu0 %vm7659_vm8, %v10817_v4 }
 0x428   : > { %6483 = vmatprep.subr.bf16.mxu0 %v10817_v4 }
 0x42a   : > { %v1690_v53 = vpop.f32.mrf.mxu1 }
 0x42b   : > { %v8691_v23 = vsel %vm8684_vm10, %v1690_v53, -1e+30  ;;  %6484 = vmatpush3.bf16.msra.mxu0 %v8561_v6 }
 0x42c   : > { %v6327_v13 = vpop.f32.mrf.mxu1  ;;  %v2314_v60 = vsel %vm2313_vm11, %v8691_v23, -inf  ;;  %6485 = vmatprep.subr.bf16.mxu0 %v10817_v4 }
 0x42d   : > { %2315 = vmax.xlane.f32.xlu0 %v2314_v60 }
 0x42e   : > { %6456 = vmatmul.mubr.msk.bf16.gmra.mxu0 %vm1637_vm9, %v1532_v17  ;;  %v1693_v28 = vpop.f32.mrf.mxu1 }
 0x42f   : > { %v8705_v61 = vsel %vm8697_vm12, %v1693_v28, -1e+30  ;;  %6486 = vmatpush3.bf16.msra.mxu0 %v8568_v63  ;;  %6459 = vmatprep.mubr.msk.bf16.mxu0 %vm7659_vm8, %v10817_v4 }
 0x430   : > { %v6328_v18 = vpop.f32.mrf.mxu1  ;;  %v2317_v9 = vsel %vm2313_vm11, %v8705_v61, -inf  ;;  %6517 = vmatprep.subr.bf16.mxu0 %v10817_v4 }
 0x431   : > { %2318 = vmax.xlane.f32.xlu1 %v2317_v9  ;;  %v8795_v18 = vpop.permute.xlu1 %1585 }
 0x432   : > { %v1698_v22 = vpop.f32.mrf.mxu1 }
 0x433   : > { %v8720_v5 = vsel %vm8712_vm13, %v1698_v22, -1e+30 }
 0x434   : > { %v6331_v15 = vpop.f32.mrf.mxu1  ;;  %v2320_v25 = vsel %vm2313_vm11, %v8720_v5, -inf }
 0x435   : > { %2321 = vmax.xlane.f32.xlu0 %v2320_v25  ;;  %v8797_v9 = vpop.permute.xlu1 %1593  ;;  %v8803_v15 = vpop.permute.xlu0 %1587 }
 0x436   : > { %6460 = vmatmul.mubr.msk.bf16.gmra.mxu0 %vm1637_vm9, %v1534_v31  ;;  %v1701_v33 = vpop.f32.mrf.mxu1 }
 0x437   : > { %v8732_v35 = vsel %vm8724_vm14, %v1701_v33, -1e+30  ;;  %6487 = vmatprep.mubr.msk.bf16.mxu0 %vm7659_vm8, %v10817_v4 }
 0x438   : > { %v6332_v36 = vpop.f32.mrf.mxu1  ;;  %v2323_v21 = vsel %vm2313_vm11, %v8732_v35, -inf }
 0x439   : > { %2324 = vmax.xlane.f32.xlu0 %v2323_v21  ;;  %v8799_v20 = vpop.permute.xlu1 %1605  ;;  %v8813_v21 = vpop.permute.xlu0 %1583 }
 0x43a   : > { %v1706_v40 = vpop.f32.mrf.mxu1  ;;  %10933 = vst [vmem:[#allocation31_spill] sm:$0xff] %v8799_v20 }
 0x43b   : > { %v8745_v29 = vsel %vm8738_vm15, %v1706_v40, -1e+30 }
 0x43c   : > { %v6335_v41 = vpop.f32.mrf.mxu1  ;;  %v2326_v46 = vsel %vm2313_vm11, %v8745_v29, -inf }
 0x43d   : > { %2327 = vmax.xlane.f32.xlu0 %v2326_v46  ;;  %v8801_v22 = vpop.permute.xlu1 %1591 }
 0x43e   : > { %v1709_v48 = vpop.f32.mrf.mxu1 }
 0x43f   : > { %v8755_v49 = vsel %vm8749_vm0, %v1709_v48, -1e+30 }
 0x440   : > { %v6336_v42 = vpop.f32.mrf.mxu1  ;;  %v2329_v37 = vsel %vm2313_vm11, %v8755_v49, -inf }
 0x441   : > { %2330 = vmax.xlane.f32.xlu1 %v2329_v37  ;;  %v8809_v31 = vpop.permute.xlu1 %1589 }
 0x442   : > { %v1765_v51 = vpop.f32.mrf.mxu0  ;;  %10934 = vst [vmem:[#allocation32_spill] sm:$0xff] %v8809_v31 }
 0x443   : > { %v8761_v54 = vsel %vm8684_vm10, %v1765_v51, -1e+30  ;;  %v8827_v51 = vpop.permute.xlu0 %1603 }
 0x444   : > { %v6345_v44 = vpop.f32.mrf.mxu0  ;;  %v2332_v56 = vsel %vm2313_vm11, %v8761_v54, -inf  ;;  %10936 = vst [vmem:[#allocation34_spill] sm:$0xff] %v8827_v51 }
 0x445   : > { %2333 = vmax.xlane.f32.xlu0 %v2332_v56  ;;  %v8821_v48 = vpop.permute.xlu1 %1611 }
 0x446   : > { %v1768_v55 = vpop.f32.mrf.mxu0  ;;  %10935 = vst [vmem:[#allocation33_spill] sm:$0xff] %v8821_v48 }
 0x447   : > { %v8767_v58 = vsel %vm8697_vm12, %v1768_v55, -1e+30 }
 0x448   : > { %v6346_v32 = vpop.f32.mrf.mxu0  ;;  %v2335_v0 = vsel %vm2313_vm11, %v8767_v58, -inf }
 0x449   : > { %2336 = vmax.xlane.f32.xlu1 %v2335_v0  ;;  %v8835_v0 = vpop.permute.xlu1 %1609 }
 0x44a   : > { %v1773_v43 = vpop.f32.mrf.mxu0  ;;  %10937 = vst [vmem:[#allocation35_spill] sm:$0xff] %v8835_v0 }
 0x44b   : > { %v8773_v2 = vsel %vm8712_vm13, %v1773_v43, -1e+30 }
 0x44c   : > { %v6349_v45 = vpop.f32.mrf.mxu0  ;;  %v2338_v1 = vsel %vm2313_vm11, %v8773_v2, -inf }
 0x44d   : > { %2339 = vmax.xlane.f32.xlu0 %v2338_v1  ;;  %v8839_v1 = vpop.permute.xlu0 %1601 }
 0x44e   : > { %v1776_v57 = vpop.f32.mrf.mxu0  ;;  %10938 = vst [vmem:[#allocation36_spill] sm:$0xff] %v8839_v1 }
 0x44f   : > { %v8779_v3 = vsel %vm8724_vm14, %v1776_v57, -1e+30 }
 0x450   : > { %v6350_v52 = vpop.f32.mrf.mxu0  ;;  %v2341_v7 = vsel %vm2313_vm11, %v8779_v3, -inf }
 0x451   : > { %2342 = vmax.xlane.f32.xlu1 %v2341_v7 }
 0x452   : > { %v1781_v62 = vpop.f32.mrf.mxu0 }
 0x453   : > { %v8785_v12 = vsel %vm8738_vm15, %v1781_v62, -1e+30 }
 0x454   : > { %v6353_v53 = vpop.f32.mrf.mxu0  ;;  %v2344_v13 = vsel %vm2313_vm11, %v8785_v12, -inf }
 0x455   : > { %2345 = vmax.xlane.f32.xlu0 %v2344_v13  ;;  %v8847_v53 = vpop.permute.xlu1 %1621 }
 0x456   : > { %v1784_v60 = vpop.f32.mrf.mxu0  ;;  %10939 = vst [vmem:[#allocation37_spill] sm:$0xff] %v8847_v53 }
 0x457   : > { %v8791_v16 = vsel %vm8749_vm0, %v1784_v60, -1e+30 }
 0x458   : > { %v6354_v17 = vpop.f32.mrf.mxu0  ;;  %v2347_v28 = vsel %vm2313_vm11, %v8791_v16, -inf }
 0x459   : > { %2348 = vmax.xlane.f32.xlu1 %v2347_v28  ;;  %v8853_v17 = vpop.permute.xlu0 %1623 }
 0x45a   : > { %10940 = vst [vmem:[#allocation38_spill] sm:$0xff] %v8853_v17 }
 0x49d   : > { %v1840_v25 = vpop.f32.mrf.mxu1 }
 0x49e   : > { %v8807_v10 = vsel %vm8684_vm10, %v1840_v25, -1e+30 }
 0x49f   : > { %v6363_v33 = vpop.f32.mrf.mxu1  ;;  %v2350_v36 = vsel %vm2313_vm11, %v8807_v10, -inf }
 0x4a0   : > { %2351 = vmax.xlane.f32.xlu0 %v2350_v36 }
 0x4a1   : > { %v1843_v24 = vpop.f32.mrf.mxu1 }
 0x4a2   : > { %v8817_v40 = vsel %vm8697_vm12, %v1843_v24, -1e+30  ;;  %v8857_v24 = vpop.permute.xlu1 %1607 }
 0x4a3   : > { %v6364_v41 = vpop.f32.mrf.mxu1  ;;  %v2353_v46 = vsel %vm2313_vm11, %v8817_v40, -inf  ;;  %10941 = vst [vmem:[#allocation39_spill] sm:$0xff] %v8857_v24 }
 0x4a4   : > { %2354 = vmax.xlane.f32.xlu1 %v2353_v46 }
 0x4a5   : > { %v1848_v42 = vpop.f32.mrf.mxu1 }
 0x4a6   : > { %v8825_v37 = vsel %vm8712_vm13, %v1848_v42, -1e+30 }
 0x4a7   : > { %v6367_v44 = vpop.f32.mrf.mxu1  ;;  %v2356_v56 = vsel %vm2313_vm11, %v8825_v37, -inf }
 0x4a8   : > { %2357 = vmax.xlane.f32.xlu0 %v2356_v56 }
 0x4a9   : > { %v1851_v55 = vpop.f32.mrf.mxu1 }
 0x4aa   : > { %v8833_v32 = vsel %vm8724_vm14, %v1851_v55, -1e+30 }
 0x4ab   : > { %v6368_v43 = vpop.f32.mrf.mxu1  ;;  %v2359_v45 = vsel %vm2313_vm11, %v8833_v32, -inf }
 0x4ac   : > { %2360 = vmax.xlane.f32.xlu1 %v2359_v45 }
 0x4ad   : > { %v1856_v57 = vpop.f32.mrf.mxu1 }
 0x4ae   : > { %v8843_v52 = vsel %vm8738_vm15, %v1856_v57, -1e+30 }
 0x4af   : > { %v6371_v7 = vpop.f32.mrf.mxu1  ;;  %v2362_v62 = vsel %vm2313_vm11, %v8843_v52, -inf }
 0x4b0   : > { %2363 = vmax.xlane.f32.xlu0 %v2362_v62 }
 0x4b1   : > { %v1859_v13 = vpop.f32.mrf.mxu1 }
 0x4b2   : > { %v8851_v60 = vsel %vm8749_vm0, %v1859_v13, -1e+30 }
 0x4b3   : > { %v6372_v28 = vpop.f32.mrf.mxu1  ;;  %v2365_v25 = vsel %vm2313_vm11, %v8851_v60, -inf }
 0x4b4   : > { %2366 = vmax.xlane.f32.xlu1 %v2365_v25 }
 0x4b6   : > { %v1915_v33 = vpop.f32.mrf.mxu0  ;;  %v1990_v36 = vpop.f32.mrf.mxu1 }
 0x4b7   : > { %v8861_v41 = vsel %vm8684_vm10, %v1915_v33, -1e+30  ;;  %v2316_v46 = vpop.xlane.xlu0 %2315  ;;  %v8868_v43 = vsel %vm8684_vm10, %v1990_v36, -1e+30 }
 0x4b8   : > { %v2458_v42 = vsub.f32 %v8691_v23, %v2316_v46  ;;  %v6381_v44 = vpop.f32.mrf.mxu0  ;;  %v6399_v56 = vpop.f32.mrf.mxu1  ;;  %v2368_v55 = vsel %vm2313_vm11, %v8861_v41, -inf  ;;  %v2386_v33 = vsel %vm2313_vm11, %v8868_v43, -inf }
 0x4b9   : > { %2369 = vmax.xlane.f32.xlu0 %v2368_v55 }
 0x4ba   : > { %v1918_v45 = vpop.f32.mrf.mxu0  ;;  %v1993_v57 = vpop.f32.mrf.mxu1  ;;  %v2506_v13 = vmul.f32 1.442695, %v2458_v42 }
 0x4bb   : > { %v8872_v7 = vsel %vm8697_vm12, %v1918_v45, -1e+30  ;;  %v2319_v62 = vpop.xlane.xlu1 %2318  ;;  %v8881_v46 = vsel %vm8697_vm12, %v1993_v57, -1e+30 }
 0x4bc   : > { %v2459_v23 = vsub.f32 %v8705_v61, %v2319_v62  ;;  %v6382_v28 = vpop.f32.mrf.mxu0  ;;  %v6400_v25 = vpop.f32.mrf.mxu1  ;;  %v2371_v36 = vsel %vm2313_vm11, %v8872_v7, -inf  ;;  %6914 = vpow2.f32 %v2506_v13  ;;  %v2389_v55 = vsel %vm2313_vm11, %v8881_v46, -inf }
 0x4bd   : > { %2387 = vmax.xlane.f32.xlu0 %v2386_v33  ;;  %2372 = vmax.xlane.f32.xlu1 %v2371_v36 }
 0x4be   : > { %v1923_v44 = vpop.f32.mrf.mxu0  ;;  %v1998_v56 = vpop.f32.mrf.mxu1  ;;  %v2508_v45 = vmul.f32 1.442695, %v2459_v23 }
 0x4bf   : > { %v8885_v42 = vsel %vm8712_vm13, %v1923_v44, -1e+30  ;;  %v2322_v61 = vpop.xlane.xlu0 %2321  ;;  %v8893_v25 = vsel %vm8712_vm13, %v1998_v56, -1e+30 }
 0x4c0   : > { %v6385_v62 = vpop.f32.mrf.mxu0  ;;  %v6403_v28 = vpop.f32.mrf.mxu1  ;;  %v2374_v57 = vsel %vm2313_vm11, %v8885_v42, -inf  ;;  %6916 = vpow2.f32 %v2508_v45  ;;  %v2460_v23 = vsub.f32 %v8720_v5, %v2322_v61  ;;  %v2392_v56 = vsel %vm2313_vm11, %v8893_v25, -inf }
 0x4c1   : > { %2390 = vmax.xlane.f32.xlu1 %v2389_v55  ;;  %2375 = vmax.xlane.f32.xlu0 %v2374_v57 }
 0x4c2   : > { %v1926_v33 = vpop.f32.mrf.mxu0  ;;  %v2001_v36 = vpop.f32.mrf.mxu1  ;;  %v2510_v61 = vmul.f32 1.442695, %v2460_v23 }
 0x4c3   : > { %v8897_v13 = vsel %vm8724_vm14, %v1926_v33, -1e+30  ;;  %v8906_v55 = vsel %vm8724_vm14, %v2001_v36, -1e+30  ;;  %v2325_v57 = vpop.xlane.xlu0 %2324 }
 0x4c4   : > { %v2377_v44 = vsel %vm2313_vm11, %v8897_v13, -inf  ;;  %v6386_v62 = vpop.f32.mrf.mxu0  ;;  %v6404_v28 = vpop.f32.mrf.mxu1  ;;  %v2395_v45 = vsel %vm2313_vm11, %v8906_v55, -inf  ;;  %6918 = vpow2.f32 %v2510_v61 }
 0x4c5   : > { %2393 = vmax.xlane.f32.xlu0 %v2392_v56  ;;  %2378 = vmax.xlane.f32.xlu1 %v2377_v44  ;;  %v2461_v62 = vsub.f32 %v8732_v35, %v2325_v57 }
 0x4c6   : > { %v1931_v33 = vpop.f32.mrf.mxu0  ;;  %v2006_v30 = vpop.f32.mrf.mxu1 }
 0x4c7   : > { %v8910_v5 = vsel %vm8738_vm15, %v1931_v33, -1e+30  ;;  %v8919_v44 = vsel %vm8738_vm15, %v2006_v30, -1e+30  ;;  %v2512_v38 = vmul.f32 1.442695, %v2461_v62 }
 0x4c8   : > { %v6389_v28 = vpop.f32.mrf.mxu0  ;;  %v6407_v50 = vpop.f32.mrf.mxu1  ;;  %v2380_v36 = vsel %vm2313_vm11, %v8910_v5, -inf }
 0x4c9   : > { %2396 = vmax.xlane.f32.xlu1 %v2395_v45  ;;  %2381 = vmax.xlane.f32.xlu0 %v2380_v36  ;;  %v2398_v50 = vsel %vm2313_vm11, %v8919_v44, -inf  ;;  %v8929_v30 = vpop.eup %6914  ;;  %v2328_v45 = vpop.xlane.xlu0 %2327  ;;  %6920 = vpow2.f32 %v2512_v38 }
 0x4ca   : > { %v1934_v56 = vpop.f32.mrf.mxu0  ;;  %v2009_v33 = vpop.f32.mrf.mxu1  ;;  %v2462_v62 = vsub.f32 %v8745_v29, %v2328_v45 }
 0x4cb   : > { %v8923_v23 = vsel %vm8749_vm0, %v1934_v56, -1e+30  ;;  %v8933_v36 = vsel %vm8749_vm0, %v2009_v33, -1e+30  ;;  %v2331_v53 = vpop.xlane.xlu1 %2330 }
 0x4cc   : > { %v2383_v35 = vsel %vm2313_vm11, %v8923_v23, -inf  ;;  %v6390_v57 = vpop.f32.mrf.mxu0  ;;  %v6408_v28 = vpop.f32.mrf.mxu1  ;;  %v2401_v34 = vsel %vm2313_vm11, %v8933_v36, -inf  ;;  %v2514_v29 = vmul.f32 1.442695, %v2462_v62 }
 0x4cd   : > { %2399 = vmax.xlane.f32.xlu0 %v2398_v50  ;;  %2384 = vmax.xlane.f32.xlu1 %v2383_v35  ;;  %v2602_v28 = vsel %vm2313_vm11, %v8929_v30, 0.0  ;;  %v8940_v27 = vpop.eup %6916  ;;  %v2463_v35 = vsub.f32 %v8755_v49, %v2331_v53 }
 0x4ce   : > { %v2065_v56 = vpop.f32.mrf.mxu0  ;;  %v2140_v61 = vpop.f32.mrf.mxu1  ;;  %v2605_v17 = vsel %vm2313_vm11, %v8940_v27, 0.0  ;;  %6922 = vpow2.f32 %v2514_v29 }
 0x4cf   : > { %v8944_v33 = vsel %vm8684_vm10, %v2065_v56, -1e+30  ;;  %v8953_v24 = vsel %vm8684_vm10, %v2140_v61, -1e+30  ;;  %v2334_v53 = vpop.xlane.xlu0 %2333  ;;  %v2516_v62 = vmul.f32 1.442695, %v2463_v35 }
 0x4d0   : > { %v6417_v4 = vpop.f32.mrf.mxu0  ;;  %v6435_v57 = vpop.f32.mrf.mxu1  ;;  %v2464_v29 = vsub.f32 %v8761_v54, %v2334_v53 }
 0x4d1   : > { %2402 = vmax.xlane.f32.xlu1 %v2401_v34  ;;  %2603 = vadd.xlane.f32.xlu0 %v2602_v28  ;;  %v2404_v4 = vsel %vm2313_vm11, %v8944_v33, -inf  ;;  %v2422_v28 = vsel %vm2313_vm11, %v8953_v24, -inf  ;;  %v8963_v0 = vpop.eup %6918  ;;  %6924 = vpow2.f32 %v2516_v62 }
 0x4d2   : > { %v2068_v38 = vpop.f32.mrf.mxu0  ;;  %v2143_v50 = vpop.f32.mrf.mxu1  ;;  %v2518_v53 = vmul.f32 1.442695, %v2464_v29 }
 0x4d3   : > { %v8957_v34 = vsel %vm8697_vm12, %v2068_v38, -1e+30  ;;  %v8967_v38 = vsel %vm8697_vm12, %v2143_v50, -1e+30  ;;  %v2337_v51 = vpop.xlane.xlu1 %2336 }
 0x4d4   : > { %v6418_v45 = vpop.f32.mrf.mxu0  ;;  %v6436_v57 = vpop.f32.mrf.mxu1  ;;  %v2425_v35 = vsel %vm2313_vm11, %v8967_v38, -inf  ;;  %v2465_v62 = vsub.f32 %v8767_v58, %v2337_v51  ;;  %6926 = vpow2.f32 %v2518_v53 }
 0x4d5   : > { %2606 = vadd.xlane.f32.xlu1 %v2605_v17  ;;  %2405 = vmax.xlane.f32.xlu0 %v2404_v4  ;;  %v2407_v45 = vsel %vm2313_vm11, %v8957_v34, -inf }
 0x4d6   : > { %v2073_v56 = vpop.f32.mrf.mxu0  ;;  %v2148_v49 = vpop.f32.mrf.mxu1 }
 0x4d7   : > { %v8978_v50 = vsel %vm8712_vm13, %v2073_v56, -1e+30  ;;  %v8987_v20 = vsel %vm8712_vm13, %v2148_v49, -1e+30  ;;  %v2340_v56 = vpop.xlane.xlu0 %2339 }
 0x4d8   : > { %v6421_v57 = vpop.f32.mrf.mxu0  ;;  %v6439_v61 = vpop.f32.mrf.mxu1  ;;  %10942 = vst [vmem:[#allocation40_spill] sm:$0xff] %v8978_v50 }
 0x4d9   : > { %2408 = vmax.xlane.f32.xlu1 %v2407_v45  ;;  %2423 = vmax.xlane.f32.xlu0 %v2422_v28  ;;  %v2608_v57 = vsel %vm2313_vm11, %v8963_v0, 0.0  ;;  %v8974_v61 = vpop.eup %6920 }
 0x4da   : > { %v2076_v17 = vpop.f32.mrf.mxu0  ;;  %v2151_v4 = vpop.f32.mrf.mxu1  ;;  %v2611_v63 = vsel %vm2313_vm11, %v8974_v61, 0.0 }
 0x4db   : > { %v2343_v29 = vpop.xlane.xlu1 %2342 }
 0x4dc   : > { %v6422_v48 = vpop.f32.mrf.mxu0  ;;  %v6440_v1 = vpop.f32.mrf.mxu1  ;;  %v2467_v53 = vsub.f32 %v8779_v3, %v2343_v29 }
 0x4dd   : > { %2426 = vmax.xlane.f32.xlu1 %v2425_v35  ;;  %2609 = vadd.xlane.f32.xlu0 %v2608_v57  ;;  %v2410_v48 = vsel %vm2313_vm11, %v8978_v50, -inf  ;;  %v8991_v35 = vsel %vm8724_vm14, %v2076_v17, -1e+30  ;;  %v2520_v57 = vmul.f32 1.442695, %v2465_v62  ;;  %v8998_v50 = vpop.eup %6922 }
 0x4de   : > { %v2081_v28 = vpop.f32.mrf.mxu0  ;;  %v2156_v54 = vpop.f32.mrf.mxu1  ;;  %v2413_v49 = vsel %vm2313_vm11, %v8991_v35, -inf  ;;  %v2524_v3 = vmul.f32 1.442695, %v2467_v53 }
 0x4df   : > { %6928 = vpow2.f32 %v2520_v57 }
 0x4e0   : > { %v6425_v1 = vpop.f32.mrf.mxu0  ;;  %v6443_v45 = vpop.f32.mrf.mxu1 }
 0x4e1   : > { %2411 = vmax.xlane.f32.xlu0 %v2410_v48  ;;  %2612 = vadd.xlane.f32.xlu1 %v2611_v63  ;;  %v2428_v1 = vsel %vm2313_vm11, %v8987_v20, -inf  ;;  %v2466_v45 = vsub.f32 %v8773_v2, %v2340_v56  ;;  %v9002_v63 = vsel %vm8724_vm14, %v2151_v4, -1e+30  ;;  %v9013_v4 = vsel %vm8738_vm15, %v2081_v28, -1e+30  ;;  %v2346_v56 = vpop.xlane.xlu0 %2345 }
 0x4e2   : > { %v2084_v58 = vpop.f32.mrf.mxu0  ;;  %v2159_v51 = vpop.f32.mrf.mxu1  ;;  %10943 = vst [vmem:[#allocation41_spill] sm:$0xff] %v9002_v63  ;;  %v2431_v2 = vsel %vm2313_vm11, %v9002_v63, -inf  ;;  %10944 = vst [vmem:[#allocation42_spill] sm:$0xff] %v9013_v4  ;;  %v2416_v29 = vsel %vm2313_vm11, %v9013_v4, -inf  ;;  %v2468_v57 = vsub.f32 %v8785_v12, %v2346_v56 }
 0x4e3   : > { %v2522_v62 = vmul.f32 1.442695, %v2466_v45  ;;  %v9026_v28 = vsel %vm8749_vm0, %v2084_v58, -1e+30  ;;  %v9037_v58 = vsel %vm8749_vm0, %v2159_v51, -1e+30 }
 0x4e4   : > { %v6426_v6 = vpop.f32.mrf.mxu0  ;;  %v6444_v31 = vpop.f32.mrf.mxu1  ;;  %v2419_v56 = vsel %vm2313_vm11, %v9026_v28, -inf  ;;  %10945 = vst [vmem:[#allocation43_spill] sm:$0xff] %v9037_v58 }
 0x4e5   : > { %2429 = vmax.xlane.f32.xlu0 %v2428_v1  ;;  %2414 = vmax.xlane.f32.xlu1 %v2413_v49  ;;  %v2614_v6 = vsel %vm2313_vm11, %v8998_v50, 0.0  ;;  %v9009_v31 = vpop.eup %6924  ;;  %6930 = vpow2.f32 %v2522_v62 }
 0x4e6   : > { %v2215_v17 = vpop.f32.mrf.mxu0  ;;  %v2617_v49 = vsel %vm2313_vm11, %v9009_v31, 0.0  ;;  %6932 = vpow2.f32 %v2524_v3  ;;  %v9028_v62 = vpop.eup %6926  ;;  %v2437_v3 = vsel %vm2313_vm11, %v9037_v58, -inf }
 0x4e8   : > { %v6453_v48 = vpop.f32.mrf.mxu0 }
 0x4e9   : > { %2432 = vmax.xlane.f32.xlu1 %v2431_v2  ;;  %2615 = vadd.xlane.f32.xlu0 %v2614_v6  ;;  %v9022_v48 = vsel %vm8738_vm15, %v2156_v54, -1e+30  ;;  %v2349_v2 = vpop.xlane.xlu1 %2348  ;;  %v2526_v6 = vmul.f32 1.442695, %v2468_v57  ;;  %v2620_v57 = vsel %vm2313_vm11, %v9028_v62, 0.0 }
 0x4ea   : > { %v2218_v1 = vpop.f32.mrf.mxu0  ;;  %v2434_v12 = vsel %vm2313_vm11, %v9022_v48, -inf  ;;  %v2469_v54 = vsub.f32 %v8791_v16, %v2349_v2  ;;  %v9047_v16 = vsel %vm8684_vm10, %v2215_v17, -1e+30 }
 0x4eb   : > { %6934 = vpow2.f32 %v2526_v6  ;;  %v2440_v2 = vsel %vm2313_vm11, %v9047_v16, -inf }
 0x4ec   : > { %v6454_v45 = vpop.f32.mrf.mxu0  ;;  %v9043_v63 = vpop.eup %6928 }
 0x4ed   : > { %2618 = vadd.xlane.f32.xlu1 %v2617_v49  ;;  %2417 = vmax.xlane.f32.xlu0 %v2416_v29  ;;  %v2528_v49 = vmul.f32 1.442695, %v2469_v54 }
 0x4ee   : > { %v2223_v53 = vpop.f32.mrf.mxu0 }
 0x4ef   : > { %6936 = vpow2.f32 %v2528_v49  ;;  %v9067_v49 = vsel %vm8712_vm13, %v2223_v53, -1e+30 }
 0x4f0   : > { %v6457_v45 = vpop.f32.mrf.mxu0  ;;  %10946 = vst [vmem:[#allocation44_spill] sm:$0xff] %v9067_v49  ;;  %v2446_v14 = vsel %vm2313_vm11, %v9067_v49, -inf }
 0x4f1   : > { %2420 = vmax.xlane.f32.xlu1 %v2419_v56  ;;  %2435 = vmax.xlane.f32.xlu0 %v2434_v12  ;;  %v9057_v56 = vsel %vm8697_vm12, %v2218_v1, -1e+30 }
 0x4f2   : > { %v2226_v29 = vpop.f32.mrf.mxu0  ;;  %v9053_v6 = vpop.eup %6930  ;;  %v2443_v54 = vsel %vm2313_vm11, %v9057_v56, -inf }
 0x4f3   : > { %v9059_v17 = vpop.eup %6932 }
 0x4f4   : > { %v6458_v4 = vpop.f32.mrf.mxu0  ;;  %v2629_v1 = vsel %vm2313_vm11, %v9059_v17, 0.0 }
 0x4f5   : > { %2438 = vmax.xlane.f32.xlu1 %v2437_v3  ;;  %2621 = vadd.xlane.f32.xlu0 %v2620_v57  ;;  %v2623_v4 = vsel %vm2313_vm11, %v9043_v63, 0.0  ;;  %v2626_v3 = vsel %vm2313_vm11, %v9053_v6, 0.0 }
 0x4f6   : > { %v2231_v51 = vpop.f32.mrf.mxu0 }
 0x4f8   : > { %v6461_v12 = vpop.f32.mrf.mxu0  ;;  %v9073_v57 = vpop.eup %6934 }
 0x4f9   : > { %2624 = vadd.xlane.f32.xlu1 %v2623_v4  ;;  %2441 = vmax.xlane.f32.xlu0 %v2440_v2  ;;  %v9077_v2 = vsel %vm8724_vm14, %v2226_v29, -1e+30  ;;  %v2632_v53 = vsel %vm2313_vm11, %v9073_v57, 0.0  ;;  %v9087_v4 = vsel %vm8738_vm15, %v2231_v51, -1e+30 }
 0x4fa   : > { %v2234_v11 = vpop.f32.mrf.mxu0  ;;  %v2449_v19 = vsel %vm2313_vm11, %v9077_v2, -inf  ;;  %10948 = vst [vmem:[#allocation46_spill] sm:$0xff] %v9087_v4  ;;  %v2452_v26 = vsel %vm2313_vm11, %v9087_v4, -inf }
 0x4fc   : > { %v6462_v45 = vpop.f32.mrf.mxu0  ;;  %v9083_v12 = vpop.eup %6936 }
 0x4fd   : > { %2444 = vmax.xlane.f32.xlu1 %v2443_v54  ;;  %2627 = vadd.xlane.f32.xlu0 %v2626_v3  ;;  %10947 = vst [vmem:[#allocation45_spill] sm:$0xff] %v9083_v12  ;;  %v2635_v29 = vsel %vm2313_vm11, %v9083_v12, 0.0  ;;  %v9095_v54 = vsel %vm8749_vm0, %v2234_v11, -1e+30  ;;  %v10958_v12 = vmov 0.0  }
 0x4fe   : > { %v2455_v45 = vsel %vm2313_vm11, %v9095_v54, -inf }
 0x501   : > { %2630 = vadd.xlane.f32.xlu1 %v2629_v1  ;;  %2447 = vmax.xlane.f32.xlu0 %v2446_v14 }
 0x505   : > { %2450 = vmax.xlane.f32.xlu1 %v2449_v19  ;;  %2633 = vadd.xlane.f32.xlu0 %v2632_v53 }
 0x509   : > { %2636 = vadd.xlane.f32.xlu1 %v2635_v29  ;;  %2453 = vmax.xlane.f32.xlu0 %v2452_v26 }
 0x50d   : > { %2456 = vmax.xlane.f32.xlu1 %v2455_v45 }
 0x529   : > { %v2352_v39 = vpop.xlane.xlu0 %2351 }
 0x52a   : > { %v2470_v51 = vsub.f32 %v8807_v10, %v2352_v39 }
 0x52c   : > { %v2530_v3 = vmul.f32 1.442695, %v2470_v51 }
 0x52d   : > { %v2355_v14 = vpop.xlane.xlu1 %2354 }
 0x52e   : > { %6938 = vpow2.f32 %v2530_v3  ;;  %v2471_v1 = vsub.f32 %v8817_v40, %v2355_v14 }
 0x530   : > { %v2532_v19 = vmul.f32 1.442695, %v2471_v1 }
 0x531   : > { %v2358_v53 = vpop.xlane.xlu0 %2357 }
 0x532   : > { %6940 = vpow2.f32 %v2532_v19  ;;  %v2472_v47 = vsub.f32 %v8825_v37, %v2358_v53 }
 0x534   : > { %v2534_v11 = vmul.f32 1.442695, %v2472_v47 }
 0x535   : > { %v2361_v29 = vpop.xlane.xlu1 %2360 }
 0x536   : > { %6942 = vpow2.f32 %v2534_v11  ;;  %v2473_v26 = vsub.f32 %v8833_v32, %v2361_v29 }
 0x538   : > { %v2536_v4 = vmul.f32 1.442695, %v2473_v26 }
 0x539   : > { %v2364_v45 = vpop.xlane.xlu0 %2363 }
 0x53a   : > { %6944 = vpow2.f32 %v2536_v4  ;;  %v2474_v10 = vsub.f32 %v8843_v52, %v2364_v45 }
 0x53b   : > { %v9104_v39 = vpop.eup %6938 }
 0x53c   : > { %10949 = vst [vmem:[#allocation47_spill] sm:$0xff] %v9104_v39  ;;  %v2538_v51 = vmul.f32 1.442695, %v2474_v10  ;;  %v2638_v40 = vsel %vm2313_vm11, %v9104_v39, 0.0 }
 0x53d   : > { %v2367_v3 = vpop.xlane.xlu1 %2366  ;;  %2639 = vadd.xlane.f32.xlu0 %v2638_v40 }
 0x53e   : > { %6946 = vpow2.f32 %v2538_v51  ;;  %v2475_v37 = vsub.f32 %v8851_v60, %v2367_v3 }
 0x53f   : > { %v9109_v14 = vpop.eup %6940 }
 0x540   : > { %10950 = vst [vmem:[#allocation48_spill] sm:$0xff] %v9109_v14  ;;  %v2540_v1 = vmul.f32 1.442695, %v2475_v37  ;;  %v2641_v32 = vsel %vm2313_vm11, %v9109_v14, 0.0 }
 0x541   : > { %2642 = vadd.xlane.f32.xlu1 %v2641_v32 }
 0x542   : > { %6948 = vpow2.f32 %v2540_v1  ;;  %v2370_v52 = vpop.xlane.xlu0 %2369 }
 0x543   : > { %v9113_v4 = vpop.eup %6942  ;;  %v2476_v19 = vsub.f32 %v8861_v41, %v2370_v52 }
 0x544   : > { %10951 = vst [vmem:[#allocation49_spill] sm:$0xff] %v9113_v4  ;;  %v2644_v53 = vsel %vm2313_vm11, %v9113_v4, 0.0 }
 0x545   : > { %v2542_v47 = vmul.f32 1.442695, %v2476_v19  ;;  %2645 = vadd.xlane.f32.xlu0 %v2644_v53 }
 0x546   : > { %v2373_v11 = vpop.xlane.xlu1 %2372  ;;  %v2388_v60 = vpop.xlane.xlu0 %2387 }
 0x547   : > { %v9118_v29 = vpop.eup %6944  ;;  %6950 = vpow2.f32 %v2542_v47  ;;  %v2477_v26 = vsub.f32 %v8872_v7, %v2373_v11  ;;  %v2482_v45 = vsub.f32 %v8868_v43, %v2388_v60 }
 0x548   : > { %10952 = vst [vmem:[#allocation50_spill] sm:$0xff] %v9118_v29  ;;  %v2647_v10 = vsel %vm2313_vm11, %v9118_v29, 0.0 }
 0x549   : > { %v2554_v51 = vmul.f32 1.442695, %v2482_v45  ;;  %2648 = vadd.xlane.f32.xlu1 %v2647_v10  ;;  %v2544_v41 = vmul.f32 1.442695, %v2477_v26 }
 0x54a   : > { %v2391_v40 = vpop.xlane.xlu1 %2390  ;;  %v9124_v3 = vpop.xlane.xlu0 %2375 }
 0x54b   : > { %v9126_v37 = vpop.eup %6946  ;;  %6952 = vpow2.f32 %v2554_v51  ;;  %v2483_v58 = vsub.f32 %v8881_v46, %v2391_v40 }
 0x54c   : > { %10953 = vst [vmem:[#allocation51_spill] sm:$0xff] %v9126_v37  ;;  %v2650_v1 = vsel %vm2313_vm11, %v9126_v37, 0.0  ;;  %6954 = vpow2.f32 %v2544_v41 }
 0x54d   : > { %2651 = vadd.xlane.f32.xlu0 %v2650_v1 }
 0x54e   : > { %v9130_v7 = vpop.xlane.xlu1 %2378  ;;  %v9132_v43 = vpop.xlane.xlu0 %2393 }
 0x54f   : > { %v9134_v32 = vpop.eup %6948  ;;  %v2484_v40 = vsub.f32 %v8893_v25, %v9132_v43  ;;  %v2479_v25 = vsub.f32 %v8897_v13, %v9130_v7 }
 0x550   : > { %10954 = vst [vmem:[#allocation52_spill] sm:$0xff] %v9134_v32  ;;  %v2653_v52 = vsel %vm2313_vm11, %v9134_v32, 0.0 }
 0x551   : > { %2654 = vadd.xlane.f32.xlu1 %v2653_v52 }
 0x552   : > { %v9138_v19 = vpop.xlane.xlu1 %2396  ;;  %v9140_v53 = vpop.xlane.xlu0 %2381 }
 0x554   : > { %v9142_v47 = vpop.eup %6950 }
 0x555   : > { %10955 = vst [vmem:[#allocation53_spill] sm:$0xff] %v9142_v47  ;;  %v2656_v11 = vsel %vm2313_vm11, %v9142_v47, 0.0 }
 0x556   : > { %v9146_v60 = vpop.xlane.xlu1 %2384  ;;  %2657 = vadd.xlane.f32.xlu1 %v2656_v11  ;;  %v9148_v26 = vpop.xlane.xlu0 %2399 }
 0x558   : > { %v9150_v45 = vpop.eup %6952 }
 0x559   : > { %10956 = vst [vmem:[#allocation54_spill] sm:$0xff] %v9150_v45  ;;  %v2674_v51 = vsel %vm2313_vm11, %v9150_v45, 0.0  ;;  %v9156_v1 = vpop.eup %6954 }
 0x55a   : > { %v9152_v10 = vpop.xlane.xlu1 %2402  ;;  %v2604_v41 = vpop.xlane.xlu0 %2603  ;;  %10957 = vst [vmem:[#allocation55_spill] sm:$0xff] %v9156_v1  ;;  %2675 = vadd.xlane.f32.xlu0 %v2674_v51  ;;  %v2659_v47 = vsel %vm2313_vm11, %v9156_v1, 0.0 }
 0x55b   : > { %6956 = vrcp.f32 %v2604_v41 }
 0x55e   : > { %v2607_v52 = vpop.xlane.xlu1 %2606  ;;  %v9160_v32 = vpop.xlane.xlu0 %2405  ;;  %2660 = vadd.xlane.f32.xlu0 %v2659_v47 }
 0x55f   : > { %6958 = vrcp.f32 %v2607_v52 }
 0x562   : > { %v2409_v11 = vpop.xlane.xlu1 %2408  ;;  %v9162_v37 = vpop.xlane.xlu0 %2423 }
 0x566   : > { %v9164_v29 = vpop.xlane.xlu1 %2426  ;;  %v2610_v4 = vpop.xlane.xlu0 %2609 }
 0x567   : > { %1629 = vrot.lane.b32.xlu1 %v8550_v59, %s7662_s23  ;;  %6960 = vrcp.f32 %v2610_v4 }
 0x568   : > { %v6957_v45 = vpop.eup %6956 }
 0x569   : > { %v2794_v14 = vmul.f32 %v6957_v45, %v8929_v30  ;;  %v2478_v30 = vsub.f32 %v8885_v42, %v9124_v3 }
 0x56a   : > { %v2613_v51 = vpop.xlane.xlu1 %2612  ;;  %v9168_v41 = vpop.xlane.xlu0 %2411 }
 0x56b   : > { %6962 = vrcp.f32 %v2613_v51  ;;  %v2558_v51 = vmul.f32 1.442695, %v2484_v40 }
 0x56c   : > { %v6959_v1 = vpop.eup %6958 }
 0x56d   : > { %v2795_v47 = vmul.f32 %v6959_v1, %v8940_v27  ;;  %v2556_v27 = vmul.f32 1.442695, %v2483_v58  ;;  %v2486_v1 = vsub.f32 %v8919_v44, %v9148_v26  ;;  %v2548_v44 = vmul.f32 1.442695, %v2479_v25 }
 0x56e   : > { %v2415_v52 = vpop.xlane.xlu1 %2414  ;;  %v9172_v39 = vpop.xlane.xlu0 %2429 }
 0x56f   : > { %v2842_v49 = vpack.c.bf16 %v2795_v47, %v2794_v14  ;;  %v2562_v47 = vmul.f32 1.442695, %v2486_v1 }
 0x571   : > { %6470 = vmatmul.mubr.msk.bf16.vlgmr.msra.gmra.mxu1 %vm2313_vm11, %v2842_v49 }
 0x572   : > { %v9176_v59 = vpop.xlane.xlu1 %2432  ;;  %v2616_v4 = vpop.xlane.xlu0 %2615  ;;  %6500 = vmatpush3.bf16.msra.mxu1 %v8803_v15  ;;  %6473 = vmatprep.mubr.msk.bf16.mxu1 %vm7659_vm8, %v10958_v12 }
 0x573   : > { %6501 = vmatprep.subr.bf16.mxu1 %v10958_v12  ;;  %6964 = vrcp.f32 %v2616_v4 }
 0x574   : > { %1619 = vrot.lane.b32.xlu0 %v8570_v8, %s7662_s23  ;;  %v6961_v14 = vpop.eup %6960  ;;  %v2546_v8 = vmul.f32 1.442695, %v2478_v30 }
 0x575   : > { %v2796_v42 = vmul.f32 %v6961_v14, %v8963_v0 }
 0x576   : > { %v2619_v46 = vpop.xlane.xlu1 %2618  ;;  %v9186_v49 = vpop.xlane.xlu0 %2417  ;;  %6502 = vmatpush3.bf16.msra.mxu1 %v8795_v18 }
 0x577   : > { %6966 = vrcp.f32 %v2619_v46  ;;  %6503 = vmatprep.subr.bf16.mxu1 %v10958_v12 }
 0x578   : > { %v6963_v15 = vpop.eup %6962  ;;  %6968 = vpow2.f32 %v2556_v27  ;;  %v2491_v27 = vsub.f32 %v8991_v35, %v2415_v52 }
 0x579   : > { %v2797_v3 = vmul.f32 %v6963_v15, %v8974_v61  ;;  %6970 = vpow2.f32 %v2546_v8  ;;  %v2489_v61 = vsub.f32 %v8957_v34, %v2409_v11  ;;  %v2480_v34 = vsub.f32 %v8910_v5, %v9140_v53 }
 0x57a   : > { %v9192_v58 = vpop.xlane.xlu1 %2420  ;;  %v2436_v45 = vpop.xlane.xlu0 %2435  ;;  %6504 = vmatpush3.bf16.msra.mxu1 %v8813_v21  ;;  %6972 = vpow2.f32 %v2558_v51  ;;  %v2485_v21 = vsub.f32 %v8906_v55, %v9138_v19  ;;  %v2572_v40 = vmul.f32 1.442695, %v2491_v27  ;;  %v2481_v8 = vsub.f32 %v8923_v23, %v9146_v60 }
 0x57b   : > { %v2843_v18 = vpack.c.bf16 %v2797_v3, %v2796_v42  ;;  %6535 = vmatprep.subr.bf16.mxu1 %v10958_v12  ;;  %v2568_v7 = vmul.f32 1.442695, %v2489_v61  ;;  %v2498_v35 = vsub.f32 %v9022_v48, %v2436_v45  ;;  %v2550_v42 = vmul.f32 1.442695, %v2480_v34 }
 0x57c   : > { %v2560_v46 = vmul.f32 1.442695, %v2485_v21  ;;  %v2493_v48 = vsub.f32 %v9026_v28, %v9192_v58  ;;  %v2552_v23 = vmul.f32 1.442695, %v2481_v8  ;;  %v2487_v60 = vsub.f32 %v8933_v36, %v9152_v10 }
 0x57d   : > { %6474 = vmatmul.mubr.msk.bf16.gmra.mxu1 %vm2313_vm11, %v2843_v18  ;;  %v2586_v45 = vmul.f32 1.442695, %v2498_v35  ;;  %v2488_v36 = vsub.f32 %v8944_v33, %v9160_v32  ;;  %v2494_v27 = vsub.f32 %v8953_v24, %v9162_v37  ;;  %v2495_v37 = vsub.f32 %v8967_v38, %v9164_v29 }
 0x57e   : > { %v9203_v43 = vpop.xlane.xlu1 %2438  ;;  %v2622_v0 = vpop.xlane.xlu0 %2621  ;;  %6477 = vmatprep.mubr.msk.bf16.mxu1 %vm7659_vm8, %v10958_v12  ;;  %v2576_v25 = vmul.f32 1.442695, %v2493_v48  ;;  %v2564_v61 = vmul.f32 1.442695, %v2487_v60 }
 0x57f   : > { %6974 = vrcp.f32 %v2622_v0 }
 0x580   : > { %v6965_v13 = vpop.eup %6964  ;;  %6976 = vpow2.f32 %v2562_v47 }
 0x581   : > { %v2798_v55 = vmul.f32 %v6965_v13, %v8998_v50 }
 0x582   : > { %v2625_v26 = vpop.xlane.xlu1 %2624  ;;  %v2442_v4 = vpop.xlane.xlu0 %2441 }
 0x583   : > { %6978 = vrcp.f32 %v2625_v26  ;;  %v2500_v28 = vsub.f32 %v9047_v16, %v2442_v4 }
 0x584   : > { %v6967_v30 = vpop.eup %6966  ;;  %6980 = vpow2.f32 %v2548_v44 }
 0x585   : > { %v2799_v19 = vmul.f32 %v6967_v30, %v9009_v31  ;;  %v9217_v15 = vpop.eup %6968  ;;  %6982 = vpow2.f32 %v2568_v7  ;;  %v2590_v4 = vmul.f32 1.442695, %v2500_v28  ;;  %v10961_v28 = vld [vmem:[#allocation45_spill] sm:$0xff] }
 0x586   : > { %v9213_v11 = vpop.xlane.xlu1 %2444  ;;  %v2628_v14 = vpop.xlane.xlu0 %2627  ;;  %6984 = vpow2.f32 %v2560_v46  ;;  %v2677_v50 = vsel %vm2313_vm11, %v9217_v15, 0.0 }
 0x587   : > { %v2844_v52 = vpack.c.bf16 %v2799_v19, %v2798_v55  ;;  %6986 = vrcp.f32 %v2628_v14  ;;  %v9227_v31 = vpop.eup %6970  ;;  %v2501_v13 = vsub.f32 %v9057_v56, %v9213_v11 }
 0x588   : > { %6988 = vpow2.f32 %v2572_v40  ;;  %v9235_v3 = vpop.eup %6972  ;;  %v2662_v18 = vsel %vm2313_vm11, %v9227_v31, 0.0 }
 0x589   : > { %6478 = vmatmul.mubr.msk.bf16.gmra.mxu1 %vm2313_vm11, %v2844_v52  ;;  %v2680_v26 = vsel %vm2313_vm11, %v9235_v3, 0.0  ;;  %v2592_v46 = vmul.f32 1.442695, %v2501_v13 }
 0x58a   : > { %v2631_v5 = vpop.xlane.xlu1 %2630  ;;  %v9223_v53 = vpop.xlane.xlu0 %2447  ;;  %6505 = vmatprep.mubr.msk.bf16.mxu1 %vm7659_vm8, %v10958_v12 }
 0x58b   : > { %2678 = vadd.xlane.f32.xlu1 %v2677_v50  ;;  %6990 = vrcp.f32 %v2631_v5  ;;  %v10959_v5 = vld [vmem:[#allocation40_spill] sm:$0xff] }
 0x58c   : > { %6992 = vpow2.f32 %v2550_v42  ;;  %v6975_v51 = vpop.eup %6974  ;;  %v2580_v42 = vmul.f32 1.442695, %v2495_v37  ;;  %v2490_v50 = vsub.f32 %v10959_v5, %v9168_v41 }
 0x58d   : > { %6994 = vpow2.f32 %v2586_v45  ;;  %v9240_v0 = vpop.eup %6976  ;;  %v2800_v10 = vmul.f32 %v6975_v51, %v9028_v62  ;;  %v2566_v62 = vmul.f32 1.442695, %v2488_v36  ;;  %v10960_v45 = vld [vmem:[#allocation32_spill] sm:$0xff]  ;;  %v2496_v51 = vsub.f32 %v8987_v20, %v9172_v39  ;;  %v10962_v20 = vld [vmem:[#allocation41_spill] sm:$0xff] }
 0x58e   : > { %v2451_v1 = vpop.xlane.xlu1 %2450  ;;  %v2634_v58 = vpop.xlane.xlu0 %2633  ;;  %6996 = vpow2.f32 %v2552_v23  ;;  %v2686_v33 = vsel %vm2313_vm11, %v9240_v0, 0.0 }
 0x58f   : > { %2663 = vadd.xlane.f32.xlu1 %v2662_v18  ;;  %6998 = vrcp.f32 %v2634_v58  ;;  %v2503_v34 = vsub.f32 %v9077_v2, %v2451_v1  ;;  %v2578_v2 = vmul.f32 1.442695, %v2494_v27  ;;  %v2570_v18 = vmul.f32 1.442695, %v2490_v50 }
 0x590   : > { %v6979_v47 = vpop.eup %6978  ;;  %7000 = vpow2.f32 %v2576_v25 }
 0x591   : > { %v2801_v21 = vmul.f32 %v6979_v47, %v9043_v63  ;;  %v9248_v16 = vpop.eup %6980  ;;  %v2596_v52 = vmul.f32 1.442695, %v2503_v34  ;;  %v10964_v34 = vld [vmem:[#allocation43_spill] sm:$0xff] }
 0x592   : > { %v2637_v44 = vpop.xlane.xlu1 %2636  ;;  %v9254_v32 = vpop.eup %6982  ;;  %v2665_v56 = vsel %vm2313_vm11, %v9248_v16, 0.0 }
 0x593   : > { %2681 = vadd.xlane.f32.xlu1 %v2680_v26  ;;  %7002 = vrcp.f32 %v2637_v44  ;;  %2687 = vadd.xlane.f32.xlu0 %v2686_v33  ;;  %v2845_v63 = vpack.c.bf16 %v2801_v21, %v2800_v10  ;;  %v9256_v7 = vpop.eup %6984  ;;  %v2695_v11 = vsel %vm2313_vm11, %v9254_v32, 0.0  ;;  %v2582_v44 = vmul.f32 1.442695, %v2496_v51  ;;  %v10963_v33 = vld [vmem:[#allocation42_spill] sm:$0xff]  ;;  %v10967_v51 = vld [vmem:[#allocation29_spill] sm:$0xff] }
 0x594   : > { %7004 = vpow2.f32 %v2564_v61  ;;  %v6987_v30 = vpop.eup %6986 }
 0x595   : > { %6488 = vmatmul.mubr.msk.bf16.vlgmr.msra.gmra.mxu0 %vm2313_vm11, %v2845_v63  ;;  %7006 = vpow2.f32 %v2590_v4  ;;  %v9267_v14 = vpop.eup %6988  ;;  %v2802_v19 = vmul.f32 %v6987_v30, %v9053_v6 }
 0x596   : > { %6518 = vmatpush3.bf16.msra.mxu0 %v8797_v9  ;;  %v2457_v55 = vpop.xlane.xlu1 %2456  ;;  %7008 = vpow2.f32 %v2566_v62  ;;  %6491 = vmatprep.mubr.msk.bf16.mxu0 %vm7659_vm8, %v10958_v12  ;;  %v2683_v9 = vsel %vm2313_vm11, %v9256_v7, 0.0  ;;  %v2701_v38 = vsel %vm2313_vm11, %v9267_v14, 0.0 }
 0x597   : > { %2666 = vadd.xlane.f32.xlu1 %v2665_v56  ;;  %2696 = vadd.xlane.f32.xlu0 %v2695_v11  ;;  %7010 = vpow2.f32 %v2592_v46  ;;  %v2505_v8 = vsub.f32 %v9095_v54, %v2457_v55  ;;  %v2499_v11 = vsub.f32 %v10964_v34, %v9203_v43  ;;  %v2454_v43 = vpop.xlane.xlu0 %2453  ;;  %v10970_v34 = vld [vmem:[#allocation31_spill] sm:$0xff] }
 0x598   : > { %6519 = vmatprep.subr.bf16.mxu0 %v10958_v12  ;;  %v6991_v24 = vpop.eup %6990  ;;  %7012 = vpow2.f32 %v2578_v2  ;;  %v10965_v2 = vld [vmem:[#allocation44_spill] sm:$0xff] }
 0x599   : > { %v2803_v40 = vmul.f32 %v6991_v24, %v9059_v17  ;;  %v9278_v35 = vpop.eup %6992  ;;  %7014 = vpow2.f32 %v2596_v52  ;;  %v2600_v48 = vmul.f32 1.442695, %v2505_v8  ;;  %v2588_v37 = vmul.f32 1.442695, %v2499_v11 }
 0x59a   : > { %6520 = vmatpush3.bf16.msra.mxu0 %v8801_v22  ;;  %v9284_v29 = vpop.eup %6994  ;;  %v2668_v22 = vsel %vm2313_vm11, %v9278_v35, 0.0  ;;  %7016 = vpow2.f32 %v2580_v42 }
 0x59b   : > { %2684 = vadd.xlane.f32.xlu1 %v2683_v9  ;;  %2702 = vadd.xlane.f32.xlu0 %v2701_v38  ;;  %v2846_v6 = vpack.c.bf16 %v2803_v40, %v2802_v19  ;;  %v9287_v17 = vpop.eup %6996  ;;  %v2722_v23 = vsel %vm2313_vm11, %v9284_v29, 0.0  ;;  %7018 = vpow2.f32 %v2600_v48  ;;  %v2502_v9 = vsub.f32 %v10965_v2, %v9223_v53  ;;  %v10966_v38 = vld [vmem:[#allocation46_spill] sm:$0xff] }
 0x59c   : > { %6521 = vmatprep.subr.bf16.mxu0 %v10958_v12  ;;  %v6999_v54 = vpop.eup %6998  ;;  %v2671_v1 = vsel %vm2313_vm11, %v9287_v17, 0.0  ;;  %7020 = vpow2.f32 %v2570_v18  ;;  %v10973_v2 = vld [vmem:[#allocation50_spill] sm:$0xff] }
 0x59d   : > { %6492 = vmatmul.mubr.msk.bf16.gmra.mxu0 %vm2313_vm11, %v2846_v6  ;;  %v9297_v60 = vpop.eup %7000  ;;  %v2804_v25 = vmul.f32 %v6999_v54, %v9073_v57  ;;  %v2497_v57 = vsub.f32 %v10962_v20, %v9176_v59  ;;  %7022 = vpow2.f32 %v2582_v44  ;;  %v2492_v59 = vsub.f32 %v10963_v33, %v9186_v49  ;;  %v10969_v33 = vld [vmem:[#allocation48_spill] sm:$0xff] }
 0x59e   : > { %6522 = vmatpush3.bf16.msra.mxu0 %v10960_v45  ;;  %6495 = vmatprep.mubr.msk.bf16.mxu0 %vm7659_vm8, %v10958_v12  ;;  %v2707_v61 = vsel %vm2313_vm11, %v9297_v60, 0.0  ;;  %v2594_v8 = vmul.f32 1.442695, %v2502_v9  ;;  %v2504_v6 = vsub.f32 %v10966_v38, %v2454_v43 }
 0x59f   : > { %2669 = vadd.xlane.f32.xlu1 %v2668_v22  ;;  %2723 = vadd.xlane.f32.xlu0 %v2722_v23  ;;  %v2584_v13 = vmul.f32 1.442695, %v2497_v57  ;;  %v2574_v46 = vmul.f32 1.442695, %v2492_v59 }
 0x5a0   : > { %v7003_v41 = vpop.eup %7002  ;;  %6553 = vmatprep.subr.bf16.mxu0 %v10958_v12  ;;  %v2598_v53 = vmul.f32 1.442695, %v2504_v6  ;;  %v10975_v6 = vld [vmem:[#allocation36_spill] sm:$0xff] }
 0x5a1   : > { %v2805_v58 = vmul.f32 %v7003_v41, %v10961_v28  ;;  %v9308_v47 = vpop.eup %7004  ;;  %7024 = vpow2.f32 %v2584_v13 }
 0x5a2   : > { %v9312_v36 = vpop.eup %7006  ;;  %v2689_v39 = vsel %vm2313_vm11, %v9308_v47, 0.0  ;;  %7026 = vpow2.f32 %v2574_v46 }
 0x5a3   : > { %2672 = vadd.xlane.f32.xlu1 %v2671_v1  ;;  %2708 = vadd.xlane.f32.xlu0 %v2707_v61  ;;  %v2847_v10 = vpack.c.bf16 %v2805_v58, %v2804_v25  ;;  %v9314_v21 = vpop.eup %7008  ;;  %v2728_v26 = vsel %vm2313_vm11, %v9312_v36, 0.0  ;;  %7028 = vpow2.f32 %v2588_v37 }
 0x5a4   : > { %v9325_v4 = vpop.eup %7010  ;;  %v2692_v63 = vsel %vm2313_vm11, %v9314_v21, 0.0  ;;  %7030 = vpow2.f32 %v2594_v8 }
 0x5a5   : > { %6496 = vmatmul.mubr.msk.bf16.gmra.mxu0 %vm2313_vm11, %v2847_v10  ;;  %v9331_v62 = vpop.eup %7012  ;;  %v2731_v27 = vsel %vm2313_vm11, %v9325_v4, 0.0  ;;  %7032 = vpow2.f32 %v2598_v53 }
 0x5a6   : > { %6523 = vmatprep.mubr.msk.bf16.mxu0 %vm7659_vm8, %v10958_v12  ;;  %v9335_v56 = vpop.eup %7014  ;;  %v2710_v49 = vsel %vm2313_vm11, %v9331_v62, 0.0 }
 0x5a7   : > { %2690 = vadd.xlane.f32.xlu1 %v2689_v39  ;;  %2729 = vadd.xlane.f32.xlu0 %v2728_v26  ;;  %v9337_v30 = vpop.eup %7016  ;;  %v2737_v55 = vsel %vm2313_vm11, %v9335_v56, 0.0  ;;  %v10968_v26 = vld [vmem:[#allocation47_spill] sm:$0xff] }
 0x5a8   : > { %v9345_v24 = vpop.eup %7018  ;;  %v2713_v19 = vsel %vm2313_vm11, %v9337_v30, 0.0 }
 0x5a9   : > { %v9351_v40 = vpop.eup %7020  ;;  %v2743_v52 = vsel %vm2313_vm11, %v9345_v24, 0.0 }
 0x5aa   : > { %v2698_v42 = vsel %vm2313_vm11, %v9351_v40, 0.0  ;;  %v9358_v5 = vpop.eup %7022 }
 0x5ab   : > { %2693 = vadd.xlane.f32.xlu1 %v2692_v63  ;;  %2732 = vadd.xlane.f32.xlu0 %v2731_v27  ;;  %v2716_v50 = vsel %vm2313_vm11, %v9358_v5, 0.0 }
 0x5ae   : > { %v9362_v22 = vpop.eup %7024 }
 0x5af   : > { %2711 = vadd.xlane.f32.xlu1 %v2710_v49  ;;  %2738 = vadd.xlane.f32.xlu0 %v2737_v55  ;;  %v2719_v54 = vsel %vm2313_vm11, %v9362_v22, 0.0  ;;  %v9366_v48 = vpop.eup %7026  ;;  %v10971_v49 = vld [vmem:[#allocation30_spill] sm:$0xff]  ;;  %v10972_v55 = vld [vmem:[#allocation49_spill] sm:$0xff] }
 0x5b0   : > { %v2704_v45 = vsel %vm2313_vm11, %v9366_v48, 0.0  ;;  %v9370_v23 = vpop.eup %7028 }
 0x5b1   : > { %v2725_v41 = vsel %vm2313_vm11, %v9370_v23, 0.0  ;;  %v9374_v18 = vpop.eup %7030 }
 0x5b2   : > { %v2734_v28 = vsel %vm2313_vm11, %v9374_v18, 0.0  ;;  %v9380_v58 = vpop.eup %7032 }
 0x5b3   : > { %2714 = vadd.xlane.f32.xlu1 %v2713_v19  ;;  %2744 = vadd.xlane.f32.xlu0 %v2743_v52  ;;  %v2740_v61 = vsel %vm2313_vm11, %v9380_v58, 0.0  ;;  %v10974_v19 = vld [vmem:[#allocation34_spill] sm:$0xff] }
 0x5b7   : > { %2699 = vadd.xlane.f32.xlu1 %v2698_v42 }
 0x5bb   : > { %2717 = vadd.xlane.f32.xlu1 %v2716_v50  ;;  %v10976_v50 = vld [vmem:[#allocation51_spill] sm:$0xff] }
 0x5bf   : > { %2720 = vadd.xlane.f32.xlu1 %v2719_v54 }
 0x5c3   : > { %2705 = vadd.xlane.f32.xlu1 %v2704_v45  ;;  %v10977_v45 = vld [vmem:[#allocation52_spill] sm:$0xff] }
 0x5c6   : > { %v2640_v1 = vpop.xlane.xlu0 %2639 }
 0x5c7   : > { %2726 = vadd.xlane.f32.xlu1 %v2725_v41  ;;  %7034 = vrcp.f32 %v2640_v1 }
 0x5c9   : > { %1627 = vrot.lane.b32.xlu0 %v10967_v51, %s7662_s23 }
 0x5ca   : > { %v2643_v25 = vpop.xlane.xlu1 %2642 }
 0x5cb   : > { %7036 = vrcp.f32 %v2643_v25  ;;  %2735 = vadd.xlane.f32.xlu1 %v2734_v28  ;;  %v10978_v28 = vld [vmem:[#allocation53_spill] sm:$0xff] }
 0x5ce   : > { %v2646_v10 = vpop.xlane.xlu0 %2645 }
 0x5cf   : > { %2741 = vadd.xlane.f32.xlu1 %v2740_v61  ;;  %7038 = vrcp.f32 %v2646_v10  ;;  %v10979_v10 = vld [vmem:[#allocation55_spill] sm:$0xff] }
 0x5d2   : > { %v2649_v44 = vpop.xlane.xlu1 %2648 }
 0x5d3   : > { %7040 = vrcp.f32 %v2649_v44 }
 0x5d4   : > { %v7035_v20 = vpop.eup %7034 }
 0x5d5   : > { %v2806_v13 = vmul.f32 %v7035_v20, %v10968_v26  ;;  %v10982_v26 = vld [vmem:[#allocation39_spill] sm:$0xff] }
 0x5d6   : > { %v2652_v57 = vpop.xlane.xlu0 %2651 }
 0x5d7   : > { %7042 = vrcp.f32 %v2652_v57  ;;  %v10980_v57 = vld [vmem:[#allocation33_spill] sm:$0xff] }
 0x5d8   : > { %v7037_v39 = vpop.eup %7036 }
 0x5d9   : > { %v2807_v59 = vmul.f32 %v7037_v39, %v10969_v33  ;;  %v10981_v39 = vld [vmem:[#allocation35_spill] sm:$0xff] }
 0x5da   : > { %v2655_v63 = vpop.xlane.xlu1 %2654 }
 0x5db   : > { %v2848_v27 = vpack.c.bf16 %v2807_v59, %v2806_v13  ;;  %7044 = vrcp.f32 %v2655_v63 }
 0x5dc   : > { %v7039_v46 = vpop.eup %7038 }
 0x5dd   : > { %6506 = vmatmul.mubr.msk.bf16.vlgmr.msra.gmra.mxu1 %vm2313_vm11, %v2848_v27  ;;  %v2808_v37 = vmul.f32 %v7039_v46, %v10972_v55 }
 0x5de   : > { %6536 = vmatpush3.bf16.msra.mxu1 %v10970_v34  ;;  %6509 = vmatprep.mubr.msk.bf16.mxu1 %vm7659_vm8, %v10958_v12 }
 0x5df   : > { %6537 = vmatprep.subr.bf16.mxu1 %v10958_v12  ;;  %v2658_v52 = vpop.xlane.xlu1 %2657 }
 0x5e0   : > { %v7041_v11 = vpop.eup %7040  ;;  %1625 = vrot.lane.b32.xlu1 %v10971_v49, %s7662_s23  ;;  %7046 = vrcp.f32 %v2658_v52 }
 0x5e1   : > { %v2809_v9 = vmul.f32 %v7041_v11, %v10973_v2 }
 0x5e2   : > { %6538 = vmatpush3.bf16.msra.mxu1 %v10974_v19 }
 0x5e3   : > { %6539 = vmatprep.subr.bf16.mxu1 %v10958_v12  ;;  %v2849_v43 = vpack.c.bf16 %v2809_v9, %v2808_v37  ;;  %v2676_v8 = vpop.xlane.xlu0 %2675  ;;  %v9418_v13 = vpop.permute.xlu1 %1629  ;;  %v10983_v37 = vld [vmem:[#allocation54_spill] sm:$0xff] }
 0x5e4   : > { %v7043_v38 = vpop.eup %7042 }
 0x5e5   : > { %6510 = vmatmul.mubr.msk.bf16.gmra.mxu1 %vm2313_vm11, %v2849_v43  ;;  %v2810_v54 = vmul.f32 %v7043_v38, %v10976_v50 }
 0x5e6   : > { %6540 = vmatpush3.bf16.msra.mxu1 %v10975_v6  ;;  %6513 = vmatprep.mubr.msk.bf16.mxu1 %vm7659_vm8, %v10958_v12 }
 0x5e7   : > { %6571 = vmatprep.subr.bf16.mxu1 %v10958_v12  ;;  %v2661_v53 = vpop.xlane.xlu0 %2660 }
 0x5e8   : > { %v7045_v42 = vpop.eup %7044  ;;  %7048 = vrcp.f32 %v2661_v53 }
 0x5e9   : > { %v2811_v41 = vmul.f32 %v7045_v42, %v10977_v45  ;;  %7050 = vrcp.f32 %v2676_v8  ;;  %v10984_v8 = vld [vmem:[#allocation38_spill] sm:$0xff] }
 0x5eb   : > { %v2850_v1 = vpack.c.bf16 %v2811_v41, %v2810_v54  ;;  %v1620_v63 = vpop.permute.xlu0 %1619 }
 0x5ed   : > { %6514 = vmatmul.mubr.msk.bf16.gmra.mxu1 %vm2313_vm11, %v2850_v1  ;;  %v7047_v51 = vpop.eup %7046 }
 0x5ee   : > { %6541 = vmatprep.mubr.msk.bf16.mxu1 %vm7659_vm8, %v10958_v12  ;;  %v2812_v61 = vmul.f32 %v7047_v51, %v10978_v28 }
 0x5f5   : > { %v7049_v25 = vpop.eup %7048 }
 0x5f6   : > { %v2813_v44 = vmul.f32 %v7049_v25, %v10979_v10  ;;  %v7051_v34 = vpop.eup %7050 }
 0x5f7   : > { %v2818_v2 = vmul.f32 %v7051_v34, %v10983_v37 }
 0x5f8   : > { %v2851_v20 = vpack.c.bf16 %v2813_v44, %v2812_v61 }
 0x5fa   : > { %6524 = vmatmul.mubr.msk.bf16.vlgmr.msra.gmra.mxu0 %vm2313_vm11, %v2851_v20 }
 0x5fb   : > { %6554 = vmatpush3.bf16.msra.mxu0 %v10980_v57  ;;  %6527 = vmatprep.mubr.msk.bf16.mxu0 %vm7659_vm8, %v10958_v12 }
 0x5fc   : > { %6555 = vmatprep.subr.bf16.mxu0 %v10958_v12 }
 0x5ff   : > { %6556 = vmatpush3.bf16.msra.mxu0 %v10981_v39 }
 0x600   : > { %6557 = vmatprep.subr.bf16.mxu0 %v10958_v12 }
 0x603   : > { %6558 = vmatpush3.bf16.msra.mxu0 %v10982_v26 }
 0x604   : > { %6589 = vmatprep.subr.bf16.mxu0 %v10958_v12 }
 0x614   : > { %v2679_v33 = vpop.xlane.xlu1 %2678 }
 0x615   : > { %7052 = vrcp.f32 %v2679_v33 }
 0x618   : > { %v2664_v59 = vpop.xlane.xlu1 %2663 }
 0x619   : > { %7054 = vrcp.f32 %v2664_v59 }
 0x61c   : > { %v2682_v27 = vpop.xlane.xlu1 %2681  ;;  %v2688_v46 = vpop.xlane.xlu0 %2687 }
 0x620   : > { %v2667_v11 = vpop.xlane.xlu1 %2666  ;;  %v2697_v49 = vpop.xlane.xlu0 %2696 }
 0x621   : > { %7056 = vrcp.f32 %v2667_v11 }
 0x622   : > { %v7053_v55 = vpop.eup %7052  ;;  %7058 = vrcp.f32 %v2682_v27 }
 0x623   : > { %v2819_v9 = vmul.f32 %v7053_v55, %v9217_v15  ;;  %v10985_v15 = vld [vmem:[#allocation37_spill] sm:$0xff] }
 0x624   : > { %v2685_v19 = vpop.xlane.xlu1 %2684  ;;  %v2703_v52 = vpop.xlane.xlu0 %2702 }
 0x625   : > { %v2854_v43 = vpack.c.bf16 %v2819_v9, %v2818_v2  ;;  %7060 = vrcp.f32 %v2685_v19 }
 0x626   : > { %v7055_v42 = vpop.eup %7054 }
 0x627   : > { %6542 = vmatmul.mubr.msk.bf16.vlgmr.msra.gmra.mxu1 %vm2313_vm11, %v2854_v43  ;;  %v2814_v45 = vmul.f32 %v7055_v42, %v9227_v31 }
 0x628   : > { %6572 = vmatpush3.bf16.msra.mxu1 %v10984_v8  ;;  %v2670_v38 = vpop.xlane.xlu1 %2669  ;;  %6545 = vmatprep.mubr.msk.bf16.mxu1 %vm7659_vm8, %v10958_v12  ;;  %v9426_v6 = vpop.xlane.xlu0 %2723 }
 0x629   : > { %6573 = vmatprep.subr.bf16.mxu1 %v10958_v12  ;;  %7062 = vrcp.f32 %v2670_v38 }
 0x62c   : > { %6574 = vmatpush3.bf16.msra.mxu1 %v10985_v15  ;;  %v2673_v53 = vpop.xlane.xlu1 %2672  ;;  %v9430_v50 = vpop.xlane.xlu0 %2708 }
 0x62d   : > { %7064 = vrcp.f32 %v2673_v53  ;;  %6575 = vmatprep.subr.bf16.mxu1 %v10958_v12 }
 0x62e   : > { %v7057_v54 = vpop.eup %7056  ;;  %7066 = vrcp.f32 %v2688_v46 }
 0x62f   : > { %v2815_v41 = vmul.f32 %v7057_v54, %v9248_v16  ;;  %v7059_v1 = vpop.eup %7058 }
 0x630   : > { %6576 = vmatpush3.bf16.msra.mxu1 %v1620_v63  ;;  %v2691_v51 = vpop.xlane.xlu1 %2690  ;;  %v9437_v10 = vpop.xlane.xlu0 %2729  ;;  %v2820_v44 = vmul.f32 %v7059_v1, %v9235_v3 }
 0x631   : > { %7068 = vrcp.f32 %v2691_v51  ;;  %v2852_v25 = vpack.c.bf16 %v2815_v41, %v2814_v45  ;;  %v9435_v61 = vpop.f32.mrf.mxu1 }
 0x632   : > { %v7061_v28 = vpop.eup %7060  ;;  %7070 = vrcp.f32 %v2697_v49 }
 0x633   : > { %6528 = vmatmul.mubr.msk.bf16.gmra.mxu0 %vm2313_vm11, %v2852_v25  ;;  %v2821_v20 = vmul.f32 %v7061_v28, %v9256_v7  ;;  %v6471_v31 = vpop.f32.mrf.mxu1 }
 0x634   : > { %v2694_v57 = vpop.xlane.xlu1 %2693  ;;  %6531 = vmatprep.mubr.msk.bf16.mxu0 %vm7659_vm8, %v10958_v12  ;;  %v2733_v3 = vpop.xlane.xlu0 %2732 }
 0x635   : > { %7072 = vrcp.f32 %v2694_v57  ;;  %v2855_v16 = vpack.c.bf16 %v2821_v20, %v2820_v44  ;;  %v9444_v39 = vpop.f32.mrf.mxu1 }
 0x636   : > { %v3394_v26 = vpack.c.bf16 %v9444_v39, %v9435_v61  ;;  %v7063_v33 = vpop.eup %7062 }
 0x637   : > { %6546 = vmatmul.mubr.msk.bf16.gmra.mxu1 %vm2313_vm11, %v2855_v16  ;;  %v6472_v59 = vpop.f32.mrf.mxu1  ;;  %v2816_v27 = vmul.f32 %v7063_v33, %v9278_v35 }
 0x638   : > { %v2712_v63 = vpop.xlane.xlu1 %2711  ;;  %6549 = vmatprep.mubr.msk.bf16.mxu1 %vm7659_vm8, %v10958_v12  ;;  %v9455_v2 = vpop.xlane.xlu0 %2738 }
 0x639   : > { %7074 = vrcp.f32 %v2712_v63 }
 0x63a   : > { %v7065_v7 = vpop.eup %7064 }
 0x63b   : > { %v2817_v46 = vmul.f32 %v7065_v7, %v9287_v17  ;;  %v7067_v34 = vpop.eup %7066 }
 0x63c   : > { %v2715_v11 = vpop.xlane.xlu1 %2714  ;;  %v2822_v9 = vmul.f32 %v7067_v34, %v9240_v0  ;;  %v9471_v45 = vpop.xlane.xlu0 %2744 }
 0x63d   : > { %7076 = vrcp.f32 %v2715_v11  ;;  %v2853_v49 = vpack.c.bf16 %v2817_v46, %v2816_v27  ;;  %v9453_v37 = vpop.f32.mrf.mxu1 }
 0x63e   : > { %v7069_v55 = vpop.eup %7068  ;;  %7078 = vrcp.f32 %v2703_v52 }
 0x63f   : > { %6532 = vmatmul.mubr.msk.bf16.gmra.mxu0 %vm2313_vm11, %v2853_v49  ;;  %v2823_v19 = vmul.f32 %v7069_v55, %v9308_v47  ;;  %v7071_v43 = vpop.eup %7070  ;;  %v6475_v35 = vpop.f32.mrf.mxu1 }
 0x640   : > { %v2700_v8 = vpop.xlane.xlu1 %2699  ;;  %6559 = vmatprep.mubr.msk.bf16.mxu0 %vm7659_vm8, %v10958_v12  ;;  %v2825_v52 = vmul.f32 %v7071_v43, %v9254_v32  ;;  %v1628_v28 = vpop.permute.xlu0 %1627 }
 0x641   : > { %7080 = vrcp.f32 %v2700_v8  ;;  %v2856_v17 = vpack.c.bf16 %v2823_v19, %v2822_v9  ;;  %v9462_v42 = vpop.f32.mrf.mxu1 }
 0x642   : > { %v7073_v38 = vpop.eup %7072  ;;  %v3395_v0 = vpack.c.bf16 %v9462_v42, %v9453_v37 }
 0x643   : > { %v2824_v15 = vmul.f32 %v7073_v38, %v9314_v21  ;;  %6550 = vmatmul.mubr.msk.bf16.gmra.mxu1 %vm2313_vm11, %v2856_v17  ;;  %v6476_v47 = vpop.f32.mrf.mxu1 }
 0x644   : > { %v2718_v53 = vpop.xlane.xlu1 %2717  ;;  %6577 = vmatprep.mubr.msk.bf16.mxu1 %vm7659_vm8, %v10958_v12 }
 0x645   : > { %v2857_v54 = vpack.c.bf16 %v2825_v52, %v2824_v15  ;;  %7082 = vrcp.f32 %v2718_v53 }
 0x646   : > { %v7075_v41 = vpop.eup %7074 }
 0x647   : > { %6560 = vmatmul.mubr.msk.bf16.vlgmr.msra.gmra.mxu0 %vm2313_vm11, %v2857_v54  ;;  %v2830_v51 = vmul.f32 %v7075_v41, %v9331_v62 }
 0x648   : > { %6590 = vmatpush3.bf16.msra.mxu0 %v9418_v13  ;;  %v2721_v32 = vpop.xlane.xlu1 %2720  ;;  %6563 = vmatprep.mubr.msk.bf16.mxu0 %vm7659_vm8, %v10958_v12 }
 0x649   : > { %7084 = vrcp.f32 %v2721_v32  ;;  %6591 = vmatprep.subr.bf16.mxu0 %v10958_v12  ;;  %v9478_v1 = vpop.f32.mrf.mxu1 }
 0x64a   : > { %v7077_v21 = vpop.eup %7076  ;;  %7086 = vrcp.f32 %v9430_v50 }
 0x64b   : > { %v2831_v25 = vmul.f32 %v7077_v21, %v9337_v30  ;;  %v7079_v44 = vpop.eup %7078  ;;  %v6479_v20 = vpop.f32.mrf.mxu1 }
 0x64c   : > { %6592 = vmatpush3.bf16.msra.mxu0 %v1628_v28  ;;  %v2706_v13 = vpop.xlane.xlu1 %2705  ;;  %v2827_v30 = vmul.f32 %v7079_v44, %v9267_v14 }
 0x64d   : > { %v2860_v31 = vpack.c.bf16 %v2831_v25, %v2830_v51  ;;  %7088 = vrcp.f32 %v2706_v13  ;;  %6593 = vmatprep.subr.bf16.mxu0 %v10958_v12  ;;  %v9484_v16 = vpop.f32.mrf.mxu1 }
 0x64e   : > { %v7081_v57 = vpop.eup %7080  ;;  %7090 = vrcp.f32 %v9426_v6  ;;  %v3396_v50 = vpack.c.bf16 %v9484_v16, %v9478_v1 }
 0x64f   : > { %6578 = vmatmul.mubr.msk.bf16.vlgmr.msra.gmra.mxu1 %vm2313_vm11, %v2860_v31  ;;  %v2826_v62 = vmul.f32 %v7081_v57, %v9351_v40  ;;  %7092 = vrcp.f32 %v2733_v3  ;;  %v6480_v33 = vpop.f32.mrf.mxu1 }
 0x650   : > { %v2727_v59 = vpop.xlane.xlu1 %2726  ;;  %6581 = vmatprep.mubr.msk.bf16.mxu1 %vm7659_vm8, %v10958_v12  ;;  %v10986_v33 = vmov 0  }
 0x651   : > { %7094 = vrcp.f32 %v2727_v59  ;;  %v2858_v63 = vpack.c.bf16 %v2827_v30, %v2826_v62 }
 0x652   : > { %7096 = vrcp.f32 %v9437_v10  ;;  %v7083_v6 = vpop.eup %7082 }
 0x653   : > { %6564 = vmatmul.mubr.msk.bf16.gmra.mxu0 %vm2313_vm11, %v2858_v63  ;;  %v2832_v14 = vmul.f32 %v7083_v6, %v9358_v5 }
 0x654   : > { %v2736_v7 = vpop.xlane.xlu1 %2735  ;;  %6567 = vmatprep.mubr.msk.bf16.mxu0 %vm7659_vm8, %v10958_v12 }
 0x655   : > { %v9498_v27 = vpop.f32.mrf.mxu0  ;;  %7098 = vrcp.f32 %v2736_v7 }
 0x656   : > { %v7085_v40 = vpop.eup %7084  ;;  %7100 = vrcp.f32 %v9455_v2 }
 0x657   : > { %v2833_v3 = vmul.f32 %v7085_v40, %v9362_v22  ;;  %v7087_v46 = vpop.eup %7086  ;;  %v6489_v34 = vpop.f32.mrf.mxu0 }
 0x658   : > { %v2742_v11 = vpop.xlane.xlu1 %2741  ;;  %v2829_v5 = vmul.f32 %v7087_v46, %v9297_v60 }
 0x659   : > { %v2861_v49 = vpack.c.bf16 %v2833_v3, %v2832_v14  ;;  %v9502_v55 = vpop.f32.mrf.mxu0  ;;  %7102 = vrcp.f32 %v2742_v11 }
 0x65a   : > { %v7089_v10 = vpop.eup %7088  ;;  %v3397_v9 = vpack.c.bf16 %v9502_v55, %v9498_v27  ;;  %7104 = vrcp.f32 %v9471_v45 }
 0x65b   : > { %6582 = vmatmul.mubr.msk.bf16.gmra.mxu1 %vm2313_vm11, %v2861_v49  ;;  %v2828_v19 = vmul.f32 %v7089_v10, %v9366_v48  ;;  %v7091_v22 = vpop.eup %7090  ;;  %v6490_v43 = vpop.f32.mrf.mxu0 }
 0x65c   : > { %v1626_v35 = vpop.permute.xlu1 %1625  ;;  %6585 = vmatprep.mubr.msk.bf16.mxu1 %vm7659_vm8, %v10958_v12  ;;  %v7093_v8 = vpop.eup %7092  ;;  %v2834_v52 = vmul.f32 %v7091_v22, %v9284_v29 }
 0x65d   : > { %6594 = vmatpush3.bf16.msra.mxu0 %v1626_v35  ;;  %v2859_v17 = vpack.c.bf16 %v2829_v5, %v2828_v19  ;;  %v9512_v2 = vpop.f32.mrf.mxu0  ;;  %v2837_v47 = vmul.f32 %v7093_v8, %v9325_v4 }
 0x65e   : > { %v7095_v38 = vpop.eup %7094 }
 0x65f   : > { %6568 = vmatmul.mubr.msk.bf16.gmra.mxu0 %vm2313_vm11, %v2859_v17  ;;  %v2835_v48 = vmul.f32 %v7095_v38, %v9370_v23  ;;  %v7097_v15 = vpop.eup %7096  ;;  %v6493_v60 = vpop.f32.mrf.mxu0 }
 0x660   : > { %6595 = vmatprep.mubr.msk.bf16.mxu0 %vm7659_vm8, %v10958_v12  ;;  %v2836_v41 = vmul.f32 %v7097_v15, %v9312_v36  ;;  %v6779_v15 = vld [vmem:[%s8116_s12 + $0x30] sm:$0xff]  }
 0x661   : > { %v2862_v53 = vpack.c.bf16 %v2835_v48, %v2834_v52  ;;  %v9520_v54 = vpop.f32.mrf.mxu0  ;;  %v6778_v48 = vld [vmem:[%s8116_s12 + $0x38] sm:$0xff]  }
 0x662   : > { %v3398_v29 = vpack.c.bf16 %v9520_v54, %v9512_v2  ;;  %v2863_v32 = vpack.c.bf16 %v2837_v47, %v2836_v41  ;;  %v7099_v21 = vpop.eup %7098  ;;  %6607 = vmatprep.subr.bf16.mxu1 %v6778_v48  ;;  %v5918_v54 = vld [vmem:[%s814_s9] ss:$0 sm:$0xff]  ;;  %s11089_s9 = sld [smem:[#allocation83_spill]] (!%p5994_p10) }
 0x663   : > { %6586 = vmatmul.mubr.msk.bf16.gmra.mxu1 %vm2313_vm11, %v2862_v53  ;;  %v6494_v23 = vpop.f32.mrf.mxu0  ;;  %v7101_v4 = vpop.eup %7100  ;;  %v2838_v36 = vmul.f32 %v7099_v21, %v9374_v18  ;;  %v6780_v53 = vld [vmem:[%s8116_s12 + $0x28] sm:$0xff]  }
 0x664   : > { %v2839_v44 = vmul.f32 %v7101_v4, %v9335_v56  ;;  %6608 = vmatpush3.bf16.msra.mxu1 %v6778_v48  ;;  %v6781_v4 = vld [vmem:[%s8116_s12 + $0x20] sm:$0xff]  }
 0x665   : > { %v9527_v51 = vpop.f32.mrf.mxu0  ;;  %6609 = vmatprep.subr.bf16.mxu1 %v6779_v15 }
 0x666   : > { %v2864_v13 = vpack.c.bf16 %v2839_v44, %v2838_v36  ;;  %v7103_v31 = vpop.eup %7102 }
 0x667   : > { %6596 = vmatmul.mubr.msk.bf16.vlgmr.msra.gmra.mxu0 %vm2313_vm11, %v2863_v32  ;;  %v6497_v25 = vpop.f32.mrf.mxu0  ;;  %v7105_v57 = vpop.eup %7104  ;;  %v2840_v62 = vmul.f32 %v7103_v31, %v9380_v58 }
 0x668   : > { %6599 = vmatprep.mubr.msk.bf16.mxu0 %vm7659_vm8, %v10958_v12  ;;  %v2841_v18 = vmul.f32 %v7105_v57, %v9345_v24  ;;  %6610 = vmatpush3.bf16.msra.mxu1 %v6779_v15 }
 0x669   : > { %v9533_v45 = vpop.f32.mrf.mxu0  ;;  %6611 = vmatprep.subr.bf16.mxu1 %v6780_v53 }
 0x66a   : > { %v3399_v28 = vpack.c.bf16 %v9533_v45, %v9527_v51  ;;  %v2865_v30 = vpack.c.bf16 %v2841_v18, %v2840_v62  ;;  %v7250_v51 = vld [vmem:[#allocation2 + $0x30] sm:$0xff] }
 0x66b   : > { %v6498_v20 = vpop.f32.mrf.mxu0 }
 0x66c   : > { %6612 = vmatpush3.bf16.msra.mxu1 %v6780_v53  ;;  %v6782_v20 = vld [vmem:[%s8116_s12 + $0x18] sm:$0xff]  }
 0x66d   : > { %6613 = vmatprep.subr.bf16.mxu1 %v6781_v4 }
 0x66f   : > { %6600 = vmatmul.mubr.msk.bf16.gmra.mxu0 %vm2313_vm11, %v2864_v13 }
 0x670   : > { %6603 = vmatprep.mubr.msk.bf16.mxu0 %vm7659_vm8, %v10958_v12  ;;  %6614 = vmatpush3.bf16.msra.mxu1 %v6781_v4 }
 0x671   : > { %6615 = vmatprep.subr.bf16.mxu1 %v6782_v20 }
 0x674   : > { %6616 = vmatpush3.bf16.msra.mxu1 %v6782_v20 }
 0x677   : > { %6604 = vmatmul.mubr.msk.bf16.gmra.mxu0 %vm2313_vm11, %v2865_v30 }
 0x678   : > { %4192 = vmatprep.mubr.bf16.mxu0 %v10986_v33 }
 0x69d   : > { %v3041_v59 = vpop.f32.mrf.mxu1 }
 0x69f   : > { %v6507_v56 = vpop.f32.mrf.mxu1 }
 0x6a1   : > { %v3044_v63 = vpop.f32.mrf.mxu1 }
 0x6a2   : > { %v3400_v6 = vpack.c.bf16 %v3044_v63, %v3041_v59  ;;  %v6783_v63 = vld [vmem:[%s8116_s12 + $0x10] sm:$0xff]  }
 0x6a3   : > { %v6508_v7 = vpop.f32.mrf.mxu1  ;;  %6617 = vmatprep.subr.bf16.mxu1 %v6783_v63 }
 0x6a4   : > { %3424 = vrot.lane.b32.xlu1 %v3400_v6, %s7662_s23  ;;  %6618 = vmatpush3.bf16.msra.mxu1 %v6783_v63 }
 0x6a5   : > { %v3049_v40 = vpop.f32.mrf.mxu1 }
 0x6a7   : > { %v6511_v14 = vpop.f32.mrf.mxu1 }
 0x6a9   : > { %v3052_v3 = vpop.f32.mrf.mxu1 }
 0x6aa   : > { %v3401_v12 = vpack.c.bf16 %v3052_v3, %v3049_v40  ;;  %v6784_v3 = vld [vmem:[%s8116_s12 + $0x8] sm:$0xff]  }
 0x6ab   : > { %v6512_v46 = vpop.f32.mrf.mxu1  ;;  %6619 = vmatprep.subr.bf16.mxu1 %v6784_v3 }
 0x6ac   : > { %3426 = vrot.lane.b32.xlu0 %v3401_v12, %s7662_s23  ;;  %6620 = vmatpush3.bf16.msra.mxu1 %v6784_v3 }
 0x6ad   : > { %v9547_v24 = vpop.f32.mrf.mxu1 }
 0x6af   : > { %v6515_v58 = vpop.f32.mrf.mxu1 }
 0x6b0   : > { %v6785_v58 = vld [vmem:[%s8116_s12] sm:$0xff]  }
 0x6b1   : > { %v9549_v34 = vpop.f32.mrf.mxu1  ;;  %6621 = vmatprep.subr.bf16.mxu1 %v6785_v58 }
 0x6b2   : > { %v3402_v11 = vpack.c.bf16 %v9549_v34, %v9547_v24  ;;  %6622 = vmatpush3.bf16.msra.mxu1 %v6785_v58 }
 0x6b3   : > { %v6516_v49 = vpop.f32.mrf.mxu1 }
 0x6ba   : > { %v9553_v10 = vpop.f32.mrf.mxu0 }
 0x6bc   : > { %v6525_v19 = vpop.f32.mrf.mxu0 }
 0x6be   : > { %v9555_v5 = vpop.f32.mrf.mxu0 }
 0x6bf   : > { %v3403_v22 = vpack.c.bf16 %v9555_v5, %v9553_v10 }
 0x6c0   : > { %v6526_v43 = vpop.f32.mrf.mxu0 }
 0x6e7   : > { %v3173_v35 = vpop.f32.mrf.mxu1 }
 0x6e9   : > { %v6543_v8 = vpop.f32.mrf.mxu1 }
 0x6eb   : > { %v3176_v17 = vpop.f32.mrf.mxu1 }
 0x6ec   : > { %v3406_v38 = vpack.c.bf16 %v3176_v17, %v3173_v35 }
 0x6ed   : > { %v6544_v52 = vpop.f32.mrf.mxu1 }
 0x6ee   : > { %3442 = vrot.lane.b32.xlu1 %v3406_v38, %s7661_s10 }
 0x6f3   : > { %v9562_v60 = vpop.f32.mrf.mxu0 }
 0x6f5   : > { %v6529_v47 = vpop.f32.mrf.mxu0 }
 0x6f7   : > { %v9565_v41 = vpop.f32.mrf.mxu0  ;;  %v3181_v23 = vpop.f32.mrf.mxu1 }
 0x6f9   : > { %v6530_v32 = vpop.f32.mrf.mxu0  ;;  %v6547_v21 = vpop.f32.mrf.mxu1 }
 0x6fb   : > { %v3184_v25 = vpop.f32.mrf.mxu1 }
 0x6fc   : > { %v3407_v36 = vpack.c.bf16 %v3184_v25, %v3181_v23 }
 0x6fd   : > { %v6548_v44 = vpop.f32.mrf.mxu1 }
 0x6fe   : > { %3444 = vrot.lane.b32.xlu0 %v3407_v36, %s7661_s10 }
 0x6ff   : > { %v9570_v13 = vpop.f32.mrf.mxu0 }
 0x701   : > { %v6533_v31 = vpop.f32.mrf.mxu0 }
 0x703   : > { %v9572_v57 = vpop.f32.mrf.mxu0  ;;  %v3189_v62 = vpop.f32.mrf.mxu1 }
 0x704   : > { %v3405_v5 = vpack.c.bf16 %v9572_v57, %v9570_v13 }
 0x705   : > { %v6534_v18 = vpop.f32.mrf.mxu0  ;;  %v6551_v30 = vpop.f32.mrf.mxu1 }
 0x706   : > { %v3404_v30 = vpack.c.bf16 %v9565_v41, %v9562_v60 }
 0x707   : > { %v3192_v59 = vpop.f32.mrf.mxu1  ;;  %v3239_v56 = vpop.f32.mrf.mxu0 }
 0x708   : > { %v3408_v48 = vpack.c.bf16 %v3192_v59, %v3189_v62 }
 0x709   : > { %v6552_v6 = vpop.f32.mrf.mxu1  ;;  %v6561_v7 = vpop.f32.mrf.mxu0 }
 0x70b   : > { %v3242_v40 = vpop.f32.mrf.mxu0 }
 0x70d   : > { %v6562_v14 = vpop.f32.mrf.mxu0 }
 0x70f   : > { %v3305_v12 = vpop.f32.mrf.mxu1 }
 0x711   : > { %v6579_v46 = vpop.f32.mrf.mxu1 }
 0x713   : > { %v3247_v49 = vpop.f32.mrf.mxu0  ;;  %v3308_v19 = vpop.f32.mrf.mxu1 }
 0x714   : > { %v3412_v43 = vpack.c.bf16 %v3308_v19, %v3305_v12 }
 0x715   : > { %v6565_v35 = vpop.f32.mrf.mxu0  ;;  %v6580_v8 = vpop.f32.mrf.mxu1 }
 0x716   : > { %3460 = vrot.lane.b32.xlu1 %v3412_v43, %s7660_s17  ;;  %v3425_v13 = vpop.permute.xlu1 %3424 }
 0x717   : > { %v3250_v17 = vpop.f32.mrf.mxu0  ;;  %v3474_v58 = vsel %vm1637_vm9, %v3394_v26, %v3425_v13 }
 0x719   : > { %v6566_v38 = vpop.f32.mrf.mxu0 }
 0x71a   : > { %3428 = vrot.lane.b32.xlu1 %v3402_v11, %s7662_s23  ;;  %v3409_v11 = vpack.c.bf16 %v3242_v40, %v3239_v56 }
 0x71b   : > { %v3313_v52 = vpop.f32.mrf.mxu1 }
 0x71d   : > { %v6583_v15 = vpop.f32.mrf.mxu1 }
 0x71e   : > { %3446 = vrot.lane.b32.xlu1 %v3408_v48, %s7661_s10  ;;  %v3427_v35 = vpop.permute.xlu0 %3426 }
 0x71f   : > { %v3255_v47 = vpop.f32.mrf.mxu0  ;;  %v3316_v53 = vpop.f32.mrf.mxu1  ;;  %v3477_v38 = vsel %vm1637_vm9, %v3395_v0, %v3427_v35 }
 0x720   : > { %v3413_v23 = vpack.c.bf16 %v3316_v53, %v3313_v52 }
 0x721   : > { %v6569_v32 = vpop.f32.mrf.mxu0  ;;  %v6584_v21 = vpop.f32.mrf.mxu1 }
 0x722   : > { %3462 = vrot.lane.b32.xlu0 %v3413_v23, %s7660_s17 }
 0x723   : > { %v3258_v4 = vpop.f32.mrf.mxu0  ;;  %v3321_v25 = vpop.f32.mrf.mxu1 }
 0x724   : > { %v3411_v7 = vpack.c.bf16 %v3258_v4, %v3255_v47 }
 0x725   : > { %v6570_v36 = vpop.f32.mrf.mxu0  ;;  %v6587_v44 = vpop.f32.mrf.mxu1 }
 0x726   : > { %3430 = vrot.lane.b32.xlu0 %v3403_v22, %s7662_s23  ;;  %v3410_v22 = vpack.c.bf16 %v3250_v17, %v3247_v49 }
 0x727   : > { %v3324_v24 = vpop.f32.mrf.mxu1  ;;  %v3371_v34 = vpop.f32.mrf.mxu0 }
 0x728   : > { %v3414_v20 = vpack.c.bf16 %v3324_v24, %v3321_v25 }
 0x729   : > { %v6588_v31 = vpop.f32.mrf.mxu1  ;;  %v6597_v62 = vpop.f32.mrf.mxu0 }
 0x72a   : > { %3448 = vrot.lane.b32.xlu0 %v3409_v11, %s7661_s10  ;;  %3464 = vrot.lane.b32.xlu1 %v3414_v20, %s7660_s17 }
 0x72b   : > { %v3374_v18 = vpop.f32.mrf.mxu0 }
 0x72c   : > { %v3415_v59 = vpack.c.bf16 %v3374_v18, %v3371_v34 }
 0x72d   : > { %v6598_v63 = vpop.f32.mrf.mxu0 }
 0x72e   : > { %3432 = vrot.lane.b32.xlu1 %v3404_v30, %s7662_s23  ;;  %3466 = vrot.lane.b32.xlu0 %v3415_v59, %s7660_s17  ;;  %v7251_v30 = vld [vmem:[#allocation2 + $0x18] sm:$0xff]  ;;  %v7252_v63 = vld [vmem:[#allocation2] sm:$0xff] }
 0x72f   : > { %v3379_v10 = vpop.f32.mrf.mxu0 }
 0x731   : > { %v6601_v56 = vpop.f32.mrf.mxu0 }
 0x732   : > { %3450 = vrot.lane.b32.xlu1 %v3410_v22, %s7661_s10  ;;  %3434 = vrot.lane.b32.xlu0 %v3405_v5, %s7662_s23  ;;  %v7253_v22 = vld [vmem:[#allocation2 + $0x58] sm:$0xff] }
 0x733   : > { %v3382_v6 = vpop.f32.mrf.mxu0 }
 0x734   : > { %v3416_v40 = vpack.c.bf16 %v3382_v6, %v3379_v10 }
 0x735   : > { %v6602_v60 = vpop.f32.mrf.mxu0 }
 0x736   : > { %3452 = vrot.lane.b32.xlu0 %v3411_v7, %s7661_s10  ;;  %3468 = vrot.lane.b32.xlu1 %v3416_v40, %s7660_s17 }
 0x737   : > { %v3387_v41 = vpop.f32.mrf.mxu0 }
 0x739   : > { %v6605_v14 = vpop.f32.mrf.mxu0 }
 0x73b   : > { %v3390_v3 = vpop.f32.mrf.mxu0 }
 0x73c   : > { %v3417_v12 = vpack.c.bf16 %v3390_v3, %v3387_v41  ;;  %v7254_v41 = vld [vmem:[#allocation2 + $0x50] sm:$0xff] }
 0x73d   : > { %v6606_v46 = vpop.f32.mrf.mxu0 }
 0x73e   : > { %3470 = vrot.lane.b32.xlu0 %v3417_v12, %s7660_s17  ;;  %v7255_v46 = vld [vmem:[#allocation2 + $0x8] sm:$0xff] }
 0x760   : > { %v3443_v57 = vpop.permute.xlu1 %3442 }
 0x761   : > { %v3492_v49 = vsel %vm3490_vm1, %v3474_v58, %v3443_v57  ;;  %v7256_v58 = vld [vmem:[#allocation2 + $0x20] sm:$0xff] }
 0x770   : > { %v3445_v8 = vpop.permute.xlu0 %3444 }
 0x771   : > { %v3494_v52 = vsel %vm3490_vm1, %v3477_v38, %v3445_v8 }
 0x788   : > { %v3461_v19 = vpop.permute.xlu1 %3460 }
 0x789   : > { %v3505_v43 = vsel %vm3503_vm2, %v3492_v49, %v3461_v19  ;;  %v7257_v19 = vld [vmem:[#allocation2 + $0x38] sm:$0xff] }
 0x78a   : > { %6623 = vmatprep.mubr.bf16.mxu1 %v3505_v43 }
 0x78c   : > { %v3429_v17 = vpop.permute.xlu1 %3428 }
 0x78d   : > { %v3480_v15 = vsel %vm1637_vm9, %v3396_v50, %v3429_v17 }
 0x790   : > { %v3447_v39 = vpop.permute.xlu1 %3446 }
 0x791   : > { %v3496_v47 = vsel %vm3490_vm1, %v3480_v15, %v3447_v39  ;;  %v7259_v15 = vld [vmem:[#allocation2 + $0x10] sm:$0xff] }
 0x794   : > { %v3463_v48 = vpop.permute.xlu0 %3462 }
 0x795   : > { %v3508_v61 = vsel %vm3503_vm2, %v3494_v52, %v3463_v48  ;;  %v7258_v48 = vld [vmem:[#allocation2 + $0x28] sm:$0xff] }
 0x796   : > { %6624 = vmatmul.mubr.bf16.vlgmr.msra.gmra.mxu1 %v3508_v61 }
 0x798   : > { %v3431_v26 = vpop.permute.xlu0 %3430 }
 0x799   : > { %v3483_v42 = vsel %vm1637_vm9, %v3397_v9, %v3431_v26 }
 0x79c   : > { %v3465_v53 = vpop.permute.xlu1 %3464  ;;  %v3449_v23 = vpop.permute.xlu0 %3448 }
 0x79d   : > { %v3511_v37 = vsel %vm3503_vm2, %v3496_v47, %v3465_v53  ;;  %v3498_v0 = vsel %vm3490_vm1, %v3483_v42, %v3449_v23  ;;  %v7260_v23 = vld [vmem:[#allocation2 + $0x48] sm:$0xff]  ;;  %v7261_v42 = vld [vmem:[#allocation2 + $0x40] sm:$0xff] }
 0x79e   : > { %6627 = vmatprep.mubr.bf16.mxu1 %v3511_v37 }
 0x7a0   : > { %v3433_v32 = vpop.permute.xlu1 %3432  ;;  %v3467_v21 = vpop.permute.xlu0 %3466 }
 0x7a1   : > { %v3514_v1 = vsel %vm3503_vm2, %v3498_v0, %v3467_v21  ;;  %v3486_v4 = vsel %vm1637_vm9, %v3398_v29, %v3433_v32 }
 0x7a2   : > { %6628 = vmatmul.mubr.bf16.gmra.mxu1 %v3514_v1 }
 0x7a4   : > { %v3451_v16 = vpop.permute.xlu1 %3450  ;;  %v3435_v50 = vpop.permute.xlu0 %3434 }
 0x7a5   : > { %v3500_v25 = vsel %vm3490_vm1, %v3486_v4, %v3451_v16  ;;  %v3489_v36 = vsel %vm1637_vm9, %v3399_v28, %v3435_v50 }
 0x7a8   : > { %v3469_v27 = vpop.permute.xlu1 %3468  ;;  %v3453_v9 = vpop.permute.xlu0 %3452 }
 0x7a9   : > { %v3517_v55 = vsel %vm3503_vm2, %v3500_v25, %v3469_v27  ;;  %v3502_v44 = vsel %vm3490_vm1, %v3489_v36, %v3453_v9 }
 0x7aa   : > { %6631 = vmatprep.mubr.bf16.mxu1 %v3517_v55 }
 0x7b0   : > { %v3471_v24 = vpop.permute.xlu0 %3470 }
 0x7b1   : > { %v3520_v34 = vsel %vm3503_vm2, %v3502_v44, %v3471_v24 }
 0x7b2   : > { %6632 = vmatmul.mubr.bf16.gmra.mxu1 %v3520_v34 }
 0x7b3   : > { %4285 = vmatprep.mubr.bf16.mxu1 %v10986_v33 }
 0x856   : > { %v6625_v2 = vpop.f32.mrf.mxu1 }
 0x857   : > { %v3636_v18 = vadd.f32 %v6625_v2, %v5918_v54 }
 0x858   : > { %v3627_v29 = vpop.f32.mrf.mxu1 }
 0x859   : > { %v3628_v11 = vadd.f32 %v5918_v54, %v3627_v29  ;;  %v9652_v56 = vadd.f32 %v7253_v22, %v3636_v18 }
 0x85a   : > { %v6626_v20 = vpop.f32.mrf.mxu1 }
 0x85b   : > { %v9643_v45 = vadd.f32 %v7250_v51, %v3628_v11  ;;  %v3639_v28 = vadd.f32 %v6626_v20, %v5918_v54  ;;  %10991 = vst [vmem:[#allocation41_spill] sm:$0xff] %v9652_v56 }
 0x85c   : > { %v3630_v31 = vpop.f32.mrf.mxu1 }
 0x85d   : > { %10988 = vst [vmem:[#allocation40_spill] sm:$0xff] %v9643_v45  ;;  %v3631_v62 = vadd.f32 %v5918_v54, %v3630_v31  ;;  %3688 = vadd.xlane.f32.xlu1 %v9643_v45  ;;  %v9646_v59 = vadd.f32 %v7251_v30, %v3639_v28 }
 0x85f   : > { %10989 = vst [vmem:[#allocation32_spill] sm:$0xff] %v9646_v59  ;;  %v9648_v10 = vadd.f32 %v7252_v63, %v3631_v62 }
 0x861   : > { %10990 = vst [vmem:[#allocation45_spill] sm:$0xff] %v9648_v10  ;;  %3690 = vadd.xlane.f32.xlu0 %v9648_v10  ;;  %3694 = vadd.xlane.f32.xlu1 %v9646_v59 }
 0x862   : > { %v6629_v5 = vpop.f32.mrf.mxu1 }
 0x863   : > { %v3652_v60 = vadd.f32 %v6629_v5, %v5918_v54 }
 0x864   : > { %v3643_v6 = vpop.f32.mrf.mxu1 }
 0x865   : > { %v3644_v7 = vadd.f32 %v5918_v54, %v3643_v6  ;;  %3692 = vadd.xlane.f32.xlu0 %v9652_v56  ;;  %v9658_v13 = vadd.f32 %v7255_v46, %v3652_v60 }
 0x866   : > { %v6630_v40 = vpop.f32.mrf.mxu1 }
 0x867   : > { %v9655_v14 = vadd.f32 %v7254_v41, %v3644_v7  ;;  %10993 = vst [vmem:[#allocation43_spill] sm:$0xff] %v9658_v13  ;;  %v3655_v57 = vadd.f32 %v6630_v40, %v5918_v54 }
 0x868   : > { %v3646_v3 = vpop.f32.mrf.mxu1 }
 0x869   : > { %10992 = vst [vmem:[#allocation42_spill] sm:$0xff] %v9655_v14  ;;  %v3647_v12 = vadd.f32 %v5918_v54, %v3646_v3  ;;  %3696 = vadd.xlane.f32.xlu0 %v9655_v14  ;;  %v9664_v43 = vadd.f32 %v7257_v19, %v3655_v57 }
 0x86b   : > { %v9660_v49 = vadd.f32 %v7256_v58, %v3647_v12  ;;  %10995 = vst [vmem:[#allocation46_spill] sm:$0xff] %v9664_v43 }
 0x86d   : > { %10994 = vst [vmem:[#allocation44_spill] sm:$0xff] %v9660_v49  ;;  %3698 = vadd.xlane.f32.xlu1 %v9660_v49  ;;  %3700 = vadd.xlane.f32.xlu0 %v9658_v13 }
 0x871   : > { %3702 = vadd.xlane.f32.xlu1 %v9664_v43 }
 0x872   : > { %v6633_v35 = vpop.f32.mrf.mxu1 }
 0x873   : > { %v3668_v52 = vadd.f32 %v6633_v35, %v5918_v54 }
 0x874   : > { %v3659_v8 = vpop.f32.mrf.mxu1 }
 0x875   : > { %v3660_v17 = vadd.f32 %v5918_v54, %v3659_v8  ;;  %v9670_v47 = vadd.f32 %v7259_v15, %v3668_v52  ;;  %v6788_v8 = vld [vmem:[%s8125_s18 + $0xe4] ss:$16 sps:$4 sm:$0xff]  }
 0x876   : > { %v6634_v38 = vpop.f32.mrf.mxu1  ;;  %4160 = vmatprep.subr.bf16.mxu0 %v6788_v8 }
 0x877   : > { %v9667_v61 = vadd.f32 %v7258_v48, %v3660_v17  ;;  %10997 = vst [vmem:[#allocation47_spill] sm:$0xff] %v9670_v47  ;;  %v3671_v53 = vadd.f32 %v6634_v38, %v5918_v54  ;;  %v6791_v17 = vld [vmem:[%s8125_s18 + $0xec] ss:$16 sps:$4 sm:$0xff]   ;;  %v6786_v48 = vld [vmem:[%s8125_s18 + $0xe0] ss:$16 sps:$4 sm:$0xff]  }
 0x878   : > { %v3662_v39 = vpop.f32.mrf.mxu1  ;;  %4253 = vmatprep.subr.bf16.mxu1 %v6791_v17  ;;  %4161 = vmatpush1.bf16.msra.mxu0 %v6786_v48 }
 0x879   : > { %10996 = vst [vmem:[#allocation29_spill] sm:$0xff] %v9667_v61  ;;  %v3663_v26 = vadd.f32 %v5918_v54, %v3662_v39  ;;  %3704 = vadd.xlane.f32.xlu0 %v9667_v61  ;;  %v9676_v0 = vadd.f32 %v7261_v42, %v3671_v53  ;;  %v6789_v39 = vld [vmem:[%s8125_s18 + $0xe8] ss:$16 sps:$4 sm:$0xff]   ;;  %v6794_v42 = vld [vmem:[%s8125_s18 + $0xc4] ss:$16 sps:$4 sm:$0xff]  }
 0x87a   : > { %4254 = vmatpush1.bf16.msra.mxu1 %v6789_v39  ;;  %4162 = vmatprep.subr.bf16.mxu0 %v6794_v42 }
 0x87b   : > { %v9672_v37 = vadd.f32 %v7260_v23, %v3663_v26  ;;  %10999 = vst [vmem:[#allocation31_spill] sm:$0xff] %v9676_v0 }
 0x87d   : > { %10998 = vst [vmem:[#allocation48_spill] sm:$0xff] %v9672_v37  ;;  %3706 = vadd.xlane.f32.xlu1 %v9672_v37  ;;  %3708 = vadd.xlane.f32.xlu0 %v9670_v47 }
 0x881   : > { %3710 = vadd.xlane.f32.xlu1 %v9676_v0 }
 0x8e6   : > { %v3689_v32 = vpop.xlane.xlu1 %3688 }
 0x8e7   : > { %v3712_v21 = vmul.f32 0.0078125, %v3689_v32  ;;  %v6797_v32 = vld [vmem:[%s8125_s18 + $0xcc] ss:$16 sps:$4 sm:$0xff]  }
 0x8e8   : > { %4255 = vmatprep.subr.bf16.mxu1 %v6797_v32 }
 0x8e9   : > { %v9680_v1 = vsub.f32 %v9643_v45, %v3712_v21 }
 0x8ea   : > { %v3695_v16 = vpop.xlane.xlu1 %3694  ;;  %v3691_v50 = vpop.xlane.xlu0 %3690 }
 0x8eb   : > { %v3715_v4 = vmul.f32 0.0078125, %v3695_v16  ;;  %v3713_v25 = vmul.f32 0.0078125, %v3691_v50  ;;  %v3736_v27 = vmul.f32 %v9680_v1, %v9680_v1  ;;  %v6792_v16 = vld [vmem:[%s8125_s18 + $0xc0] ss:$16 sps:$4 sm:$0xff]   ;;  %v6795_v50 = vld [vmem:[%s8125_s18 + $0xc8] ss:$16 sps:$4 sm:$0xff]  }
 0x8ec   : > { %4163 = vmatpush1.bf16.msra.mxu0 %v6792_v16  ;;  %4256 = vmatpush1.bf16.msra.mxu1 %v6795_v50 }
 0x8ed   : > { %v9685_v55 = vsub.f32 %v9648_v10, %v3713_v25  ;;  %3748 = vadd.xlane.f32.xlu0 %v3736_v27  ;;  %v9688_v36 = vsub.f32 %v9646_v59, %v3715_v4  ;;  %v6800_v25 = vld [vmem:[%s8125_s18 + $0xa4] ss:$16 sps:$4 sm:$0xff]   ;;  %v6803_v27 = vld [vmem:[%s8125_s18 + $0xac] ss:$16 sps:$4 sm:$0xff]  }
 0x8ee   : > { %v3693_v9 = vpop.xlane.xlu0 %3692  ;;  %4164 = vmatprep.subr.bf16.mxu0 %v6800_v25  ;;  %4257 = vmatprep.subr.bf16.mxu1 %v6803_v27 }
 0x8ef   : > { %v3714_v44 = vmul.f32 0.0078125, %v3693_v9  ;;  %v3737_v24 = vmul.f32 %v9685_v55, %v9685_v55  ;;  %v3739_v29 = vmul.f32 %v9688_v36, %v9688_v36  ;;  %v6798_v9 = vld [vmem:[%s8125_s18 + $0xa0] ss:$16 sps:$4 sm:$0xff]  }
 0x8f0   : > { %4165 = vmatpush1.bf16.msra.mxu0 %v6798_v9 }
 0x8f1   : > { %v9693_v34 = vsub.f32 %v9652_v56, %v3714_v44  ;;  %3750 = vadd.xlane.f32.xlu1 %v3737_v24  ;;  %v6801_v44 = vld [vmem:[%s8125_s18 + $0xa8] ss:$16 sps:$4 sm:$0xff]   ;;  %v6806_v24 = vld [vmem:[%s8125_s18 + $0x84] ss:$16 sps:$4 sm:$0xff]  }
 0x8f2   : > { %v3697_v2 = vpop.xlane.xlu0 %3696  ;;  %4258 = vmatpush1.bf16.msra.mxu1 %v6801_v44  ;;  %4166 = vmatprep.subr.bf16.mxu0 %v6806_v24 }
 0x8f3   : > { %v3716_v54 = vmul.f32 0.0078125, %v3697_v2  ;;  %v3738_v11 = vmul.f32 %v9693_v34, %v9693_v34  ;;  %v6809_v2 = vld [vmem:[%s8125_s18 + $0x8c] ss:$16 sps:$4 sm:$0xff]  }
 0x8f4   : > { %4259 = vmatprep.subr.bf16.mxu1 %v6809_v2 }
 0x8f5   : > { %v9700_v20 = vsub.f32 %v9655_v14, %v3716_v54  ;;  %3754 = vadd.xlane.f32.xlu1 %v3739_v29  ;;  %3752 = vadd.xlane.f32.xlu0 %v3738_v11  ;;  %v6804_v54 = vld [vmem:[%s8125_s18 + $0x80] ss:$16 sps:$4 sm:$0xff]   ;;  %v6807_v29 = vld [vmem:[%s8125_s18 + $0x88] ss:$16 sps:$4 sm:$0xff]   ;;  %v6812_v11 = vld [vmem:[%s8125_s18 + $0x64] ss:$16 sps:$4 sm:$0xff]  }
 0x8f6   : > { %v3699_v51 = vpop.xlane.xlu1 %3698  ;;  %v3701_v28 = vpop.xlane.xlu0 %3700  ;;  %4167 = vmatpush1.bf16.msra.mxu0 %v6804_v54  ;;  %4260 = vmatpush1.bf16.msra.mxu1 %v6807_v29 }
 0x8f7   : > { %v3717_v31 = vmul.f32 0.0078125, %v3699_v51  ;;  %v3718_v62 = vmul.f32 0.0078125, %v3701_v28  ;;  %v3740_v18 = vmul.f32 %v9700_v20, %v9700_v20  ;;  %v6815_v51 = vld [vmem:[%s8125_s18 + $0x6c] ss:$16 sps:$4 sm:$0xff]   ;;  %v6810_v28 = vld [vmem:[%s8125_s18 + $0x60] ss:$16 sps:$4 sm:$0xff]   ;;  %4168 = vmatprep.subr.bf16.mxu0 %v6812_v11 }
 0x8f8   : > { %4261 = vmatprep.subr.bf16.mxu1 %v6815_v51 }
 0x8f9   : > { %v9705_v30 = vsub.f32 %v9660_v49, %v3717_v31  ;;  %v9708_v63 = vsub.f32 %v9658_v13, %v3718_v62  ;;  %3756 = vadd.xlane.f32.xlu0 %v3740_v18  ;;  %v6813_v31 = vld [vmem:[%s8125_s18 + $0x68] ss:$16 sps:$4 sm:$0xff]   ;;  %v6818_v62 = vld [vmem:[%s8125_s18 + $0x44] ss:$16 sps:$4 sm:$0xff]   ;;  %v6821_v18 = vld [vmem:[%s8125_s18 + $0x4c] ss:$16 sps:$4 sm:$0xff]  }
 0x8fa   : > { %v3703_v5 = vpop.xlane.xlu1 %3702  ;;  %4169 = vmatpush1.bf16.msra.mxu0 %v6810_v28  ;;  %4262 = vmatpush1.bf16.msra.mxu1 %v6813_v31 }
 0x8fb   : > { %v3719_v22 = vmul.f32 0.0078125, %v3703_v5  ;;  %v3741_v6 = vmul.f32 %v9705_v30, %v9705_v30  ;;  %v3742_v7 = vmul.f32 %v9708_v63, %v9708_v63  ;;  %v6816_v5 = vld [vmem:[%s8125_s18 + $0x40] ss:$16 sps:$4 sm:$0xff]   ;;  %4170 = vmatprep.subr.bf16.mxu0 %v6818_v62  ;;  %4263 = vmatprep.subr.bf16.mxu1 %v6821_v18 }
 0x8fd   : > { %v9715_v40 = vsub.f32 %v9664_v43, %v3719_v22  ;;  %3758 = vadd.xlane.f32.xlu1 %v3741_v6  ;;  %3760 = vadd.xlane.f32.xlu0 %v3742_v7  ;;  %v6819_v22 = vld [vmem:[%s8125_s18 + $0x48] ss:$16 sps:$4 sm:$0xff]   ;;  %v6824_v6 = vld [vmem:[%s8125_s18 + $0x24] ss:$16 sps:$4 sm:$0xff]   ;;  %v6827_v7 = vld [vmem:[%s8125_s18 + $0x2c] ss:$16 sps:$4 sm:$0xff]  }
 0x8fe   : > { %4171 = vmatpush1.bf16.msra.mxu0 %v6816_v5  ;;  %4264 = vmatpush1.bf16.msra.mxu1 %v6819_v22 }
 0x8ff   : > { %v3743_v60 = vmul.f32 %v9715_v40, %v9715_v40  ;;  %4172 = vmatprep.subr.bf16.mxu0 %v6824_v6  ;;  %4265 = vmatprep.subr.bf16.mxu1 %v6827_v7 }
 0x901   : > { %3762 = vadd.xlane.f32.xlu1 %v3743_v60  ;;  %v6822_v60 = vld [vmem:[%s8125_s18 + $0x20] ss:$16 sps:$4 sm:$0xff]  }
 0x902   : > { %v3705_v41 = vpop.xlane.xlu0 %3704  ;;  %4173 = vmatpush1.bf16.msra.mxu0 %v6822_v60 }
 0x903   : > { %v3720_v3 = vmul.f32 0.0078125, %v3705_v41  ;;  %v6825_v41 = vld [vmem:[%s8125_s18 + $0x28] ss:$16 sps:$4 sm:$0xff]  }
 0x904   : > { %4266 = vmatpush1.bf16.msra.mxu1 %v6825_v41 }
 0x905   : > { %v9720_v12 = vsub.f32 %v9667_v61, %v3720_v3  ;;  %v6830_v3 = vld [vmem:[%s8125_s18 + $0x4] ss:$16 sps:$4 sm:$0xff]  }
 0x906   : > { %v3707_v46 = vpop.xlane.xlu1 %3706  ;;  %v3709_v57 = vpop.xlane.xlu0 %3708  ;;  %4174 = vmatprep.subr.bf16.mxu0 %v6830_v3 }
 0x907   : > { %v3721_v58 = vmul.f32 0.0078125, %v3707_v46  ;;  %v3722_v19 = vmul.f32 0.0078125, %v3709_v57  ;;  %v3744_v35 = vmul.f32 %v9720_v12, %v9720_v12  ;;  %v6833_v46 = vld [vmem:[%s8125_s18 + $0xc] ss:$16 sps:$4 sm:$0xff]   ;;  %v6828_v57 = vld [vmem:[%s8125_s18] ss:$16 sps:$4 sm:$0xff]  }
 0x908   : > { %4267 = vmatprep.subr.bf16.mxu1 %v6833_v46  ;;  %4175 = vmatpush1.bf16.msra.mxu0 %v6828_v57 }
 0x909   : > { %v9727_v38 = vsub.f32 %v9672_v37, %v3721_v58  ;;  %v9730_v52 = vsub.f32 %v9670_v47, %v3722_v19  ;;  %3764 = vadd.xlane.f32.xlu0 %v3744_v35  ;;  %v6831_v58 = vld [vmem:[%s8125_s18 + $0x8] ss:$16 sps:$4 sm:$0xff]   ;;  %s11000_s18 = scalar_lea.vmem [#allocation12], %s8100_s29 }
 0x90a   : > { %v3711_v26 = vpop.xlane.xlu1 %3710  ;;  %4268 = vmatpush1.bf16.msra.mxu1 %v6831_v58  ;;  %v6834_v19 = vld [vmem:[%s8155_s0 + $0x78] sm:$0xff]  }
 0x90b   : > { %v3723_v15 = vmul.f32 0.0078125, %v3711_v26  ;;  %v3745_v53 = vmul.f32 %v9727_v38, %v9727_v38  ;;  %v3746_v23 = vmul.f32 %v9730_v52, %v9730_v52  ;;  %v6836_v35 = vld [vmem:[%s8155_s0 + $0xf8] sm:$0xff]   ;;  %6187 = vmatprep.subr.bf16.mxu0 %v6834_v19 }
 0x90c   : > { %6239 = vmatprep.subr.bf16.mxu1 %v6836_v35 }
 0x90d   : > { %v9741_v21 = vsub.f32 %v9676_v0, %v3723_v15  ;;  %3766 = vadd.xlane.f32.xlu1 %v3745_v53  ;;  %3768 = vadd.xlane.f32.xlu0 %v3746_v23 }
 0x90f   : > { %v3747_v4 = vmul.f32 %v9741_v21, %v9741_v21 }
 0x911   : > { %3770 = vadd.xlane.f32.xlu1 %v3747_v4 }
 0x976   : > { %v3749_v8 = vpop.xlane.xlu0 %3748 }
 0x977   : > { %v3772_v17 = vmul.f32 0.0078125, %v3749_v8 }
 0x979   : > { %v3784_v48 = vadd.f32 1e-05, %v3772_v17 }
 0x97a   : > { %v3751_v39 = vpop.xlane.xlu1 %3750 }
 0x97b   : > { %7106 = vrsqrt.f32 %v3784_v48  ;;  %v3773_v26 = vmul.f32 0.0078125, %v3751_v39  ;;  %vm3798_vm3 = vcmp.eq.f32.partialorder %v3784_v48, inf  ;;  %v3801_v11 = vand.u32 2147483648, %v3784_v48 }
 0x97c   : > { %vm3800_vm4 = vcmp.eq.f32.partialorder %v3784_v48, 0.0 }
 0x97d   : > { %v3785_v15 = vadd.f32 1e-05, %v3773_v26 }
 0x97e   : > { %v3755_v53 = vpop.xlane.xlu1 %3754  ;;  %v3753_v23 = vpop.xlane.xlu0 %3752 }
 0x97f   : > { %v3775_v42 = vmul.f32 0.0078125, %v3755_v53  ;;  %v3774_v32 = vmul.f32 0.0078125, %v3753_v23  ;;  %7108 = vrsqrt.f32 %v3785_v15  ;;  %vm3805_vm5 = vcmp.eq.f32.partialorder %v3785_v15, inf }
 0x980   : > { %v3808_v60 = vand.u32 2147483648, %v3785_v15  ;;  %vm3807_vm6 = vcmp.eq.f32.partialorder %v3785_v15, 0.0 }
 0x981   : > { %v3787_v16 = vadd.f32 1e-05, %v3775_v42  ;;  %v3786_v50 = vadd.f32 1e-05, %v3774_v32 }
 0x982   : > { %v3757_v4 = vpop.xlane.xlu0 %3756 }
 0x983   : > { %7110 = vrsqrt.f32 %v3787_v16  ;;  %v3776_v25 = vmul.f32 0.0078125, %v3757_v4  ;;  %vm3819_vm7 = vcmp.eq.f32.partialorder %v3787_v16, inf  ;;  %vm3821_vm8 = vcmp.eq.f32.partialorder %v3787_v16, 0.0 }
 0x984   : > { %7112 = vrsqrt.f32 %v3786_v50  ;;  %v3822_v19 = vand.u32 2147483648, %v3787_v16  ;;  %vm3812_vm9 = vcmp.eq.f32.partialorder %v3786_v50, inf  ;;  %vm3814_vm10 = vcmp.eq.f32.partialorder %v3786_v50, 0.0 }
 0x985   : > { %v9773_v44 = vadd.f32 1e-05, %v3776_v25 }
 0x986   : > { %v3759_v27 = vpop.xlane.xlu1 %3758  ;;  %v3761_v9 = vpop.xlane.xlu0 %3760 }
 0x987   : > { %v3777_v24 = vmul.f32 0.0078125, %v3759_v27  ;;  %v3778_v2 = vmul.f32 0.0078125, %v3761_v9  ;;  %7114 = vrsqrt.f32 %v9773_v44  ;;  %vm3826_vm11 = vcmp.eq.f32.partialorder %v9773_v44, inf }
 0x988   : > { %v7107_v54 = vpop.eup %7106  ;;  %vm3828_vm12 = vcmp.eq.f32.partialorder %v9773_v44, 0.0 }
 0x989   : > { %v3797_v29 = vmul.f32 %v7107_v54, %v3784_v48  ;;  %v9776_v51 = vadd.f32 1e-05, %v3777_v24  ;;  %v9778_v28 = vadd.f32 1e-05, %v3778_v2 }
 0x98a   : > { %v3763_v31 = vpop.xlane.xlu1 %3762 }
 0x98b   : > { %v3799_v62 = vsel %vm3798_vm3, %v3784_v48, %v3797_v29  ;;  %v3779_v18 = vmul.f32 0.0078125, %v3763_v31  ;;  %7116 = vrsqrt.f32 %v9776_v51  ;;  %v3815_v48 = vand.u32 2147483648, %v3786_v50 }
 0x98c   : > { %v3802_v5 = vsel %vm3800_vm4, %v3801_v11, %v3799_v62  ;;  %v7109_v22 = vpop.eup %7108  ;;  %vm3833_vm13 = vcmp.eq.f32.partialorder %v9776_v51, inf  ;;  %vm3835_vm14 = vcmp.eq.f32.partialorder %v9776_v51, 0.0  ;;  %vm3840_vm15 = vcmp.eq.f32.partialorder %v9778_v28, inf }
 0x98d   : > { %7118 = vrcp.f32 %v3802_v5  ;;  %v3804_v6 = vmul.f32 %v7109_v22, %v3785_v15  ;;  %v9782_v7 = vadd.f32 1e-05, %v3779_v18  ;;  %v3836_v5 = vand.u32 2147483648, %v9776_v51 }
 0x98e   : > { %7120 = vrsqrt.f32 %v9778_v28  ;;  %vm3842_vm0 = vcmp.eq.f32.partialorder %v9778_v28, 0.0 }
 0x98f   : > { %v3806_v3 = vsel %vm3805_vm5, %v3785_v15, %v3804_v6  ;;  %7122 = vrsqrt.f32 %v9782_v7  ;;  %vm3847_vm1 = vcmp.eq.f32.partialorder %v9782_v7, inf  ;;  %vm3849_vm2 = vcmp.eq.f32.partialorder %v9782_v7, 0.0 }
 0x990   : > { %v7111_v41 = vpop.eup %7110  ;;  %v3809_v57 = vsel %vm3807_vm6, %v3808_v60, %v3806_v3 }
 0x991   : > { %v7113_v46 = vpop.eup %7112  ;;  %v3818_v58 = vmul.f32 %v7111_v41, %v3787_v16  ;;  %7124 = vrcp.f32 %v3809_v57 }
 0x992   : > { %v3811_v35 = vmul.f32 %v7113_v46, %v3786_v50  ;;  %v3765_v8 = vpop.xlane.xlu0 %3764  ;;  %v9809_v46 = vld [vmem:[%s11000_s18] ss:$0 sm:$0xff] }
 0x993   : > { %v3820_v17 = vsel %vm3819_vm7, %v3787_v16, %v3818_v58  ;;  %v3780_v39 = vmul.f32 0.0078125, %v3765_v8  ;;  %v3829_v16 = vand.u32 2147483648, %v9773_v44 }
 0x994   : > { %v3823_v26 = vsel %vm3821_vm8, %v3822_v19, %v3820_v17  ;;  %v3813_v53 = vsel %vm3812_vm9, %v3786_v50, %v3811_v35  ;;  %v7115_v42 = vpop.eup %7114  ;;  %v3850_v19 = vand.u32 2147483648, %v9782_v7 }
 0x995   : > { %7126 = vrcp.f32 %v3823_v26  ;;  %v3816_v15 = vsel %vm3814_vm10, %v3815_v48, %v3813_v53  ;;  %v9785_v23 = vadd.f32 1e-05, %v3780_v39  ;;  %v3825_v25 = vmul.f32 %v7115_v42, %v9773_v44 }
 0x996   : > { %7128 = vrcp.f32 %v3816_v15  ;;  %v3767_v32 = vpop.xlane.xlu1 %3766  ;;  %v3769_v4 = vpop.xlane.xlu0 %3768 }
 0x997   : > { %7130 = vrsqrt.f32 %v9785_v23  ;;  %v3781_v27 = vmul.f32 0.0078125, %v3767_v32  ;;  %v3782_v9 = vmul.f32 0.0078125, %v3769_v4  ;;  %v3827_v50 = vsel %vm3826_vm11, %v9773_v44, %v3825_v25 }
 0x998   : > { %v7117_v24 = vpop.eup %7116  ;;  %v3830_v54 = vsel %vm3828_vm12, %v3829_v16, %v3827_v50  ;;  %vm3854_vm3 = vcmp.eq.f32.partialorder %v9785_v23, inf  ;;  %v6835_v50 = vld [vmem:[%s8155_s0 + $0x38] sm:$0xff]   ;;  %vm3856_vm4 = vcmp.eq.f32.partialorder %v9785_v23, 0.0 }
 0x999   : > { %v3832_v29 = vmul.f32 %v7117_v24, %v9776_v51  ;;  %v9795_v11 = vadd.f32 1e-05, %v3781_v27  ;;  %v9797_v31 = vadd.f32 1e-05, %v3782_v9  ;;  %7132 = vrcp.f32 %v3830_v54 }
 0x99a   : > { %v7119_v2 = vpop.eup %7118  ;;  %v3771_v62 = vpop.xlane.xlu1 %3770  ;;  %v3857_v54 = vand.u32 2147483648, %v9785_v23 }
 0x99b   : > { %v7121_v18 = vpop.eup %7120  ;;  %v3783_v22 = vmul.f32 0.0078125, %v3771_v62  ;;  %v3834_v44 = vsel %vm3833_vm13, %v9776_v51, %v3832_v29  ;;  %7134 = vrsqrt.f32 %v9795_v11  ;;  %v3881_v60 = vmul.f32 %v7119_v2, %v9680_v1  ;;  %v6837_v2 = vld [vmem:[%s8155_s0 + $0xb8] sm:$0xff]   ;;  %v6838_v29 = vld [vmem:[%s8155_s0 + $0x70] sm:$0xff]  }
 0x99c   : > { %v3839_v6 = vmul.f32 %v7121_v18, %v9778_v28  ;;  %v7123_v41 = vpop.eup %7122  ;;  %v3837_v3 = vsel %vm3835_vm14, %v3836_v5, %v3834_v44  ;;  %7136 = vrsqrt.f32 %v9797_v31  ;;  %v3843_v1 = vand.u32 2147483648, %v9778_v28 }
 0x99d   : > { %7138 = vrcp.f32 %v3837_v3  ;;  %v3846_v51 = vmul.f32 %v7123_v41, %v9782_v7  ;;  %v9817_v35 = vadd.f32 1e-05, %v3783_v22  ;;  %v3910_v48 = vmul.f32 %v9809_v46, %v3881_v60  ;;  %v6839_v60 = vld [vmem:[%s8155_s0 + $0x30] sm:$0xff]  }
 0x99e   : > { %v3841_v57 = vsel %vm3840_vm15, %v9778_v28, %v3839_v6  ;;  %v7125_v58 = vpop.eup %7124  ;;  %v9826_v28 = vld [vmem:[%s11001_s7] ss:$0 sm:$0xff]  ;;  %vm3861_vm5 = vcmp.eq.f32.partialorder %v9795_v11, inf  ;;  %vm3863_vm6 = vcmp.eq.f32.partialorder %v9795_v11, 0.0  ;;  %vm3868_vm7 = vcmp.eq.f32.partialorder %v9797_v31, inf }
 0x99f   : > { %v3848_v8 = vsel %vm3847_vm1, %v9782_v7, %v3846_v51  ;;  %v3883_v17 = vmul.f32 %v7125_v58, %v9685_v55  ;;  %v3844_v39 = vsel %vm3842_vm0, %v3843_v1, %v3841_v57  ;;  %7140 = vrsqrt.f32 %v9817_v35 }
 0x9a0   : > { %v3851_v26 = vsel %vm3849_vm2, %v3850_v19, %v3848_v8  ;;  %v3928_v32 = vadd.f32 %v9826_v28, %v3910_v48  ;;  %vm3870_vm8 = vcmp.eq.f32.partialorder %v9797_v31, 0.0  ;;  %vm3875_vm9 = vcmp.eq.f32.partialorder %v9817_v35, inf }
 0x9a1   : > { %7142 = vrcp.f32 %v3851_v26  ;;  %v3911_v15 = vmul.f32 %v9809_v46, %v3883_v17  ;;  %v3871_v26 = vand.u32 2147483648, %v9797_v31  ;;  %vm3877_vm10 = vcmp.eq.f32.partialorder %v9817_v35, 0.0 }
 0x9a2   : > { %v7127_v53 = vpop.eup %7126  ;;  %7144 = vrcp.f32 %v3844_v39 }
 0x9a3   : > { %v7129_v42 = vpop.eup %7128  ;;  %v3887_v7 = vmul.f32 %v7127_v53, %v9688_v36  ;;  %v3929_v4 = vadd.f32 %v9826_v28, %v3911_v15 }
 0x9a4   : > { %v7131_v55 = vpop.eup %7130  ;;  %v3885_v25 = vmul.f32 %v7129_v42, %v9693_v34 }
 0x9a5   : > { %v3853_v16 = vmul.f32 %v7131_v55, %v9785_v23  ;;  %v3940_v27 = vpack.c.bf16 %v3929_v4, %v3928_v32  ;;  %v3913_v24 = vmul.f32 %v9809_v46, %v3887_v7 }
 0x9a6   : > { %v3912_v9 = vmul.f32 %v9809_v46, %v3885_v25  ;;  %v7133_v62 = vpop.eup %7132 }
 0x9a7   : > { %v3855_v36 = vsel %vm3854_vm3, %v9785_v23, %v3853_v16  ;;  %4193 = vmatmul.mubr.bf16.vlgmr.msra.gmra.mxu0 %v3940_v27  ;;  %4286 = vmatmul.mubr.bf16.vlgmr.msra.gmra.mxu1 %v3940_v27  ;;  %v3931_v6 = vadd.f32 %v9826_v28, %v3913_v24  ;;  %v3864_v23 = vand.u32 2147483648, %v9795_v11  ;;  %v3889_v51 = vmul.f32 %v7133_v62, %v9700_v20 }
 0x9a8   : > { %v7135_v34 = vpop.eup %7134  ;;  %v3858_v18 = vsel %vm3856_vm4, %v3857_v54, %v3855_v36  ;;  %4202 = vmatprep.mubr.bf16.mxu0 %v10986_v33  ;;  %4295 = vmatprep.mubr.bf16.mxu1 %v10986_v33  ;;  %v3930_v44 = vadd.f32 %v9826_v28, %v3912_v9  ;;  %v3878_v20 = vand.u32 2147483648, %v9817_v35 }
 0x9a9   : > { %v7137_v5 = vpop.eup %7136  ;;  %v3860_v22 = vmul.f32 %v7135_v34, %v9795_v11  ;;  %6188 = vmatpush3.bf16.msra.mxu0 %v6835_v50  ;;  %6240 = vmatpush3.bf16.msra.mxu1 %v6837_v2  ;;  %7146 = vrcp.f32 %v3858_v18 }
 0x9aa   : > { %v7139_v41 = vpop.eup %7138  ;;  %v3867_v3 = vmul.f32 %v7137_v5, %v9797_v31  ;;  %6189 = vmatprep.subr.bf16.mxu0 %v6838_v29  ;;  %v3941_v17 = vpack.c.bf16 %v3931_v6, %v3930_v44 }
 0x9ab   : > { %v3862_v57 = vsel %vm3861_vm5, %v9795_v11, %v3860_v22  ;;  %v3891_v58 = vmul.f32 %v7139_v41, %v9705_v30  ;;  %v3914_v30 = vmul.f32 %v9809_v46, %v3889_v51  ;;  %v6841_v41 = vld [vmem:[%s8155_s0 + $0xb0] sm:$0xff]   ;;  %v6847_v51 = vld [vmem:[%s8155_s0 + $0x20] sm:$0xff]  }
 0x9ac   : > { %v3865_v1 = vsel %vm3863_vm6, %v3864_v23, %v3862_v57  ;;  %v7141_v19 = vpop.eup %7140  ;;  %v3869_v8 = vsel %vm3868_vm7, %v9797_v31, %v3867_v3  ;;  %v6844_v23 = vld [vmem:[%s8155_s0 + $0xe8] sm:$0xff]   ;;  %v6848_v57 = vld [vmem:[%s8155_s0 + $0xe0] sm:$0xff]  }
 0x9ad   : > { %7148 = vrcp.f32 %v3865_v1  ;;  %v3915_v48 = vmul.f32 %v9809_v46, %v3891_v58  ;;  %6190 = vmatpush3.bf16.msra.mxu0 %v6839_v60  ;;  %v3874_v11 = vmul.f32 %v7141_v19, %v9817_v35  ;;  %v3872_v15 = vsel %vm3870_vm8, %v3871_v26, %v3869_v8  ;;  %v6840_v60 = vld [vmem:[%s8155_s0 + $0xf0] sm:$0xff]   ;;  %v6845_v3 = vld [vmem:[%s8155_s0 + $0xa8] sm:$0xff]   ;;  %v6849_v58 = vld [vmem:[%s8155_s0 + $0xa0] sm:$0xff]  }
 0x9ae   : > { %v7143_v39 = vpop.eup %7142  ;;  %v3932_v32 = vadd.f32 %v9826_v28, %v3914_v30  ;;  %6241 = vmatprep.subr.bf16.mxu1 %v6840_v60  ;;  %v6850_v1 = vld [vmem:[%s8155_s0 + $0x58] sm:$0xff]   ;;  %v6855_v26 = vld [vmem:[%s8155_s0 + $0x10] sm:$0xff]   ;;  %v6859_v30 = vld [vmem:[%s8155_s0 + $0x8] sm:$0xff]  }
 0x9af   : > { %4203 = vmatmul.mubr.bf16.gmra.mxu0 %v3941_v17  ;;  %4296 = vmatmul.mubr.bf16.gmra.mxu1 %v3941_v17  ;;  %v7145_v53 = vpop.eup %7144  ;;  %v3876_v42 = vsel %vm3875_vm9, %v9817_v35, %v3874_v11  ;;  %v3933_v31 = vadd.f32 %v9826_v28, %v3915_v48  ;;  %v3895_v55 = vmul.f32 %v7143_v39, %v9715_v40  ;;  %v6851_v19 = vld [vmem:[%s8155_s0 + $0x18] sm:$0xff]   ;;  %v6854_v48 = vld [vmem:[%s8155_s0 + $0x50] sm:$0xff]  }
 0x9b0   : > { %4212 = vmatprep.mubr.bf16.mxu0 %v10986_v33  ;;  %4305 = vmatprep.mubr.bf16.mxu1 %v10986_v33  ;;  %v3879_v7 = vsel %vm3877_vm10, %v3878_v20, %v3876_v42  ;;  %v3893_v4 = vmul.f32 %v7145_v53, %v9708_v63  ;;  %v6852_v8 = vld [vmem:[%s8155_s0 + $0xd8] sm:$0xff]   ;;  %v6856_v39 = vld [vmem:[%s8155_s0 + $0xd0] sm:$0xff]   ;;  %v6858_v20 = vld [vmem:[%s8155_s0 + $0x48] sm:$0xff]  }
 0x9b1   : > { %7150 = vrcp.f32 %v3879_v7  ;;  %v3942_v25 = vpack.c.bf16 %v3933_v31, %v3932_v32  ;;  %v3917_v16 = vmul.f32 %v9809_v46, %v3895_v55  ;;  %6242 = vmatpush3.bf16.msra.mxu1 %v6841_v41  ;;  %v6853_v17 = vld [vmem:[%s8155_s0 + $0x98] sm:$0xff]   ;;  %v6857_v11 = vld [vmem:[%s8155_s0 + $0x90] sm:$0xff]   ;;  %v6860_v53 = vld [vmem:[%s8155_s0 + $0xc8] sm:$0xff]  }
 0x9b2   : > { %7152 = vrcp.f32 %v3872_v15  ;;  %v3916_v35 = vmul.f32 %v9809_v46, %v3893_v4  ;;  %6243 = vmatprep.subr.bf16.mxu1 %v6844_v23  ;;  %v6861_v15 = vld [vmem:[%s8155_s0 + $0x88] sm:$0xff]   ;;  %v6862_v42 = vld [vmem:[%s8155_s0 + $0x40] sm:$0xff]   ;;  %v3978_v32 = vld [vmem:[%s8153_s1] sm:$0xf] }
 0x9b3   : > { %v3935_v40 = vadd.f32 %v9826_v28, %v3917_v16  ;;  %v6863_v7 = vld [vmem:[%s8155_s0] sm:$0xff]   ;;  %v11002_v4 = vld [vmem:[#allocation28_spill] sm:$0xff] }
 0x9b4   : > { %v3934_v24 = vadd.f32 %v9826_v28, %v3916_v35  ;;  %v6864_v31 = vld [vmem:[%s8155_s0 + $0xc0] sm:$0xff]   ;;  %v11004_v35 = vsub.s32 2, %v11002_v4 }
 0x9b5   : > { %6244 = vmatpush3.bf16.msra.mxu1 %v6845_v3  ;;  %v6865_v55 = vld [vmem:[%s8155_s0 + $0x80] sm:$0xff]  }
 0x9b6   : > { %v7147_v27 = vpop.eup %7146  ;;  %v3943_v2 = vpack.c.bf16 %v3935_v40, %v3934_v24  ;;  %6245 = vmatprep.subr.bf16.mxu1 %v6848_v57 }
 0x9b7   : > { %4213 = vmatmul.mubr.bf16.gmra.mxu0 %v3942_v25  ;;  %4306 = vmatmul.mubr.bf16.gmra.mxu1 %v3942_v25  ;;  %v3897_v50 = vmul.f32 %v7147_v27, %v9720_v12  ;;  %v11003_v25 = vsub.s32 0, %v11002_v4  ;;  %v9928_v27 = vrot.slane %v3978_v32, %v11004_v35 }
 0x9b8   : > { %4222 = vmatprep.mubr.bf16.mxu0 %v10986_v33  ;;  %4315 = vmatprep.mubr.bf16.mxu1 %v10986_v33 }
 0x9b9   : > { %v3918_v29 = vmul.f32 %v9809_v46, %v3897_v50  ;;  %6246 = vmatpush3.bf16.msra.mxu1 %v6849_v58  ;;  %v9924_v16 = vrot.slane %v3978_v32, %v11003_v25 }
 0x9ba   : > { %v7149_v9 = vpop.eup %7148  ;;  %6247 = vmatprep.subr.bf16.mxu1 %v6852_v8 }
 0x9bb   : > { %v3899_v63 = vmul.f32 %v7149_v9, %v9727_v38  ;;  %v3936_v38 = vadd.f32 %v9826_v28, %v3918_v29  ;;  %v3994_v29 = vsub.s32 3, %v11002_v4 }
 0x9bd   : > { %v3919_v36 = vmul.f32 %v9809_v46, %v3899_v63  ;;  %6248 = vmatpush3.bf16.msra.mxu1 %v6853_v17 }
 0x9be   : > { %v7151_v54 = vpop.eup %7150  ;;  %6249 = vmatprep.subr.bf16.mxu1 %v6856_v39 }
 0x9bf   : > { %4223 = vmatmul.mubr.bf16.gmra.mxu0 %v3943_v2  ;;  %4316 = vmatmul.mubr.bf16.gmra.mxu1 %v3943_v2  ;;  %v7153_v62 = vpop.eup %7152  ;;  %v3937_v34 = vadd.f32 %v9826_v28, %v3919_v36  ;;  %v3903_v12 = vmul.f32 %v7151_v54, %v9741_v21 }
 0x9c0   : > { %4232 = vmatprep.mubr.bf16.mxu0 %v10986_v33  ;;  %4325 = vmatprep.mubr.bf16.mxu1 %v10986_v33  ;;  %v3901_v18 = vmul.f32 %v7153_v62, %v9730_v52 }
 0x9c1   : > { %v3944_v5 = vpack.c.bf16 %v3937_v34, %v3936_v38  ;;  %v3921_v22 = vmul.f32 %v9809_v46, %v3903_v12  ;;  %6250 = vmatpush3.bf16.msra.mxu1 %v6857_v11 }
 0x9c2   : > { %v3920_v44 = vmul.f32 %v9809_v46, %v3901_v18  ;;  %v6842_v46 = vld [vmem:[%s8155_s0 + $0x68] sm:$0xff]   ;;  %6251 = vmatprep.subr.bf16.mxu1 %v6860_v53 }
 0x9c3   : > { %v3939_v21 = vadd.f32 %v9826_v28, %v3921_v22  ;;  %6191 = vmatprep.subr.bf16.mxu0 %v6842_v46  ;;  %v9944_v46 = vrot.slane %v3978_v32, %v3994_v29 }
 0x9c4   : > { %v3938_v6 = vadd.f32 %v9826_v28, %v3920_v44  ;;  %v6846_v28 = vld [vmem:[%s8155_s0 + $0x60] sm:$0xff]  }
 0x9c5   : > { %6252 = vmatpush3.bf16.msra.mxu1 %v6861_v15 }
 0x9c6   : > { %v3945_v52 = vpack.c.bf16 %v3939_v21, %v3938_v6  ;;  %6253 = vmatprep.subr.bf16.mxu1 %v6864_v31 }
 0x9c7   : > { %4233 = vmatmul.mubr.bf16.gmra.mxu0 %v3944_v5  ;;  %4326 = vmatmul.mubr.bf16.gmra.mxu1 %v3944_v5 }
 0x9c8   : > { %4242 = vmatprep.mubr.bf16.mxu0 %v10986_v33  ;;  %4335 = vmatprep.mubr.bf16.mxu1 %v10986_v33  ;;  %v6843_v33 = vld [vmem:[%s8155_s0 + $0x28] sm:$0xff]  }
 0x9c9   : > { %6192 = vmatpush3.bf16.msra.mxu0 %v6843_v33  ;;  %6254 = vmatpush3.bf16.msra.mxu1 %v6865_v55 }
 0x9ca   : > { %6193 = vmatprep.subr.bf16.mxu0 %v6846_v28 }
 0x9cd   : > { %6194 = vmatpush3.bf16.msra.mxu0 %v6847_v51 }
 0x9ce   : > { %6195 = vmatprep.subr.bf16.mxu0 %v6850_v1 }
 0x9cf   : > { %4243 = vmatmul.mubr.bf16.gmra.mxu0 %v3945_v52  ;;  %4336 = vmatmul.mubr.bf16.gmra.mxu1 %v3945_v52  ;;  %v11005_v52 = vsub.s32 1, %v11002_v4 }
 0x9d1   : > { %6196 = vmatpush3.bf16.msra.mxu0 %v6851_v19  ;;  %v9941_v60 = vrot.slane %v3978_v32, %v11005_v52 }
 0x9d2   : > { %6197 = vmatprep.subr.bf16.mxu0 %v6854_v48 }
 0x9d5   : > { %6198 = vmatpush3.bf16.msra.mxu0 %v6855_v26 }
 0x9d6   : > { %6199 = vmatprep.subr.bf16.mxu0 %v6858_v20 }
 0x9d9   : > { %6200 = vmatpush3.bf16.msra.mxu0 %v6859_v30 }
 0x9da   : > { %6201 = vmatprep.subr.bf16.mxu0 %v6862_v42 }
 0x9dd   : > { %6202 = vmatpush3.bf16.msra.mxu0 %v6863_v7 }
 0xa67   : > { %v4194_v40 = vpop.f32.mrf.mxu0  ;;  %v4287_v9 = vpop.f32.mrf.mxu1 }
 0xa68   : > { %v4195_v24 = vadd.f32 %v4194_v40, %v9924_v16  ;;  %v4288_v50 = vadd.f32 %v4287_v9, %v9928_v27 }
 0xa69   : > { %v4196_v63 = vpop.f32.mrf.mxu0  ;;  %v4289_v2 = vpop.f32.mrf.mxu1 }
 0xa6a   : > { %v4394_v36 = vmul.f32 0.044715, %v4195_v24  ;;  %v4396_v54 = vmul.f32 0.044715, %v4288_v50  ;;  %v9950_v8 = vadd.f32 %v4196_v63, %v9941_v60  ;;  %v9954_v48 = vadd.f32 %v4289_v2, %v9944_v46 }
 0xa6b   : > { %v4198_v62 = vpop.f32.mrf.mxu0  ;;  %v4291_v34 = vpop.f32.mrf.mxu1  ;;  %v9965_v55 = vmul.f32 0.5, %v4195_v24  ;;  %v9967_v32 = vmul.f32 0.5, %v4288_v50 }
 0xa6c   : > { %v4442_v12 = vmul.f32 %v4394_v36, %v4195_v24  ;;  %v4444_v38 = vmul.f32 %v4396_v54, %v4288_v50  ;;  %v9934_v18 = vadd.f32 %v4198_v62, %v9924_v16  ;;  %v9937_v5 = vadd.f32 %v4291_v34, %v9928_v27 }
 0xa6d   : > { %v4200_v22 = vpop.f32.mrf.mxu0  ;;  %v4293_v44 = vpop.f32.mrf.mxu1  ;;  %v4395_v35 = vmul.f32 0.044715, %v9950_v8  ;;  %v4397_v40 = vmul.f32 0.044715, %v9954_v48 }
 0xa6e   : > { %v4490_v21 = vmul.f32 %v4442_v12, %v4195_v24  ;;  %v4492_v6 = vmul.f32 %v4444_v38, %v4288_v50  ;;  %v4398_v41 = vmul.f32 0.044715, %v9934_v18  ;;  %v4400_v23 = vmul.f32 0.044715, %v9937_v5 }
 0xa6f   : > { %v4204_v33 = vpop.f32.mrf.mxu0  ;;  %v4297_v3 = vpop.f32.mrf.mxu1  ;;  %v9974_v63 = vadd.f32 %v4200_v22, %v9941_v60 }
 0xa70   : > { %v4538_v28 = vadd.f32 %v4490_v21, %v4195_v24  ;;  %v4446_v57 = vmul.f32 %v4398_v41, %v9934_v18  ;;  %v4448_v51 = vmul.f32 %v4400_v23, %v9937_v5  ;;  %v4540_v19 = vadd.f32 %v4492_v6, %v4288_v50 }
 0xa71   : > { %v4206_v58 = vpop.f32.mrf.mxu0  ;;  %v4299_v1 = vpop.f32.mrf.mxu1  ;;  %v9958_v26 = vadd.f32 %v4204_v33, %v9924_v16  ;;  %v9961_v11 = vadd.f32 %v4297_v3, %v9928_v27  ;;  %v9977_v24 = vadd.f32 %v4293_v44, %v9944_v46  ;;  %v9994_v21 = vmul.f32 0.5, %v9950_v8 }
 0xa72   : > { %v4494_v17 = vmul.f32 %v4446_v57, %v9934_v18  ;;  %v4496_v39 = vmul.f32 %v4448_v51, %v9937_v5  ;;  %v4586_v53 = vmul.f32 0.7978845, %v4538_v28  ;;  %v4588_v4 = vmul.f32 0.7978845, %v4540_v19 }
 0xa73   : > { %11006 = vst [vmem:[#allocation30_spill] sm:$0xff] %v9958_v26  ;;  %11007 = vst [vmem:[#allocation49_spill] sm:$0xff] %v9961_v11  ;;  %v4208_v20 = vpop.f32.mrf.mxu0  ;;  %v4301_v30 = vpop.f32.mrf.mxu1  ;;  %v4402_v42 = vmul.f32 0.044715, %v9958_v26  ;;  %v4404_v25 = vmul.f32 0.044715, %v9961_v11  ;;  %v9985_v34 = vadd.f32 %v4206_v58, %v9941_v60  ;;  %v10004_v51 = vadd.f32 %v4299_v1, %v9944_v46 }
 0xa74   : > { %v4542_v15 = vadd.f32 %v4494_v17, %v9934_v18  ;;  %v4544_v9 = vadd.f32 %v4496_v39, %v9937_v5  ;;  %7154 = vtanh.f32 %v4586_v53  ;;  %v9981_v54 = vadd.f32 %v4208_v20, %v9924_v16 }
 0xa75   : > { %v4210_v7 = vpop.f32.mrf.mxu0  ;;  %v4303_v31 = vpop.f32.mrf.mxu1  ;;  %v4450_v50 = vmul.f32 %v4402_v42, %v9958_v26  ;;  %v4452_v62 = vmul.f32 %v4404_v25, %v9961_v11  ;;  %v9988_v12 = vadd.f32 %v4301_v30, %v9928_v27  ;;  %7156 = vtanh.f32 %v4588_v4 }
 0xa76   : > { %11008 = vst [vmem:[#allocation50_spill] sm:$0xff] %v9981_v54  ;;  %v4590_v29 = vmul.f32 0.7978845, %v4542_v15  ;;  %v4406_v44 = vmul.f32 0.044715, %v9981_v54  ;;  %v9997_v6 = vmul.f32 0.5, %v9954_v48  ;;  %v4443_v53 = vmul.f32 %v4395_v35, %v9950_v8 }
 0xa77   : > { %v4214_v2 = vpop.f32.mrf.mxu0  ;;  %v4307_v36 = vpop.f32.mrf.mxu1  ;;  %11009 = vst [vmem:[#allocation34_spill] sm:$0xff] %v9988_v12  ;;  %v4592_v52 = vmul.f32 0.7978845, %v4544_v9  ;;  %v4399_v41 = vmul.f32 0.044715, %v9974_v63  ;;  %v4498_v57 = vmul.f32 %v4450_v50, %v9958_v26  ;;  %v4500_v19 = vmul.f32 %v4452_v62, %v9961_v11 }
 0xa78   : > { %v4408_v23 = vmul.f32 0.044715, %v9988_v12  ;;  %v4401_v28 = vmul.f32 0.044715, %v9977_v24  ;;  %v10007_v58 = vadd.f32 %v4214_v2, %v9924_v16  ;;  %7158 = vtanh.f32 %v4590_v29 }
 0xa79   : > { %v4216_v38 = vpop.f32.mrf.mxu0  ;;  %v9990_v22 = vpop.f32.mrf.mxu1  ;;  %v4403_v17 = vmul.f32 0.044715, %v9985_v34  ;;  %v4454_v39 = vmul.f32 %v4406_v44, %v9981_v54  ;;  %v10019_v1 = vadd.f32 %v4210_v7, %v9941_v60  ;;  %v10022_v42 = vadd.f32 %v4303_v31, %v9944_v46 }
 0xa7a   : > { %11010 = vst [vmem:[#allocation36_spill] sm:$0xff] %v10007_v58  ;;  %v4456_v15 = vmul.f32 %v4408_v23, %v9988_v12  ;;  %v4445_v4 = vmul.f32 %v4397_v40, %v9954_v48  ;;  %7160 = vtanh.f32 %v4592_v52  ;;  %v4410_v25 = vmul.f32 0.044715, %v10007_v58 }
 0xa7b   : > { %v4218_v33 = vpop.f32.mrf.mxu0  ;;  %v4311_v3 = vpop.f32.mrf.mxu1  ;;  %v10027_v9 = vadd.f32 %v4307_v36, %v9928_v27  ;;  %v10030_v50 = vmul.f32 0.5, %v9934_v18  ;;  %v4447_v35 = vmul.f32 %v4399_v41, %v9974_v63  ;;  %v4546_v7 = vadd.f32 %v4498_v57, %v9958_v26 }
 0xa7c   : > { %v4405_v29 = vmul.f32 0.044715, %v10004_v51  ;;  %v4449_v62 = vmul.f32 %v4401_v28, %v9977_v24  ;;  %v4548_v40 = vadd.f32 %v4500_v19, %v9961_v11  ;;  %v4451_v44 = vmul.f32 %v4403_v17, %v9985_v34 }
 0xa7d   : > { %v10012_v20 = vpop.f32.mrf.mxu0  ;;  %v10014_v30 = vpop.f32.mrf.mxu1  ;;  %11011 = vst [vmem:[#allocation51_spill] sm:$0xff] %v10027_v9  ;;  %v4502_v36 = vmul.f32 %v4454_v39, %v9981_v54  ;;  %v10040_v52 = vmul.f32 0.5, %v9937_v5  ;;  %v4504_v18 = vmul.f32 %v4456_v15, %v9988_v12  ;;  %v4407_v41 = vmul.f32 0.044715, %v10019_v1 }
 0xa7e   : > { %v4409_v23 = vmul.f32 0.044715, %v10022_v42  ;;  %v10048_v0 = vmul.f32 %v4443_v53, %v9950_v8  ;;  %v10051_v28 = vmul.f32 %v4445_v4, %v9954_v48  ;;  %v4458_v19 = vmul.f32 %v4410_v25, %v10007_v58 }
 0xa7f   : > { %v4224_v2 = vpop.f32.mrf.mxu0  ;;  %v4317_v31 = vpop.f32.mrf.mxu1  ;;  %v4412_v17 = vmul.f32 0.044715, %v10027_v9  ;;  %v10056_v5 = vmul.f32 %v4447_v35, %v9974_v63  ;;  %v4594_v39 = vmul.f32 0.7978845, %v4546_v7  ;;  %v4453_v15 = vmul.f32 %v4405_v29, %v10004_v51 }
 0xa80   : > { %v10060_v47 = vadd.f32 %v4216_v38, %v9941_v60  ;;  %v10065_v61 = vmul.f32 %v4449_v62, %v9977_v24  ;;  %v4596_v4 = vmul.f32 0.7978845, %v4548_v40  ;;  %v10068_v25 = vmul.f32 %v4451_v44, %v9985_v34 }
 0xa81   : > { %v10045_v57 = vpop.f32.mrf.mxu0  ;;  %v10062_v37 = vpop.f32.mrf.mxu1  ;;  %v4550_v43 = vadd.f32 %v4502_v36, %v9981_v54  ;;  %v4552_v35 = vadd.f32 %v4504_v18, %v9988_v12  ;;  %v4455_v7 = vmul.f32 %v4407_v41, %v10019_v1  ;;  %v4457_v29 = vmul.f32 %v4409_v23, %v10022_v42 }
 0xa82   : > { %v7155_v53 = vpop.eup %7154  ;;  %v10075_v38 = vadd.f32 %v4218_v33, %v9924_v16  ;;  %v4506_v62 = vmul.f32 %v4458_v19, %v10007_v58  ;;  %v4460_v40 = vmul.f32 %v4412_v17, %v10027_v9  ;;  %v10081_v44 = vadd.f32 %v9990_v22, %v9944_v46 }
 0xa83   : > { %v4228_v13 = vpop.f32.mrf.mxu0  ;;  %v7157_v49 = vpop.eup %7156  ;;  %v10084_v36 = vadd.f32 %v4311_v3, %v9928_v27  ;;  %7162 = vtanh.f32 %v4594_v39  ;;  %v10087_v18 = vmul.f32 %v4453_v15, %v10004_v51  ;;  %v4411_v33 = vmul.f32 0.044715, %v10060_v47 }
 0xa84   : > { %11012 = vst [vmem:[#allocation52_spill] sm:$0xff] %v10075_v38  ;;  %11013 = vst [vmem:[#allocation53_spill] sm:$0xff] %v10081_v44  ;;  %v4414_v41 = vmul.f32 0.044715, %v10075_v38  ;;  %v4321_v23 = vpop.f32.mrf.mxu1  ;;  %v4682_v14 = vadd.f32 1.0, %v7155_v53  ;;  %7164 = vtanh.f32 %v4596_v4  ;;  %v4684_v22 = vadd.f32 1.0, %v7157_v49 }
 0xa85   : > { %11014 = vst [vmem:[#allocation55_spill] sm:$0xff] %v10084_v36  ;;  %v4598_v19 = vmul.f32 0.7978845, %v4550_v43  ;;  %v4416_v17 = vmul.f32 0.044715, %v10084_v36  ;;  %v7159_v59 = vpop.eup %7158  ;;  %v10093_v56 = vmul.f32 %v4455_v7, %v10019_v1  ;;  %v10096_v3 = vmul.f32 %v4457_v29, %v10022_v42  ;;  %v4230_v15 = vpop.f32.mrf.mxu0 }
 0xa86   : > { %v10099_v39 = vadd.f32 %v4224_v2, %v9924_v16  ;;  %v4600_v10 = vmul.f32 0.7978845, %v4552_v35  ;;  %v4554_v45 = vadd.f32 %v4506_v62, %v10007_v58  ;;  %v4508_v53 = vmul.f32 %v4460_v40, %v10027_v9  ;;  %v4323_v2 = vpop.f32.mrf.mxu1 }
 0xa87   : > { %v4413_v43 = vmul.f32 0.044715, %v10081_v44  ;;  %v7161_v4 = vpop.eup %7160  ;;  %v4459_v49 = vmul.f32 %v4411_v33, %v10060_v47  ;;  %v4462_v7 = vmul.f32 %v4414_v41, %v10075_v38  ;;  %v10108_v29 = vadd.f32 %v4317_v31, %v9928_v27  ;;  %v4234_v58 = vpop.f32.mrf.mxu0 }
 0xa88   : > { %11015 = vst [vmem:[#allocation33_spill] sm:$0xff] %v10099_v39  ;;  %v4418_v12 = vmul.f32 0.044715, %v10099_v39  ;;  %v10111_v11 = vmul.f32 %v4682_v14, %v9965_v55  ;;  %v4686_v35 = vadd.f32 1.0, %v7159_v59  ;;  %7166 = vtanh.f32 %v4598_v19 }
 0xa89   : > { %11016 = vst [vmem:[#allocation35_spill] sm:$0xff] %v10108_v29  ;;  %v4464_v62 = vmul.f32 %v4416_v17, %v10084_v36  ;;  %v10115_v40 = vmul.f32 %v4684_v22, %v9967_v32  ;;  %v10119_v33 = vadd.f32 %v10012_v20, %v9941_v60  ;;  %v4420_v31 = vmul.f32 0.044715, %v10108_v29  ;;  %v4327_v17 = vpop.f32.mrf.mxu1 }
 0xa8a   : > { %v4466_v41 = vmul.f32 %v4418_v12, %v10099_v39  ;;  %v4688_v26 = vadd.f32 1.0, %v7161_v4  ;;  %7168 = vtanh.f32 %v4600_v10  ;;  %v4602_v14 = vmul.f32 0.7978845, %v4554_v45 }
 0xa8b   : > { %11017 = vst [vmem:[#allocation39_spill] sm:$0xff] %v10115_v40  ;;  %v4461_v59 = vmul.f32 %v4413_v43, %v10081_v44  ;;  %v4556_v55 = vadd.f32 %v4508_v53, %v10027_v9  ;;  %v10126_v19 = vmul.f32 %v4459_v49, %v10060_v47  ;;  %v4510_v32 = vmul.f32 %v4462_v7, %v10075_v38  ;;  %v4236_v49 = vpop.f32.mrf.mxu0 }
 0xa8c   : > { %v4468_v20 = vmul.f32 %v4420_v31, %v10108_v29  ;;  %v10131_v12 = vmul.f32 %v4686_v35, %v10030_v50  ;;  %v4512_v22 = vmul.f32 %v4464_v62, %v10084_v36  ;;  %v10136_v45 = vadd.f32 %v10014_v30, %v9944_v46 }
 0xa8d   : > { %v10139_v10 = vadd.f32 %v4228_v13, %v9924_v16  ;;  %v4415_v53 = vmul.f32 0.044715, %v10119_v33  ;;  %v4514_v43 = vmul.f32 %v4466_v41, %v10099_v39  ;;  %v10145_v4 = vadd.f32 %v10045_v57, %v9941_v60  ;;  %v4329_v41 = vpop.f32.mrf.mxu1 }
 0xa8e   : > { %v10148_v50 = vadd.f32 %v4321_v23, %v9928_v27  ;;  %7170 = vtanh.f32 %v4602_v14  ;;  %v10151_v7 = vmul.f32 %v4461_v59, %v10081_v44  ;;  %v10155_v13 = vadd.f32 %v10062_v37, %v9944_v46 }
 0xa8f   : > { %11018 = vst [vmem:[#allocation54_spill] sm:$0xff] %v10139_v10  ;;  %v4422_v30 = vmul.f32 0.044715, %v10139_v10  ;;  %v10159_v35 = vmul.f32 %v4688_v26, %v10040_v52  ;;  %v4604_v62 = vmul.f32 0.7978845, %v4556_v55  ;;  %v4558_v57 = vadd.f32 %v4510_v32, %v10075_v38 }
 0xa90   : > { %11019 = vst [vmem:[#allocation38_spill] sm:$0xff] %v10148_v50  ;;  %11020 = vst [vmem:[#allocation37_spill] sm:$0xff] %v10151_v7  ;;  %v4516_v23 = vmul.f32 %v4468_v20, %v10108_v29  ;;  %v10163_v31 = vpop.eup %7162  ;;  %v4560_v59 = vadd.f32 %v4512_v22, %v10084_v36  ;;  %v4417_v37 = vmul.f32 0.044715, %v10136_v45  ;;  %v4424_v9 = vmul.f32 0.044715, %v10148_v50  ;;  %v4238_v20 = vpop.f32.mrf.mxu0 }
 0xa91   : > { %11021 = vst [vmem:[#allocation28_spill] sm:$0xff] %v10159_v35  ;;  %11022 = vst [vmem:[#allocation56_spill] sm:$0xff] %v10163_v31  ;;  %v10170_v54 = vpop.eup %7164  ;;  %v4463_v26 = vmul.f32 %v4415_v53, %v10119_v33  ;;  %v4562_v52 = vadd.f32 %v4514_v43, %v10099_v39  ;;  %v4419_v55 = vmul.f32 0.044715, %v10145_v4  ;;  %v10176_v32 = vadd.f32 %v4230_v15, %v9941_v60 }
 0xa92   : > { %11023 = vst [vmem:[#allocation57_spill] sm:$0xff] %v10170_v54  ;;  %v4421_v14 = vmul.f32 0.044715, %v10155_v13  ;;  %v4470_v22 = vmul.f32 %v4422_v30, %v10139_v10  ;;  %v10181_v36 = vadd.f32 %v4323_v2, %v9944_v46  ;;  %v10184_v38 = vadd.f32 %v4234_v58, %v9924_v16  ;;  %v4331_v54 = vpop.f32.mrf.mxu1  ;;  %v4240_v53 = vpop.f32.mrf.mxu0 }
 0xa93   : > { %v4606_v43 = vmul.f32 0.7978845, %v4558_v57  ;;  %v4564_v39 = vadd.f32 %v4516_v23, %v10108_v29  ;;  %v10190_v15 = vadd.f32 %v4327_v17, %v9928_v27  ;;  %7172 = vtanh.f32 %v4604_v62 }
 0xa94   : > { %11024 = vst [vmem:[#allocation58_spill] sm:$0xff] %v10184_v38  ;;  %v4608_v7 = vmul.f32 0.7978845, %v4560_v59  ;;  %v4465_v30 = vmul.f32 %v4417_v37, %v10136_v45  ;;  %v4472_v2 = vmul.f32 %v4424_v9, %v10148_v50  ;;  %v10197_v58 = vmul.f32 %v4463_v26, %v10119_v33 }
 0xa95   : > { %11025 = vst [vmem:[#allocation59_spill] sm:$0xff] %v10190_v15  ;;  %v10194_v44 = vpop.eup %7166  ;;  %v4610_v31 = vmul.f32 0.7978845, %v4562_v52  ;;  %v4467_v57 = vmul.f32 %v4419_v55, %v10145_v4  ;;  %v4423_v23 = vmul.f32 0.044715, %v10176_v32  ;;  %v4469_v17 = vmul.f32 %v4421_v14, %v10155_v13  ;;  %v4333_v55 = vpop.f32.mrf.mxu1 }
 0xa96   : > { %v4518_v62 = vmul.f32 %v4470_v22, %v10139_v10  ;;  %v4425_v59 = vmul.f32 0.044715, %v10181_v36  ;;  %v4426_v37 = vmul.f32 0.044715, %v10184_v38  ;;  %7174 = vtanh.f32 %v4606_v43 }
 0xa97   : > { %v10205_v9 = vpop.eup %7168  ;;  %v4612_v29 = vmul.f32 0.7978845, %v4564_v39  ;;  %v4428_v26 = vmul.f32 0.044715, %v10190_v15  ;;  %v10209_v52 = vadd.f32 %v4238_v20, %v9924_v16  ;;  %7176 = vtanh.f32 %v4608_v7  ;;  %v4244_v20 = vpop.f32.mrf.mxu0 }
 0xa98   : > { %11026 = vst [vmem:[#allocation60_spill] sm:$0xff] %v10205_v9  ;;  %v10212_v40 = vmul.f32 %v4465_v30, %v10136_v45  ;;  %v4520_v14 = vmul.f32 %v4472_v2, %v10148_v50  ;;  %v10216_v22 = vadd.f32 %v4331_v54, %v9928_v27  ;;  %7178 = vtanh.f32 %v4610_v31 }
 0xa99   : > { %11027 = vst [vmem:[#allocation61_spill] sm:$0xff] %v10209_v52  ;;  %v4471_v9 = vmul.f32 %v4423_v23, %v10176_v32  ;;  %v10220_v39 = vadd.f32 %v4236_v49, %v9941_v60  ;;  %v4430_v43 = vmul.f32 0.044715, %v10209_v52  ;;  %v4566_v35 = vadd.f32 %v4518_v62, %v10139_v10  ;;  %v4337_v23 = vpop.f32.mrf.mxu1 }
 0xa9a   : > { %11028 = vst [vmem:[#allocation62_spill] sm:$0xff] %v10212_v40  ;;  %11029 = vst [vmem:[#allocation63_spill] sm:$0xff] %v10216_v22  ;;  %v4473_v7 = vmul.f32 %v4425_v59, %v10181_v36  ;;  %v4474_v30 = vmul.f32 %v4426_v37, %v10184_v38  ;;  %v4432_v2 = vmul.f32 0.044715, %v10216_v22  ;;  %7180 = vtanh.f32 %v4612_v29 }
 0xa9b   : > { %v10227_v40 = vpop.eup %7170  ;;  %v10230_v54 = vmul.f32 %v4467_v57, %v10145_v4  ;;  %v10233_v49 = vmul.f32 %v4469_v17, %v10155_v13  ;;  %v4476_v31 = vmul.f32 %v4428_v26, %v10190_v15  ;;  %v4568_v62 = vadd.f32 %v4520_v14, %v10148_v50 }
 0xa9c   : > { %11030 = vst [vmem:[#allocation64_spill] sm:$0xff] %v10227_v40  ;;  %v10238_v59 = vadd.f32 %v4329_v41, %v9944_v46  ;;  %v4478_v37 = vmul.f32 %v4430_v43, %v10209_v52  ;;  %v4539_v10 = vadd.f32 %v10048_v0, %v9950_v8  ;;  %v10244_v29 = vmul.f32 %v4471_v9, %v10176_v32  ;;  %v4246_v40 = vpop.f32.mrf.mxu0 }
 0xa9d   : > { %11031 = vst [vmem:[#allocation65_spill] sm:$0xff] %v10233_v49  ;;  %v4427_v57 = vmul.f32 0.044715, %v10220_v39  ;;  %v4480_v17 = vmul.f32 %v4432_v2, %v10216_v22  ;;  %v4543_v26 = vadd.f32 %v10056_v5, %v9974_v63  ;;  %v4614_v14 = vmul.f32 0.7978845, %v4566_v35  ;;  %v4339_v49 = vpop.f32.mrf.mxu1 }
 0xa9e   : > { %v10251_v41 = vmul.f32 %v4473_v7, %v10181_v36  ;;  %v4522_v43 = vmul.f32 %v4474_v30, %v10184_v38  ;;  %v4587_v50 = vmul.f32 0.7978845, %v4539_v10  ;;  %v4524_v0 = vmul.f32 %v4476_v31, %v10190_v15 }
 0xa9f   : > { %v10256_v8 = vadd.f32 %v4240_v53, %v9941_v60  ;;  %v4591_v9 = vmul.f32 0.7978845, %v4543_v26  ;;  %v4541_v2 = vadd.f32 %v10051_v28, %v9954_v48  ;;  %v4429_v5 = vmul.f32 0.044715, %v10238_v59  ;;  %v4248_v26 = vpop.f32.mrf.mxu0 }
 0xaa0   : > { %11032 = vst [vmem:[#allocation66_spill] sm:$0xff] %v10251_v41  ;;  %v4526_v35 = vmul.f32 %v4478_v37, %v10209_v52  ;;  %7182 = vtanh.f32 %v4587_v50  ;;  %v4545_v7 = vadd.f32 %v10065_v61, %v9977_v24  ;;  %v10264_v30 = vpop.eup %7172  ;;  %v4528_v10 = vmul.f32 %v4480_v17, %v10216_v22 }
 0xaa1   : > { %11033 = vst [vmem:[#allocation67_spill] sm:$0xff] %v10264_v30  ;;  %v10268_v53 = vadd.f32 %v4333_v55, %v9944_v46  ;;  %7184 = vtanh.f32 %v4591_v9  ;;  %v4589_v31 = vmul.f32 0.7978845, %v4541_v2  ;;  %v4616_v48 = vmul.f32 0.7978845, %v4568_v62  ;;  %v4341_v30 = vpop.f32.mrf.mxu1 }
 0xaa2   : > { %v4570_v28 = vadd.f32 %v4522_v43, %v10184_v38  ;;  %v4593_v41 = vmul.f32 0.7978845, %v4545_v7  ;;  %v10272_v37 = vadd.f32 %v4244_v20, %v9924_v16  ;;  %7186 = vtanh.f32 %v4614_v14 }
 0xaa3   : > { %v4572_v61 = vadd.f32 %v4524_v0, %v10190_v15  ;;  %v4475_v50 = vmul.f32 %v4427_v57, %v10220_v39  ;;  %v4431_v17 = vmul.f32 0.044715, %v10256_v8  ;;  %v10277_v55 = vpop.eup %7174  ;;  %v4574_v9 = vadd.f32 %v4526_v35, %v10209_v52 }
 0xaa4   : > { %11034 = vst [vmem:[#allocation68_spill] sm:$0xff] %v10272_v37  ;;  %v4434_v62 = vmul.f32 0.044715, %v10272_v37  ;;  %v10282_v43 = vadd.f32 %v4337_v23, %v9928_v27  ;;  %v10285_v20 = vadd.f32 %v4248_v26, %v9924_v16  ;;  %v10287_v14 = vpop.eup %7176  ;;  %v4477_v0 = vmul.f32 %v4429_v5, %v10238_v59 }
 0xaa5   : > { %v4576_v57 = vadd.f32 %v4528_v10, %v10216_v22  ;;  %v4433_v2 = vmul.f32 0.044715, %v10268_v53  ;;  %7188 = vtanh.f32 %v4589_v31  ;;  %v10292_v7 = vpop.eup %7178  ;;  %v4618_v35 = vmul.f32 0.7978845, %v4570_v28 }
 0xaa6   : > { %11035 = vst [vmem:[#allocation69_spill] sm:$0xff] %v10282_v43  ;;  %11036 = vst [vmem:[#allocation70_spill] sm:$0xff] %v10292_v7  ;;  %7190 = vtanh.f32 %v4593_v41  ;;  %v10295_v15 = vadd.f32 %v4246_v40, %v9941_v60  ;;  %v10298_v23 = vadd.f32 %v4341_v30, %v9928_v27  ;;  %v4620_v16 = vmul.f32 0.7978845, %v4572_v61 }
 0xaa7   : > { %7192 = vtanh.f32 %v4616_v48  ;;  %v4479_v26 = vmul.f32 %v4431_v17, %v10256_v8  ;;  %v10302_v5 = vadd.f32 %v4339_v49, %v9944_v46  ;;  %v10304_v10 = vpop.eup %7180  ;;  %v4622_v31 = vmul.f32 0.7978845, %v4574_v9 }
 0xaa8   : > { %11037 = vst [vmem:[#allocation71_spill] sm:$0xff] %v10298_v23  ;;  %11038 = vst [vmem:[#allocation72_spill] sm:$0xff] %v10304_v10  ;;  %v4482_v22 = vmul.f32 %v4434_v62, %v10272_v37  ;;  %v4436_v41 = vmul.f32 0.044715, %v10282_v43  ;;  %v4438_v40 = vmul.f32 0.044715, %v10285_v20  ;;  %v10310_v28 = vmul.f32 %v4475_v50, %v10220_v39 }
 0xaa9   : > { %v10313_v27 = vmul.f32 %v4477_v0, %v10238_v59  ;;  %v4624_v30 = vmul.f32 0.7978845, %v4576_v57  ;;  %v4481_v48 = vmul.f32 %v4433_v2, %v10268_v53  ;;  %7194 = vtanh.f32 %v4618_v35  ;;  %v4250_v0 = vpop.f32.mrf.mxu0 }
 0xaaa   : > { %v4351_v49 = vmul.f32 0.5, %v9974_v63  ;;  %v4435_v61 = vmul.f32 0.044715, %v10295_v15  ;;  %v4440_v17 = vmul.f32 0.044715, %v10298_v23  ;;  %7196 = vtanh.f32 %v4620_v16  ;;  %v4343_v16 = vpop.f32.mrf.mxu1 }
 0xaab   : > { %v10320_v9 = vmul.f32 %v4479_v26, %v10256_v8  ;;  %v4353_v50 = vmul.f32 0.5, %v9977_v24  ;;  %v4437_v62 = vmul.f32 0.044715, %v10302_v5  ;;  %7198 = vtanh.f32 %v4622_v31 }
 0xaac   : > { %v4530_v57 = vmul.f32 %v4482_v22, %v10272_v37  ;;  %v4484_v2 = vmul.f32 %v4436_v41, %v10282_v43  ;;  %v4486_v63 = vmul.f32 %v4438_v40, %v10285_v20  ;;  %7200 = vtanh.f32 %v4624_v30 }
 0xaad   : > { %v7183_v35 = vpop.eup %7182  ;;  %v10328_v38 = vmul.f32 %v4481_v48, %v10268_v53  ;;  %v4547_v26 = vadd.f32 %v10068_v25, %v9985_v34  ;;  %v4551_v24 = vadd.f32 %v10093_v56, %v10019_v1  ;;  %v4483_v22 = vmul.f32 %v4435_v61, %v10295_v15 }
 0xaae   : > { %v7185_v52 = vpop.eup %7184  ;;  %v4683_v31 = vadd.f32 1.0, %v7183_v35  ;;  %v4488_v41 = vmul.f32 %v4440_v17, %v10298_v23  ;;  %v10337_v40 = vadd.f32 %v4250_v0, %v9941_v60  ;;  %v4485_v48 = vmul.f32 %v4437_v62, %v10302_v5 }
 0xaaf   : > { %11039 = vst [vmem:[#allocation73_spill] sm:$0xff] %v10328_v38  ;;  %v4687_v30 = vadd.f32 1.0, %v7185_v52  ;;  %v4595_v10 = vmul.f32 0.7978845, %v4547_v26  ;;  %v4599_v7 = vmul.f32 0.7978845, %v4551_v24  ;;  %v10340_v38 = vpop.eup %7186  ;;  %v4578_v25 = vadd.f32 %v4530_v57, %v10272_v37 }
 0xab0   : > { %v4532_v56 = vmul.f32 %v4484_v2, %v10282_v43  ;;  %v4534_v35 = vmul.f32 %v4486_v63, %v10285_v20  ;;  %v10346_v61 = vadd.f32 %v4343_v16, %v9944_v46  ;;  %v4731_v17 = vmul.f32 %v4683_v31, %v9994_v21 }
 0xab1   : > { %v4735_v60 = vmul.f32 %v4687_v30, %v4351_v49  ;;  %v4549_v52 = vadd.f32 %v10087_v18, %v10004_v51  ;;  %v4553_v62 = vadd.f32 %v10096_v3, %v10022_v42  ;;  %v10354_v26 = vmul.f32 %v4483_v22, %v10295_v15 }
 0xab2   : > { %v7189_v0 = vpop.eup %7188  ;;  %v4536_v57 = vmul.f32 %v4488_v41, %v10298_v23  ;;  %v4439_v2 = vmul.f32 0.044715, %v10337_v40  ;;  %7202 = vtanh.f32 %v4595_v10  ;;  %v4580_v24 = vadd.f32 %v4532_v56, %v10282_v43 }
 0xab3   : > { %v7191_v46 = vpop.eup %7190  ;;  %v4779_v63 = vpack.c.bf16 %v4735_v60, %v4731_v17  ;;  %v4685_v16 = vadd.f32 1.0, %v7189_v0  ;;  %7204 = vtanh.f32 %v4599_v7  ;;  %v4597_v21 = vmul.f32 0.7978845, %v4549_v52 }
 0xab4   : > { %v10358_v49 = vpop.eup %7192  ;;  %v4689_v18 = vadd.f32 1.0, %v7191_v46  ;;  %v4441_v3 = vmul.f32 0.044715, %v10346_v61  ;;  %v4601_v31 = vmul.f32 0.7978845, %v4553_v62  ;;  %v10363_v41 = vmul.f32 %v4485_v48, %v10302_v5 }
 0xab5   : > { %5097 = vmatprep.mubr.bf16.mxu0 %v4779_v63  ;;  %v4626_v22 = vmul.f32 0.7978845, %v4578_v25  ;;  %v4582_v10 = vadd.f32 %v4534_v35, %v10285_v20  ;;  %7206 = vtanh.f32 %v4597_v21  ;;  %v4733_v30 = vmul.f32 %v4685_v16, %v9997_v6  ;;  %v11042_v16 = vld [vmem:[#allocation53_spill] sm:$0xff] }
 0xab6   : > { %v4737_v7 = vmul.f32 %v4689_v18, %v4353_v50  ;;  %v11040_v17 = vpack.c.bf16 %v10131_v12, %v10111_v11  ;;  %v4487_v56 = vmul.f32 %v4439_v2, %v10337_v40  ;;  %7208 = vtanh.f32 %v4601_v31  ;;  %v10371_v60 = vpop.eup %7194  ;;  %v11043_v21 = vld [vmem:[#allocation37_spill] sm:$0xff]  ;;  %v11046_v31 = vld [vmem:[#allocation39_spill] sm:$0xff] }
 0xab7   : > { %v4584_v25 = vadd.f32 %v4536_v57, %v10298_v23  ;;  %v4355_v48 = vmul.f32 0.5, %v9985_v34  ;;  %v4359_v52 = vmul.f32 0.5, %v10019_v1  ;;  %v4555_v35 = vadd.f32 %v10126_v19, %v10060_v47  ;;  %v10378_v6 = vpop.eup %7196  ;;  %v11041_v19 = vld [vmem:[#allocation56_spill] sm:$0xff] }
 0xab8   : > { %5098 = vmatmul.mubr.bf16.vlgmr.msra.gmra.mxu0 %v11040_v17  ;;  %v4781_v50 = vpack.c.bf16 %v4737_v7, %v4733_v30  ;;  %v10380_v62 = vmul.f32 0.7978845, %v4580_v24  ;;  %v4489_v11 = vmul.f32 %v4441_v3, %v10346_v61  ;;  %v4559_v12 = vadd.f32 %v10197_v58, %v10119_v33  ;;  %v10385_v0 = vpop.eup %7198  ;;  %v11044_v24 = vld [vmem:[#allocation62_spill] sm:$0xff]  ;;  %v11045_v58 = vld [vmem:[#allocation28_spill] sm:$0xff] }
 0xab9   : > { %7210 = vtanh.f32 %v4626_v22  ;;  %v4630_v57 = vmul.f32 0.7978845, %v4582_v10  ;;  %v4694_v34 = vadd.f32 1.0, %v10194_v44  ;;  %v4603_v1 = vmul.f32 0.7978845, %v4555_v35  ;;  %v10388_v2 = vpop.eup %7200  ;;  %v11048_v10 = vld [vmem:[#allocation50_spill] sm:$0xff] }
 0xaba   : > { %5178 = vmatprep.mubr.bf16.mxu1 %v4781_v50  ;;  %v4690_v46 = vadd.f32 1.0, %v11041_v19  ;;  %v4607_v63 = vmul.f32 0.7978845, %v4559_v12  ;;  %v4557_v18 = vadd.f32 %v11043_v21, %v11042_v16  ;;  %v4561_v3 = vadd.f32 %v11044_v24, %v10136_v45  ;;  %v11049_v17 = vld [vmem:[#allocation30_spill] sm:$0xff]  ;;  %v11050_v24 = vld [vmem:[#allocation57_spill] sm:$0xff] }
 0xabb   : > { %v11047_v30 = vpack.c.bf16 %v11045_v58, %v11046_v31  ;;  %v10398_v22 = vmul.f32 0.7978845, %v4584_v25  ;;  %v10401_v44 = vmul.f32 %v4487_v56, %v10337_v40  ;;  %v4358_v7 = vmul.f32 0.5, %v11048_v10 }
 0xabc   : > { %7212 = vtanh.f32 %v4603_v1  ;;  %v4354_v35 = vmul.f32 0.5, %v11049_v17  ;;  %v4605_v50 = vmul.f32 0.7978845, %v4557_v18  ;;  %v4609_v12 = vmul.f32 0.7978845, %v4561_v3  ;;  %v11051_v1 = vld [vmem:[#allocation49_spill] sm:$0xff] }
 0xabd   : > { %5179 = vmatmul.mubr.bf16.vlgmr.msra.gmra.mxu1 %v11047_v30  ;;  %7214 = vtanh.f32 %v4607_v63  ;;  %v10406_v19 = vmul.f32 %v4489_v11, %v10346_v61  ;;  %v4742_v21 = vmul.f32 %v4694_v34, %v4358_v7  ;;  %v4692_v58 = vadd.f32 1.0, %v11050_v24  ;;  %v11052_v17 = vld [vmem:[#allocation34_spill] sm:$0xff]  ;;  %v11053_v34 = vld [vmem:[#allocation60_spill] sm:$0xff] }
 0xabe   : > { %7216 = vtanh.f32 %v4630_v57  ;;  %v4357_v25 = vmul.f32 0.5, %v10004_v51  ;;  %v4361_v56 = vmul.f32 0.5, %v10022_v42  ;;  %v4738_v31 = vmul.f32 %v4690_v46, %v4354_v35 }
 0xabf   : > { %7218 = vtanh.f32 %v4605_v50  ;;  %v7203_v30 = vpop.eup %7202  ;;  %v4356_v10 = vmul.f32 0.5, %v11051_v1  ;;  %v4360_v63 = vmul.f32 0.5, %v11052_v17  ;;  %v4563_v57 = vadd.f32 %v10230_v54, %v10145_v4  ;;  %v11054_v54 = vld [vmem:[#allocation65_spill] sm:$0xff] }
 0xac0   : > { %7220 = vtanh.f32 %v4609_v12  ;;  %v7205_v11 = vpop.eup %7204  ;;  %v4691_v18 = vadd.f32 1.0, %v7203_v30  ;;  %v4696_v3 = vadd.f32 1.0, %v11053_v34  ;;  %v4363_v7 = vmul.f32 0.5, %v10060_v47  ;;  %v11055_v47 = vld [vmem:[#allocation66_spill] sm:$0xff] }
 0xac1   : > { %v4567_v51 = vadd.f32 %v10244_v29, %v10176_v32  ;;  %v4695_v42 = vadd.f32 1.0, %v7205_v11  ;;  %v4782_v46 = vpack.c.bf16 %v4742_v21, %v4738_v31  ;;  %v4740_v35 = vmul.f32 %v4692_v58, %v4356_v10  ;;  %v11056_v31 = vld [vmem:[#allocation52_spill] sm:$0xff] }
 0xac2   : > { %v4611_v50 = vmul.f32 0.7978845, %v4563_v57  ;;  %v7207_v24 = vpop.eup %7206  ;;  %v4739_v1 = vmul.f32 %v4691_v18, %v4355_v48  ;;  %v4702_v12 = vadd.f32 1.0, %v10277_v55  ;;  %v4565_v43 = vadd.f32 %v11054_v54, %v10155_v13  ;;  %v11057_v10 = vld [vmem:[#allocation64_spill] sm:$0xff] }
 0xac3   : > { %v4615_v17 = vmul.f32 0.7978845, %v4567_v51  ;;  %v7209_v30 = vpop.eup %7208  ;;  %v4743_v23 = vmul.f32 %v4695_v42, %v4359_v52  ;;  %v4693_v34 = vadd.f32 1.0, %v7207_v24  ;;  %v4569_v37 = vadd.f32 %v11055_v47, %v10181_v36  ;;  %v11058_v52 = vld [vmem:[#allocation36_spill] sm:$0xff]  ;;  %v11059_v24 = vld [vmem:[#allocation67_spill] sm:$0xff] }
 0xac4   : > { %7222 = vtanh.f32 %v4611_v50  ;;  %v4697_v29 = vadd.f32 1.0, %v7209_v30  ;;  %v4744_v11 = vmul.f32 %v4696_v3, %v4360_v63  ;;  %v4613_v21 = vmul.f32 0.7978845, %v4565_v43 }
 0xac5   : > { %7224 = vtanh.f32 %v4615_v17  ;;  %v4783_v58 = vpack.c.bf16 %v4743_v23, %v4739_v1  ;;  %v4366_v48 = vmul.f32 0.5, %v11056_v31  ;;  %v4698_v55 = vadd.f32 1.0, %v11057_v10 }
 0xac6   : > { %v4617_v57 = vmul.f32 0.7978845, %v4569_v37  ;;  %v10426_v18 = vpop.eup %7210  ;;  %v4741_v51 = vmul.f32 %v4693_v34, %v4357_v25  ;;  %v4745_v54 = vmul.f32 %v4697_v29, %v4361_v56  ;;  %v4362_v42 = vmul.f32 0.5, %v11058_v52  ;;  %v11060_v34 = vld [vmem:[#allocation51_spill] sm:$0xff] }
 0xac7   : > { %7226 = vtanh.f32 %v4613_v21  ;;  %5105 = vmatprep.mubr.bf16.mxu0 %v4783_v58  ;;  %v4750_v50 = vmul.f32 %v4702_v12, %v4366_v48  ;;  %v4700_v30 = vadd.f32 1.0, %v11059_v24  ;;  %v4704_v63 = vadd.f32 1.0, %v10287_v14  ;;  %v11061_v29 = vld [vmem:[#allocation55_spill] sm:$0xff] }
 0xac8   : > { %7228 = vtanh.f32 %v4617_v57  ;;  %v4785_v23 = vpack.c.bf16 %v4745_v54, %v4741_v51  ;;  %5106 = vmatmul.mubr.bf16.gmra.mxu0 %v4782_v46  ;;  %v4784_v3 = vpack.c.bf16 %v4744_v11, %v4740_v35  ;;  %v4367_v37 = vmul.f32 0.5, %v10119_v33 }
 0xac9   : > { %v7213_v43 = vpop.eup %7212  ;;  %v4365_v1 = vmul.f32 0.5, %v11042_v16  ;;  %v4746_v17 = vmul.f32 %v4698_v55, %v4362_v42  ;;  %v4364_v47 = vmul.f32 0.5, %v11060_v34  ;;  %v4368_v12 = vmul.f32 0.5, %v11061_v29 }
 0xaca   : > { %v7215_v25 = vpop.eup %7214  ;;  %v4699_v56 = vadd.f32 1.0, %v7213_v43  ;;  %5186 = vmatprep.mubr.bf16.mxu1 %v4785_v23  ;;  %v4369_v58 = vmul.f32 0.5, %v10136_v45  ;;  %v4371_v46 = vmul.f32 0.5, %v10145_v4  ;;  %v4571_v33 = vadd.f32 %v10310_v28, %v10220_v39  ;;  %v11062_v28 = vld [vmem:[#allocation73_spill] sm:$0xff] }
 0xacb   : > { %v10435_v21 = vpop.eup %7216  ;;  %v4703_v14 = vadd.f32 1.0, %v7215_v25  ;;  %5187 = vmatmul.mubr.bf16.gmra.mxu1 %v4784_v3  ;;  %v4786_v16 = vpack.c.bf16 %v4750_v50, %v4746_v17  ;;  %v4748_v11 = vmul.f32 %v4700_v30, %v4364_v47  ;;  %v4752_v31 = vmul.f32 %v4704_v63, %v4368_v12  ;;  %v11064_v25 = vld [vmem:[#allocation70_spill] sm:$0xff]  ;;  %v11065_v12 = vld [vmem:[#allocation72_spill] sm:$0xff] }
 0xacc   : > { %v7219_v35 = vpop.eup %7218  ;;  %v4575_v48 = vadd.f32 %v10320_v9, %v10256_v8  ;;  %v4747_v55 = vmul.f32 %v4699_v56, %v4363_v7  ;;  %v4619_v54 = vmul.f32 0.7978845, %v4571_v33  ;;  %v4573_v4 = vadd.f32 %v10313_v27, %v10238_v59 }
 0xacd   : > { %v7221_v10 = vpop.eup %7220  ;;  %v4751_v57 = vmul.f32 %v4703_v14, %v4367_v37  ;;  %v4701_v51 = vadd.f32 1.0, %v7219_v35  ;;  %v4577_v42 = vadd.f32 %v11062_v28, %v10268_v53  ;;  %v4710_v30 = vadd.f32 1.0, %v10340_v38  ;;  %v11063_v37 = vld [vmem:[#allocation54_spill] sm:$0xff] }
 0xace   : > { %v4705_v52 = vadd.f32 1.0, %v7221_v10  ;;  %v4623_v45 = vmul.f32 0.7978845, %v4575_v48  ;;  %7230 = vtanh.f32 %v4619_v54  ;;  %v4621_v9 = vmul.f32 0.7978845, %v4573_v4  ;;  %v11067_v48 = vld [vmem:[#allocation38_spill] sm:$0xff] }
 0xacf   : > { %v4787_v24 = vpack.c.bf16 %v4751_v57, %v4747_v55  ;;  %v4749_v50 = vmul.f32 %v4701_v51, %v4365_v1  ;;  %v4625_v7 = vmul.f32 0.7978845, %v4577_v42  ;;  %v4375_v23 = vmul.f32 0.5, %v10176_v32  ;;  %v11066_v32 = vld [vmem:[#allocation33_spill] sm:$0xff]  ;;  %v11068_v51 = vld [vmem:[#allocation35_spill] sm:$0xff] }
 0xad0   : > { %v4753_v63 = vmul.f32 %v4705_v52, %v4369_v58  ;;  %7232 = vtanh.f32 %v4623_v45  ;;  %v4373_v3 = vmul.f32 0.5, %v10155_v13  ;;  %v4374_v27 = vmul.f32 0.5, %v11063_v37 }
 0xad1   : > { %v7223_v43 = vpop.eup %7222  ;;  %5113 = vmatprep.mubr.bf16.mxu0 %v4787_v24  ;;  %v4706_v56 = vadd.f32 1.0, %v11064_v25  ;;  %v4712_v38 = vadd.f32 1.0, %v10358_v49  ;;  %7234 = vtanh.f32 %v4621_v9  ;;  %v4788_v47 = vpack.c.bf16 %v4752_v31, %v4748_v11 }
 0xad2   : > { %v7225_v17 = vpop.eup %7224  ;;  %v4789_v34 = vpack.c.bf16 %v4753_v63, %v4749_v50  ;;  %5114 = vmatmul.mubr.bf16.gmra.mxu0 %v4786_v16  ;;  %v4707_v1 = vadd.f32 1.0, %v7223_v43  ;;  %v4708_v14 = vadd.f32 1.0, %v11065_v12  ;;  %7236 = vtanh.f32 %v4625_v7 }
 0xad3   : > { %v4711_v29 = vadd.f32 1.0, %v7225_v17  ;;  %v4377_v13 = vmul.f32 0.5, %v10181_v36  ;;  %v4370_v33 = vmul.f32 0.5, %v11066_v32  ;;  %v4758_v35 = vmul.f32 %v4710_v30, %v4374_v27 }
 0xad4   : > { %v7227_v58 = vpop.eup %7226  ;;  %5194 = vmatprep.mubr.bf16.mxu1 %v4789_v34  ;;  %v4376_v10 = vmul.f32 0.5, %v11067_v48  ;;  %v4755_v16 = vmul.f32 %v4707_v1, %v4371_v46  ;;  %v4372_v11 = vmul.f32 0.5, %v11068_v51  ;;  %v4579_v45 = vadd.f32 %v10354_v26, %v10295_v15  ;;  %v11070_v34 = vld [vmem:[#allocation58_spill] sm:$0xff] }
 0xad5   : > { %v7229_v55 = vpop.eup %7228  ;;  %5195 = vmatmul.mubr.bf16.gmra.mxu1 %v4788_v47  ;;  %v4759_v57 = vmul.f32 %v4711_v29, %v4375_v23  ;;  %v4709_v49 = vadd.f32 1.0, %v7227_v58  ;;  %v4754_v54 = vmul.f32 %v4706_v56, %v4370_v33  ;;  %7238 = vtanh.f32 %v10380_v62  ;;  %v11071_v47 = vld [vmem:[#allocation63_spill] sm:$0xff] }
 0xad6   : > { %v4713_v31 = vadd.f32 1.0, %v7229_v55  ;;  %v4760_v52 = vmul.f32 %v4712_v38, %v4376_v10  ;;  %v4756_v4 = vmul.f32 %v4708_v14, %v4372_v11  ;;  %v4583_v28 = vadd.f32 %v10401_v44, %v10337_v40 }
 0xad7   : > { %v4791_v36 = vpack.c.bf16 %v4759_v57, %v4755_v16  ;;  %v4757_v42 = vmul.f32 %v4709_v49, %v4373_v3  ;;  %v4790_v46 = vpack.c.bf16 %v4758_v35, %v4754_v54  ;;  %v4627_v50 = vmul.f32 0.7978845, %v4579_v45  ;;  %v11072_v35 = vld [vmem:[#allocation59_spill] sm:$0xff] }
 0xad8   : > { %v4761_v24 = vmul.f32 %v4713_v31, %v4377_v13  ;;  %7240 = vtanh.f32 %v10398_v22  ;;  %v4631_v30 = vmul.f32 0.7978845, %v4583_v28  ;;  %v4581_v63 = vadd.f32 %v10363_v41, %v10302_v5  ;;  %v11069_v41 = vld [vmem:[#allocation61_spill] sm:$0xff] }
 0xad9   : > { %5121 = vmatprep.mubr.bf16.mxu0 %v4791_v36  ;;  %v4585_v26 = vadd.f32 %v10406_v19, %v10346_v61  ;;  %v4792_v9 = vpack.c.bf16 %v4760_v52, %v4756_v4  ;;  %7242 = vtanh.f32 %v4627_v50  ;;  %v4718_v44 = vadd.f32 1.0, %v10385_v0  ;;  %v11073_v50 = vld [vmem:[#allocation68_spill] sm:$0xff] }
 0xada   : > { %v4793_v62 = vpack.c.bf16 %v4761_v24, %v4757_v42  ;;  %5122 = vmatmul.mubr.bf16.gmra.mxu0 %v4790_v46  ;;  %7244 = vtanh.f32 %v4631_v30  ;;  %v4629_v7 = vmul.f32 0.7978845, %v4581_v63  ;;  %v4379_v22 = vmul.f32 0.5, %v10220_v39 }
 0xadb   : > { %v4633_v43 = vmul.f32 0.7978845, %v4585_v26  ;;  %v7231_v23 = vpop.eup %7230  ;;  %v4382_v27 = vmul.f32 0.5, %v11069_v41  ;;  %v4714_v19 = vadd.f32 1.0, %v10371_v60  ;;  %v4383_v25 = vmul.f32 0.5, %v10256_v8 }
 0xadc   : > { %5202 = vmatprep.mubr.bf16.mxu1 %v4793_v62  ;;  %v4715_v37 = vadd.f32 1.0, %v7231_v23  ;;  %7246 = vtanh.f32 %v4629_v7  ;;  %v4720_v0 = vadd.f32 1.0, %v10388_v2  ;;  %v4378_v1 = vmul.f32 0.5, %v11070_v34 }
 0xadd   : > { %v7233_v3 = vpop.eup %7232  ;;  %5203 = vmatmul.mubr.bf16.gmra.mxu1 %v4792_v9  ;;  %7248 = vtanh.f32 %v4633_v43  ;;  %v4766_v38 = vmul.f32 %v4718_v44, %v4382_v27  ;;  %v4384_v39 = vmul.f32 0.5, %v11071_v47  ;;  %v4716_v13 = vadd.f32 1.0, %v10378_v6 }
 0xade   : > { %v4719_v56 = vadd.f32 1.0, %v7233_v3  ;;  %v7235_v17 = vpop.eup %7234  ;;  %v4763_v12 = vmul.f32 %v4715_v37, %v4379_v22  ;;  %v4381_v60 = vmul.f32 0.5, %v10238_v59  ;;  %v4385_v8 = vmul.f32 0.5, %v10268_v53  ;;  %v11075_v22 = vld [vmem:[#allocation69_spill] sm:$0xff] }
 0xadf   : > { %v7237_v29 = vpop.eup %7236  ;;  %v4717_v58 = vadd.f32 1.0, %v7235_v17  ;;  %v4762_v33 = vmul.f32 %v4714_v19, %v4378_v1  ;;  %v4380_v48 = vmul.f32 0.5, %v11072_v35  ;;  %v4768_v10 = vmul.f32 %v4720_v0, %v4384_v39 }
 0xae0   : > { %v4767_v14 = vmul.f32 %v4719_v56, %v4383_v25  ;;  %v4721_v32 = vadd.f32 1.0, %v7237_v29  ;;  %v4726_v59 = vadd.f32 1.0, %v10435_v21  ;;  %v4390_v45 = vmul.f32 0.5, %v10285_v20  ;;  %v11074_v21 = vld [vmem:[#allocation71_spill] sm:$0xff] }
 0xae1   : > { %v4765_v55 = vmul.f32 %v4717_v58, %v4381_v60  ;;  %v4794_v57 = vpack.c.bf16 %v4766_v38, %v4762_v33  ;;  %v4764_v51 = vmul.f32 %v4716_v13, %v4380_v48  ;;  %v4722_v36 = vadd.f32 1.0, %v10426_v18  ;;  %v11078_v48 = vld [vmem:[#allocation45_spill] sm:$0xff] }
 0xae2   : > { %v4795_v2 = vpack.c.bf16 %v4767_v14, %v4763_v12  ;;  %v4769_v16 = vmul.f32 %v4721_v32, %v4385_v8  ;;  %v7239_v49 = vpop.eup %7238  ;;  %v4387_v4 = vmul.f32 0.5, %v10295_v15  ;;  %v4391_v28 = vmul.f32 0.5, %v10337_v40  ;;  %v11077_v32 = vld [vmem:[#allocation40_spill] sm:$0xff] }
 0xae3   : > { %v4796_v6 = vpack.c.bf16 %v4768_v10, %v4764_v51  ;;  %v4386_v30 = vmul.f32 0.5, %v11073_v50  ;;  %v4774_v63 = vmul.f32 %v4726_v59, %v4390_v45  ;;  %v4392_v26 = vmul.f32 0.5, %v11074_v21 }
 0xae4   : > { %5129 = vmatprep.mubr.bf16.mxu0 %v4795_v2  ;;  %v4797_v11 = vpack.c.bf16 %v4769_v16, %v4765_v55  ;;  %v4724_v43 = vadd.f32 1.0, %v7239_v49  ;;  %v4389_v20 = vmul.f32 0.5, %v10302_v5  ;;  %v4393_v18 = vmul.f32 0.5, %v10346_v61  ;;  %v10495_v61 = vld [vmem:[%s821_s4] ss:$0 sm:$0xff] }
 0xae5   : > { %5130 = vmatmul.mubr.bf16.gmra.mxu0 %v4794_v57  ;;  %v7241_v31 = vpop.eup %7240  ;;  %v4770_v23 = vmul.f32 %v4722_v36, %v4386_v30  ;;  %v4388_v3 = vmul.f32 0.5, %v11075_v22 }
 0xae6   : > { %v7243_v54 = vpop.eup %7242  ;;  %5210 = vmatprep.mubr.bf16.mxu1 %v4797_v11  ;;  %v4728_v24 = vadd.f32 1.0, %v7241_v31 }
 0xae7   : > { %v7245_v53 = vpop.eup %7244  ;;  %5211 = vmatmul.mubr.bf16.gmra.mxu1 %v4796_v6  ;;  %v4723_v52 = vadd.f32 1.0, %v7243_v54  ;;  %v4798_v19 = vpack.c.bf16 %v4774_v63, %v4770_v23  ;;  %v4772_v25 = vmul.f32 %v4724_v43, %v4388_v3  ;;  %v11081_v3 = vld [vmem:[#allocation42_spill] sm:$0xff] }
 0xae8   : > { %v4727_v42 = vadd.f32 1.0, %v7245_v53  ;;  %v4776_v37 = vmul.f32 %v4728_v24, %v4392_v26  ;;  %v11080_v26 = vld [vmem:[#allocation32_spill] sm:$0xff] }
 0xae9   : > { %v7247_v46 = vpop.eup %7246  ;;  %v4771_v9 = vmul.f32 %v4723_v52, %v4387_v4 }
 0xaea   : > { %v7249_v62 = vpop.eup %7248  ;;  %v4775_v44 = vmul.f32 %v4727_v42, %v4391_v28  ;;  %v4725_v7 = vadd.f32 1.0, %v7247_v46  ;;  %v4800_v0 = vpack.c.bf16 %v4776_v37, %v4772_v25  ;;  %v11079_v28 = vld [vmem:[#allocation41_spill] sm:$0xff] }
 0xaeb   : > { %v4729_v15 = vadd.f32 1.0, %v7249_v62 }
 0xaec   : > { %v4799_v40 = vpack.c.bf16 %v4775_v44, %v4771_v9  ;;  %v4773_v41 = vmul.f32 %v4725_v7, %v4389_v20 }
 0xaed   : > { %v4777_v27 = vmul.f32 %v4729_v15, %v4393_v18 }
 0xaee   : > { %5137 = vmatprep.mubr.bf16.mxu0 %v4799_v40 }
 0xaef   : > { %v4801_v56 = vpack.c.bf16 %v4777_v27, %v4773_v41  ;;  %5138 = vmatmul.mubr.bf16.gmra.mxu0 %v4798_v19 }
 0xaf1   : > { %5218 = vmatprep.mubr.bf16.mxu1 %v4801_v56 }
 0xaf2   : > { %5219 = vmatmul.mubr.bf16.gmra.mxu1 %v4800_v0 }
 0xb78   : > { %v6203_v5 = vpop.f32.mrf.mxu0 }
 0xb7a   : > { %v6204_v17 = vpop.f32.mrf.mxu0 }
 0xb7b   : > { %v6205_v34 = vadd.f32 %v6204_v17, %v6203_v5 }
 0xb7c   : > { %v6206_v1 = vpop.f32.mrf.mxu0 }
 0xb7d   : > { %v6255_v38 = vpop.f32.mrf.mxu1  ;;  %v5100_v47 = vadd.f32 %v6205_v34, %v10495_v61  ;;  %v11082_v34 = vld [vmem:[#allocation44_spill] sm:$0xff] }
 0xb7e   : > { %v6207_v39 = vpop.f32.mrf.mxu0 }
 0xb7f   : > { %v6256_v29 = vpop.f32.mrf.mxu1  ;;  %v6208_v12 = vadd.f32 %v6207_v39, %v6206_v1 }
 0xb80   : > { %v6257_v14 = vadd.f32 %v6256_v29, %v6255_v38 }
 0xb81   : > { %v6258_v58 = vpop.f32.mrf.mxu1  ;;  %v5103_v60 = vadd.f32 %v6208_v12, %v10495_v61 }
 0xb82   : > { %v5181_v13 = vadd.f32 %v6257_v14, %v5100_v47 }
 0xb83   : > { %v6259_v8 = vpop.f32.mrf.mxu1 }
 0xb84   : > { %v10500_v33 = vadd.f32 %v5181_v13, %v11077_v32  ;;  %v6260_v2 = vadd.f32 %v6259_v8, %v6258_v58  ;;  %v11083_v13 = vld [vmem:[#allocation43_spill] sm:$0xff] }
 0xb86   : > { %5239 = vst [vmem:[#allocation2 + $0x30] sm:$0xff] %v10500_v33  ;;  %v5184_v35 = vadd.f32 %v6260_v2, %v5103_v60 }
 0xb88   : > { %v10504_v10 = vadd.f32 %v5184_v35, %v11078_v48  ;;  %v6209_v55 = vpop.f32.mrf.mxu0  ;;  %v11084_v48 = vld [vmem:[#allocation46_spill] sm:$0xff] }
 0xb8a   : > { %5240 = vst [vmem:[#allocation2] sm:$0xff] %v10504_v10  ;;  %v6210_v16 = vpop.f32.mrf.mxu0 }
 0xb8b   : > { %v6261_v57 = vpop.f32.mrf.mxu1  ;;  %v6211_v49 = vadd.f32 %v6210_v16, %v6209_v55 }
 0xb8c   : > { %v6212_v51 = vpop.f32.mrf.mxu0 }
 0xb8d   : > { %v5108_v11 = vadd.f32 %v6211_v49, %v10495_v61  ;;  %v6262_v31 = vpop.f32.mrf.mxu1 }
 0xb8e   : > { %v6263_v6 = vadd.f32 %v6262_v31, %v6261_v57  ;;  %v6213_v59 = vpop.f32.mrf.mxu0 }
 0xb8f   : > { %v6264_v54 = vpop.f32.mrf.mxu1  ;;  %v6214_v53 = vadd.f32 %v6213_v59, %v6212_v51 }
 0xb90   : > { %v5189_v52 = vadd.f32 %v6263_v6, %v5108_v11 }
 0xb91   : > { %v5111_v45 = vadd.f32 %v6214_v53, %v10495_v61  ;;  %v6265_v36 = vpop.f32.mrf.mxu1 }
 0xb92   : > { %v6215_v4 = vpop.f32.mrf.mxu0  ;;  %v10510_v42 = vadd.f32 %v5189_v52, %v11079_v28  ;;  %v6266_v24 = vadd.f32 %v6265_v36, %v6264_v54  ;;  %v11085_v36 = vld [vmem:[#allocation29_spill] sm:$0xff] }
 0xb94   : > { %v6216_v46 = vpop.f32.mrf.mxu0  ;;  %5241 = vst [vmem:[#allocation2 + $0x58] sm:$0xff] %v10510_v42  ;;  %v5192_v50 = vadd.f32 %v6266_v24, %v5111_v45 }
 0xb95   : > { %v6267_v30 = vpop.f32.mrf.mxu1  ;;  %v6217_v63 = vadd.f32 %v6216_v46, %v6215_v4 }
 0xb96   : > { %v6218_v21 = vpop.f32.mrf.mxu0  ;;  %v10514_v62 = vadd.f32 %v5192_v50, %v11080_v26 }
 0xb97   : > { %v5116_v9 = vadd.f32 %v6217_v63, %v10495_v61  ;;  %v6268_v44 = vpop.f32.mrf.mxu1 }
 0xb98   : > { %v6269_v7 = vadd.f32 %v6268_v44, %v6267_v30  ;;  %v6219_v43 = vpop.f32.mrf.mxu0  ;;  %5242 = vst [vmem:[#allocation2 + $0x18] sm:$0xff] %v10514_v62  ;;  %v11086_v30 = vld [vmem:[#allocation48_spill] sm:$0xff] }
 0xb99   : > { %v6270_v20 = vpop.f32.mrf.mxu1  ;;  %v6220_v18 = vadd.f32 %v6219_v43, %v6218_v21 }
 0xb9a   : > { %v5197_v15 = vadd.f32 %v6269_v7, %v5116_v9  ;;  %v6221_v23 = vpop.f32.mrf.mxu0 }
 0xb9b   : > { %v5119_v40 = vadd.f32 %v6220_v18, %v10495_v61  ;;  %v6271_v22 = vpop.f32.mrf.mxu1 }
 0xb9c   : > { %v10520_v37 = vadd.f32 %v5197_v15, %v11081_v3  ;;  %v6272_v41 = vadd.f32 %v6271_v22, %v6270_v20  ;;  %v6222_v27 = vpop.f32.mrf.mxu0  ;;  %v11087_v3 = vld [vmem:[#allocation47_spill] sm:$0xff] }
 0xb9d   : > { %v6273_v19 = vpop.f32.mrf.mxu1  ;;  %v6223_v25 = vadd.f32 %v6222_v27, %v6221_v23 }
 0xb9e   : > { %5243 = vst [vmem:[#allocation2 + $0x50] sm:$0xff] %v10520_v37  ;;  %v5200_v56 = vadd.f32 %v6272_v41, %v5119_v40  ;;  %v6224_v0 = vpop.f32.mrf.mxu0 }
 0xb9f   : > { %v5124_v5 = vadd.f32 %v6223_v25, %v10495_v61  ;;  %v6274_v17 = vpop.f32.mrf.mxu1  ;;  %v11088_v25 = vld [vmem:[#allocation31_spill] sm:$0xff] }
 0xba0   : > { %v10525_v1 = vadd.f32 %v5200_v56, %v11082_v34  ;;  %v6275_v38 = vadd.f32 %v6274_v17, %v6273_v19  ;;  %v6225_v47 = vpop.f32.mrf.mxu0 }
 0xba1   : > { %v6276_v39 = vpop.f32.mrf.mxu1  ;;  %v6226_v29 = vadd.f32 %v6225_v47, %v6224_v0 }
 0xba2   : > { %5244 = vst [vmem:[#allocation2 + $0x20] sm:$0xff] %v10525_v1  ;;  %v5205_v12 = vadd.f32 %v6275_v38, %v5124_v5 }
 0xba3   : > { %v5127_v14 = vadd.f32 %v6226_v29, %v10495_v61  ;;  %v6277_v58 = vpop.f32.mrf.mxu1 }
 0xba4   : > { %v10530_v60 = vadd.f32 %v5205_v12, %v11083_v13  ;;  %v6278_v8 = vadd.f32 %v6277_v58, %v6276_v39 }
 0xba5   : > { %v6227_v32 = vpop.f32.mrf.mxu0 }
 0xba6   : > { %5245 = vst [vmem:[#allocation2 + $0x8] sm:$0xff] %v10530_v60  ;;  %v5208_v2 = vadd.f32 %v6278_v8, %v5127_v14 }
 0xba7   : > { %v6228_v35 = vpop.f32.mrf.mxu0  ;;  %v6279_v16 = vpop.f32.mrf.mxu1 }
 0xba8   : > { %v10534_v55 = vadd.f32 %v5208_v2, %v11084_v48  ;;  %v6229_v57 = vadd.f32 %v6228_v35, %v6227_v32 }
 0xba9   : > { %v6230_v49 = vpop.f32.mrf.mxu0  ;;  %v6280_v11 = vpop.f32.mrf.mxu1 }
 0xbaa   : > { %5246 = vst [vmem:[#allocation2 + $0x38] sm:$0xff] %v10534_v55  ;;  %v5132_v51 = vadd.f32 %v6229_v57, %v10495_v61  ;;  %v6281_v31 = vadd.f32 %v6280_v11, %v6279_v16 }
 0xbab   : > { %v6231_v6 = vpop.f32.mrf.mxu0  ;;  %v6282_v59 = vpop.f32.mrf.mxu1 }
 0xbac   : > { %v6232_v54 = vadd.f32 %v6231_v6, %v6230_v49  ;;  %v5213_v53 = vadd.f32 %v6281_v31, %v5132_v51 }
 0xbad   : > { %v6283_v45 = vpop.f32.mrf.mxu1 }
 0xbae   : > { %v5135_v52 = vadd.f32 %v6232_v54, %v10495_v61  ;;  %v10540_v4 = vadd.f32 %v5213_v53, %v11085_v36  ;;  %v6284_v28 = vadd.f32 %v6283_v45, %v6282_v59 }
 0xbaf   : > { %v6233_v24 = vpop.f32.mrf.mxu0 }
 0xbb0   : > { %5247 = vst [vmem:[#allocation2 + $0x28] sm:$0xff] %v10540_v4  ;;  %v5216_v46 = vadd.f32 %v6284_v28, %v5135_v52 }
 0xbb1   : > { %v6234_v50 = vpop.f32.mrf.mxu0 }
 0xbb2   : > { %v10544_v63 = vadd.f32 %v5216_v46, %v11086_v30  ;;  %v6285_v21 = vpop.f32.mrf.mxu1  ;;  %v6235_v26 = vadd.f32 %v6234_v50, %v6233_v24 }
 0xbb3   : > { %v6236_v9 = vpop.f32.mrf.mxu0 }
 0xbb4   : > { %5248 = vst [vmem:[#allocation2 + $0x48] sm:$0xff] %v10544_v63  ;;  %v5140_v44 = vadd.f32 %v6235_v26, %v10495_v61  ;;  %v6286_v7 = vpop.f32.mrf.mxu1 }
 0xbb5   : > { %v6287_v43 = vadd.f32 %v6286_v7, %v6285_v21  ;;  %v6237_v20 = vpop.f32.mrf.mxu0 }
 0xbb6   : > { %v6288_v18 = vpop.f32.mrf.mxu1  ;;  %v6238_v15 = vadd.f32 %v6237_v20, %v6236_v9 }
 0xbb7   : > { %v5221_v23 = vadd.f32 %v6287_v43, %v5140_v44 }
 0xbb8   : > { %v5143_v40 = vadd.f32 %v6238_v15, %v10495_v61  ;;  %v6289_v22 = vpop.f32.mrf.mxu1 }
 0xbb9   : > { %v10550_v41 = vadd.f32 %v5221_v23, %v11087_v3  ;;  %v6290_v27 = vadd.f32 %v6289_v22, %v6288_v18 }
 0xbbb   : > { %5249 = vst [vmem:[#allocation2 + $0x10] sm:$0xff] %v10550_v41  ;;  %v5224_v19 = vadd.f32 %v6290_v27, %v5143_v40  ;;  %5254 = sbr.rel (%p5994_p10) target bundleno = 3363 (0xd23), region = 124 }
 0xbbd   : > { %v10554_v56 = vadd.f32 %v5224_v19, %v11088_v25 }
 0xbbf   : > { %5250 = vst [vmem:[#allocation2 + $0x40] sm:$0xff] %v10554_v56 }
 0xbc0   : > { %5257 = vadd.xlane.f32.xlu0 %v10500_v33  ;;  %5261 = vadd.xlane.f32.xlu1 %v10510_v42 }
 0xbc4   : > { %5259 = vadd.xlane.f32.xlu0 %v10504_v10  ;;  %5263 = vadd.xlane.f32.xlu1 %v10514_v62 }
 0xbc8   : > { %5265 = vadd.xlane.f32.xlu0 %v10520_v37  ;;  %5267 = vadd.xlane.f32.xlu1 %v10525_v1 }
 0xbcc   : > { %5269 = vadd.xlane.f32.xlu0 %v10530_v60  ;;  %5271 = vadd.xlane.f32.xlu1 %v10534_v55 }
 0xbd0   : > { %5273 = vadd.xlane.f32.xlu0 %v10540_v4  ;;  %5275 = vadd.xlane.f32.xlu1 %v10544_v63 }
 0xbd4   : > { %5277 = vadd.xlane.f32.xlu0 %v10550_v41  ;;  %5279 = vadd.xlane.f32.xlu1 %v10554_v56 }
 0xc49   : > { %v5258_v61 = vpop.xlane.xlu0 %5257  ;;  %v5262_v0 = vpop.xlane.xlu1 %5261 }
 0xc4a   : > { %v5281_v5 = vmul.f32 0.0078125, %v5258_v61  ;;  %v5283_v17 = vmul.f32 0.0078125, %v5262_v0 }
 0xc4c   : > { %v10571_v34 = vsub.f32 %v10500_v33, %v5281_v5  ;;  %v10574_v38 = vsub.f32 %v10510_v42, %v5283_v17 }
 0xc4d   : > { %v5260_v47 = vpop.xlane.xlu0 %5259  ;;  %v5264_v39 = vpop.xlane.xlu1 %5263 }
 0xc4e   : > { %v5282_v29 = vmul.f32 0.0078125, %v5260_v47  ;;  %v5305_v12 = vmul.f32 %v10571_v34, %v10571_v34  ;;  %v5284_v14 = vmul.f32 0.0078125, %v5264_v39  ;;  %v5307_v33 = vmul.f32 %v10574_v38, %v10574_v38 }
 0xc50   : > { %v10579_v58 = vsub.f32 %v10504_v10, %v5282_v29  ;;  %5317 = vadd.xlane.f32.xlu0 %v5305_v12  ;;  %v10582_v13 = vsub.f32 %v10514_v62, %v5284_v14 }
 0xc51   : > { %v5266_v8 = vpop.xlane.xlu0 %5265  ;;  %v5268_v42 = vpop.xlane.xlu1 %5267 }
 0xc52   : > { %v5285_v32 = vmul.f32 0.0078125, %v5266_v8  ;;  %v5306_v2 = vmul.f32 %v10579_v58, %v10579_v58  ;;  %v5286_v35 = vmul.f32 0.0078125, %v5268_v42  ;;  %v5308_v62 = vmul.f32 %v10582_v13, %v10582_v13 }
 0xc54   : > { %v10589_v48 = vsub.f32 %v10520_v37, %v5285_v32  ;;  %5321 = vadd.xlane.f32.xlu0 %v5307_v33  ;;  %5319 = vadd.xlane.f32.xlu1 %v5306_v2  ;;  %v10592_v10 = vsub.f32 %v10525_v1, %v5286_v35 }
 0xc55   : > { %v5270_v16 = vpop.xlane.xlu0 %5269  ;;  %v5272_v57 = vpop.xlane.xlu1 %5271 }
 0xc56   : > { %v5287_v49 = vmul.f32 0.0078125, %v5270_v16  ;;  %v5309_v51 = vmul.f32 %v10589_v48, %v10589_v48  ;;  %v5288_v11 = vmul.f32 0.0078125, %v5272_v57  ;;  %v5310_v1 = vmul.f32 %v10592_v10, %v10592_v10 }
 0xc58   : > { %v10599_v31 = vsub.f32 %v10530_v60, %v5287_v49  ;;  %5323 = vadd.xlane.f32.xlu1 %v5308_v62  ;;  %5325 = vadd.xlane.f32.xlu0 %v5309_v51  ;;  %v10602_v37 = vsub.f32 %v10534_v55, %v5288_v11 }
 0xc59   : > { %v5274_v6 = vpop.xlane.xlu0 %5273  ;;  %v5276_v59 = vpop.xlane.xlu1 %5275 }
 0xc5a   : > { %v5289_v54 = vmul.f32 0.0078125, %v5274_v6  ;;  %v5311_v53 = vmul.f32 %v10599_v31, %v10599_v31  ;;  %v5290_v52 = vmul.f32 0.0078125, %v5276_v59  ;;  %v5312_v55 = vmul.f32 %v10602_v37, %v10602_v37 }
 0xc5c   : > { %v10609_v45 = vsub.f32 %v10540_v4, %v5289_v54  ;;  %5327 = vadd.xlane.f32.xlu1 %v5310_v1  ;;  %5329 = vadd.xlane.f32.xlu0 %v5311_v53  ;;  %v10612_v60 = vsub.f32 %v10544_v63, %v5290_v52 }
 0xc5d   : > { %v5278_v36 = vpop.xlane.xlu0 %5277  ;;  %v5280_v28 = vpop.xlane.xlu1 %5279 }
 0xc5e   : > { %v5291_v24 = vmul.f32 0.0078125, %v5278_v36  ;;  %v5313_v46 = vmul.f32 %v10609_v45, %v10609_v45  ;;  %v5292_v50 = vmul.f32 0.0078125, %v5280_v28  ;;  %v5314_v63 = vmul.f32 %v10612_v60, %v10612_v60 }
 0xc60   : > { %v10619_v30 = vsub.f32 %v10550_v41, %v5291_v24  ;;  %5331 = vadd.xlane.f32.xlu1 %v5312_v55  ;;  %5333 = vadd.xlane.f32.xlu0 %v5313_v46  ;;  %v10622_v4 = vsub.f32 %v10554_v56, %v5292_v50 }
 0xc62   : > { %v5315_v21 = vmul.f32 %v10619_v30, %v10619_v30  ;;  %v5316_v26 = vmul.f32 %v10622_v4, %v10622_v4 }
 0xc64   : > { %5335 = vadd.xlane.f32.xlu1 %v5314_v63  ;;  %5337 = vadd.xlane.f32.xlu0 %v5315_v21 }
 0xc68   : > { %5339 = vadd.xlane.f32.xlu1 %v5316_v26 }
 0xcd9   : > { %v5318_v9 = vpop.xlane.xlu0 %5317 }
 0xcda   : > { %v5341_v44 = vmul.f32 0.0078125, %v5318_v9 }
 0xcdc   : > { %v5353_v7 = vadd.f32 1e-05, %v5341_v44 }
 0xcdd   : > { %v5320_v43 = vpop.xlane.xlu1 %5319  ;;  %v5322_v20 = vpop.xlane.xlu0 %5321 }
 0xcde   : > { %7262 = vrsqrt.f32 %v5353_v7  ;;  %v5342_v18 = vmul.f32 0.0078125, %v5320_v43  ;;  %v5343_v15 = vmul.f32 0.0078125, %v5322_v20  ;;  %vm5367_vm11 = vcmp.eq.f32.partialorder %v5353_v7, inf }
 0xcdf   : > { %v5370_v42 = vand.u32 2147483648, %v5353_v7  ;;  %vm5369_vm12 = vcmp.eq.f32.partialorder %v5353_v7, 0.0 }
 0xce0   : > { %v5354_v23 = vadd.f32 1e-05, %v5342_v18  ;;  %v10630_v40 = vadd.f32 1e-05, %v5343_v15 }
 0xce1   : > { %v5324_v22 = vpop.xlane.xlu1 %5323  ;;  %v5326_v3 = vpop.xlane.xlu0 %5325 }
 0xce2   : > { %v5344_v41 = vmul.f32 0.0078125, %v5324_v22  ;;  %v5345_v27 = vmul.f32 0.0078125, %v5326_v3  ;;  %7264 = vrsqrt.f32 %v5354_v23  ;;  %vm5374_vm13 = vcmp.eq.f32.partialorder %v5354_v23, inf }
 0xce3   : > { %7266 = vrsqrt.f32 %v10630_v40  ;;  %vm5376_vm14 = vcmp.eq.f32.partialorder %v5354_v23, 0.0  ;;  %v5377_v53 = vand.u32 2147483648, %v5354_v23  ;;  %vm5381_vm15 = vcmp.eq.f32.partialorder %v10630_v40, inf }
 0xce4   : > { %v10633_v19 = vadd.f32 1e-05, %v5344_v41  ;;  %v10635_v25 = vadd.f32 1e-05, %v5345_v27  ;;  %v5384_v28 = vand.u32 2147483648, %v10630_v40  ;;  %vm5383_vm0 = vcmp.eq.f32.partialorder %v10630_v40, 0.0 }
 0xce5   : > { %v5328_v56 = vpop.xlane.xlu1 %5327  ;;  %v5330_v61 = vpop.xlane.xlu0 %5329 }
 0xce6   : > { %v5346_v0 = vmul.f32 0.0078125, %v5328_v56  ;;  %v5347_v5 = vmul.f32 0.0078125, %v5330_v61  ;;  %7268 = vrsqrt.f32 %v10633_v19  ;;  %vm5388_vm1 = vcmp.eq.f32.partialorder %v10633_v19, inf }
 0xce7   : > { %7270 = vrsqrt.f32 %v10635_v25  ;;  %vm5390_vm2 = vcmp.eq.f32.partialorder %v10633_v19, 0.0  ;;  %v5391_v44 = vand.u32 2147483648, %v10633_v19  ;;  %vm5395_vm3 = vcmp.eq.f32.partialorder %v10635_v25, inf }
 0xce8   : > { %v10639_v17 = vadd.f32 1e-05, %v5346_v0  ;;  %v10641_v47 = vadd.f32 1e-05, %v5347_v5  ;;  %v5398_v20 = vand.u32 2147483648, %v10635_v25  ;;  %vm5397_vm4 = vcmp.eq.f32.partialorder %v10635_v25, 0.0 }
 0xce9   : > { %v5332_v39 = vpop.xlane.xlu1 %5331  ;;  %v5334_v29 = vpop.xlane.xlu0 %5333 }
 0xcea   : > { %v5348_v12 = vmul.f32 0.0078125, %v5332_v39  ;;  %v5349_v14 = vmul.f32 0.0078125, %v5334_v29  ;;  %7272 = vrsqrt.f32 %v10639_v17  ;;  %vm5402_vm5 = vcmp.eq.f32.partialorder %v10639_v17, inf }
 0xceb   : > { %v7263_v33 = vpop.eup %7262  ;;  %7274 = vrsqrt.f32 %v10641_v47  ;;  %vm5404_vm6 = vcmp.eq.f32.partialorder %v10639_v17, 0.0  ;;  %v5405_v27 = vand.u32 2147483648, %v10639_v17  ;;  %vm5409_vm7 = vcmp.eq.f32.partialorder %v10641_v47, inf }
 0xcec   : > { %v5366_v8 = vmul.f32 %v7263_v33, %v5353_v7  ;;  %v10645_v32 = vadd.f32 1e-05, %v5348_v12  ;;  %v10647_v2 = vadd.f32 1e-05, %v5349_v14  ;;  %vm5411_vm8 = vcmp.eq.f32.partialorder %v10641_v47, 0.0 }
 0xced   : > { %v5336_v35 = vpop.xlane.xlu1 %5335  ;;  %v5338_v62 = vpop.xlane.xlu0 %5337 }
 0xcee   : > { %v5368_v16 = vsel %vm5367_vm11, %v5353_v7, %v5366_v8  ;;  %v5350_v57 = vmul.f32 0.0078125, %v5336_v35  ;;  %v5351_v49 = vmul.f32 0.0078125, %v5338_v62  ;;  %7276 = vrsqrt.f32 %v10645_v32  ;;  %v10697_v35 = vld [vmem:[%s11089_s9] ss:$0 sm:$0xff] }
 0xcef   : > { %v5371_v51 = vsel %vm5369_vm12, %v5370_v42, %v5368_v16  ;;  %v7265_v11 = vpop.eup %7264  ;;  %vm5416_vm9 = vcmp.eq.f32.partialorder %v10645_v32, inf  ;;  %vm5418_vm10 = vcmp.eq.f32.partialorder %v10645_v32, 0.0  ;;  %v5419_v14 = vand.u32 2147483648, %v10645_v32 }
 0xcf0   : > { %7278 = vrcp.f32 %v5371_v51  ;;  %v7267_v1 = vpop.eup %7266  ;;  %v5373_v6 = vmul.f32 %v7265_v11, %v5354_v23  ;;  %v10651_v59 = vadd.f32 1e-05, %v5350_v57  ;;  %v10655_v55 = vadd.f32 1e-05, %v5351_v49 }
 0xcf1   : > { %7280 = vrsqrt.f32 %v10647_v2  ;;  %v5340_v54 = vpop.xlane.xlu1 %5339  ;;  %v5380_v52 = vmul.f32 %v7267_v1, %v10630_v40  ;;  %vm5423_vm11 = vcmp.eq.f32.partialorder %v10647_v2, inf  ;;  %vm5425_vm12 = vcmp.eq.f32.partialorder %v10647_v2, 0.0 }
 0xcf2   : > { %v5375_v36 = vsel %vm5374_vm13, %v5354_v23, %v5373_v6  ;;  %7282 = vrsqrt.f32 %v10651_v59  ;;  %v5352_v24 = vmul.f32 0.0078125, %v5340_v54  ;;  %v5426_v16 = vand.u32 2147483648, %v10647_v2 }
 0xcf3   : > { %v7269_v46 = vpop.eup %7268  ;;  %v5378_v50 = vsel %vm5376_vm14, %v5377_v53, %v5375_v36  ;;  %v5382_v63 = vsel %vm5381_vm15, %v10630_v40, %v5380_v52  ;;  %7284 = vrsqrt.f32 %v10655_v55  ;;  %vm5430_vm13 = vcmp.eq.f32.partialorder %v10651_v59, inf  ;;  %v10716_v36 = vld [vmem:[%s11090_s26] ss:$0 sm:$0xff] }
 0xcf4   : > { %v7271_v21 = vpop.eup %7270  ;;  %7286 = vrcp.f32 %v5378_v50  ;;  %v5385_v26 = vsel %vm5383_vm0, %v5384_v28, %v5382_v63  ;;  %v5387_v9 = vmul.f32 %v7269_v46, %v10633_v19  ;;  %v10670_v18 = vadd.f32 1e-05, %v5352_v24 }
 0xcf5   : > { %7288 = vrcp.f32 %v5385_v26  ;;  %v5394_v7 = vmul.f32 %v7271_v21, %v10635_v25  ;;  %vm5432_vm14 = vcmp.eq.f32.partialorder %v10651_v59, 0.0  ;;  %v5433_v49 = vand.u32 2147483648, %v10651_v59 }
 0xcf6   : > { %v5389_v43 = vsel %vm5388_vm1, %v10633_v19, %v5387_v9  ;;  %vm5437_vm15 = vcmp.eq.f32.partialorder %v10655_v55, inf  ;;  %v5440_v6 = vand.u32 2147483648, %v10655_v55  ;;  %vm5439_vm0 = vcmp.eq.f32.partialorder %v10655_v55, 0.0 }
 0xcf7   : > { %v7273_v15 = vpop.eup %7272  ;;  %v5392_v23 = vsel %vm5390_vm2, %v5391_v44, %v5389_v43  ;;  %v5396_v40 = vsel %vm5395_vm3, %v10635_v25, %v5394_v7  ;;  %v5412_v25 = vand.u32 2147483648, %v10641_v47  ;;  %vm5444_vm1 = vcmp.eq.f32.partialorder %v10670_v18, inf }
 0xcf8   : > { %v7275_v22 = vpop.eup %7274  ;;  %7290 = vrcp.f32 %v5392_v23  ;;  %v5399_v3 = vsel %vm5397_vm4, %v5398_v20, %v5396_v40  ;;  %v5401_v41 = vmul.f32 %v7273_v15, %v10639_v17  ;;  %vm5446_vm2 = vcmp.eq.f32.partialorder %v10670_v18, 0.0 }
 0xcf9   : > { %7292 = vrcp.f32 %v5399_v3  ;;  %v5408_v19 = vmul.f32 %v7275_v22, %v10641_v47  ;;  %v5447_v40 = vand.u32 2147483648, %v10670_v18 }
 0xcfa   : > { %v5403_v56 = vsel %vm5402_vm5, %v10639_v17, %v5401_v41  ;;  %7294 = vrsqrt.f32 %v10670_v18 }
 0xcfb   : > { %v7277_v61 = vpop.eup %7276  ;;  %v5406_v0 = vsel %vm5404_vm6, %v5405_v27, %v5403_v56  ;;  %v5410_v5 = vsel %vm5409_vm7, %v10641_v47, %v5408_v19 }
 0xcfc   : > { %7296 = vrcp.f32 %v5406_v0  ;;  %v5413_v29 = vsel %vm5411_vm8, %v5412_v25, %v5410_v5  ;;  %v5415_v12 = vmul.f32 %v7277_v61, %v10645_v32 }
 0xcfd   : > { %v7279_v39 = vpop.eup %7278  ;;  %7298 = vrcp.f32 %v5413_v29 }
 0xcfe   : > { %v7281_v17 = vpop.eup %7280  ;;  %v5450_v33 = vmul.f32 %v7279_v39, %v10571_v34  ;;  %v5417_v8 = vsel %vm5416_vm9, %v10645_v32, %v5415_v12 }
 0xcff   : > { %v5422_v47 = vmul.f32 %v7281_v17, %v10647_v2  ;;  %v7283_v42 = vpop.eup %7282  ;;  %v5420_v62 = vsel %vm5418_vm10, %v5419_v14, %v5417_v8 }
 0xd00   : > { %v7285_v34 = vpop.eup %7284  ;;  %7300 = vrcp.f32 %v5420_v62  ;;  %v5429_v57 = vmul.f32 %v7283_v42, %v10651_v59  ;;  %v5479_v53 = vmul.f32 %v10697_v35, %v5450_v33 }
 0xd01   : > { %v5424_v32 = vsel %vm5423_vm11, %v10647_v2, %v5422_v47  ;;  %v7287_v51 = vpop.eup %7286  ;;  %v5436_v1 = vmul.f32 %v7285_v34, %v10655_v55 }
 0xd02   : > { %v5427_v11 = vsel %vm5425_vm12, %v5426_v16, %v5424_v32  ;;  %v7289_v54 = vpop.eup %7288  ;;  %v5452_v52 = vmul.f32 %v7287_v51, %v10579_v58  ;;  %v5431_v2 = vsel %vm5430_vm13, %v10651_v59, %v5429_v57  ;;  %v5497_v9 = vadd.f32 %v10716_v36, %v5479_v53 }
 0xd03   : > { %7302 = vrcp.f32 %v5427_v11  ;;  %v5454_v28 = vmul.f32 %v7289_v54, %v10574_v38  ;;  %v5434_v24 = vsel %vm5432_vm14, %v5433_v49, %v5431_v2  ;;  %v5438_v46 = vsel %vm5437_vm15, %v10655_v55, %v5436_v1 }
 0xd04   : > { %v5480_v58 = vmul.f32 %v10697_v35, %v5452_v52  ;;  %7304 = vrcp.f32 %v5434_v24  ;;  %v5441_v50 = vsel %vm5439_vm0, %v5440_v6, %v5438_v46 }
 0xd05   : > { %v7291_v63 = vpop.eup %7290  ;;  %v5481_v21 = vmul.f32 %v10697_v35, %v5454_v28  ;;  %7306 = vrcp.f32 %v5441_v50 }
 0xd06   : > { %v7293_v26 = vpop.eup %7292  ;;  %v5498_v44 = vadd.f32 %v10716_v36, %v5480_v58  ;;  %v5456_v38 = vmul.f32 %v7291_v63, %v10582_v13 }
 0xd07   : > { %v7295_v59 = vpop.eup %7294  ;;  %v5458_v7 = vmul.f32 %v7293_v26, %v10589_v48  ;;  %v5499_v23 = vadd.f32 %v10716_v36, %v5481_v21 }
 0xd08   : > { %v6031_v43 = vpack.c.bf16 %v5498_v44, %v5497_v9  ;;  %v5482_v55 = vmul.f32 %v10697_v35, %v5456_v38  ;;  %v5443_v20 = vmul.f32 %v7295_v59, %v10670_v18 }
 0xd09   : > { %v7297_v15 = vpop.eup %7296  ;;  %v5483_v48 = vmul.f32 %v10697_v35, %v5458_v7 }
 0xd0a   : > { %v7299_v22 = vpop.eup %7298  ;;  %6032 = vst [vmem:[#allocation18] sm:$0xff] %v6031_v43   ;;  %v5500_v13 = vadd.f32 %v10716_v36, %v5482_v55  ;;  %v5460_v3 = vmul.f32 %v7297_v15, %v10592_v10  ;;  %v5445_v41 = vsel %vm5444_vm1, %v10670_v18, %v5443_v20 }
 0xd0b   : > { %v5462_v27 = vmul.f32 %v7299_v22, %v10599_v31  ;;  %v5448_v19 = vsel %vm5446_vm2, %v5447_v40, %v5445_v41  ;;  %v5501_v0 = vadd.f32 %v10716_v36, %v5483_v48 }
 0xd0c   : > { %v6036_v56 = vpack.c.bf16 %v5500_v13, %v5499_v23  ;;  %v5484_v25 = vmul.f32 %v10697_v35, %v5460_v3  ;;  %7308 = vrcp.f32 %v5448_v19 }
 0xd0d   : > { %v7301_v61 = vpop.eup %7300  ;;  %v5485_v39 = vmul.f32 %v10697_v35, %v5462_v27 }
 0xd0e   : > { %6058 = vst [vmem:[#allocation18 + $0x8] sm:$0xff] %v6036_v56   ;;  %v5502_v5 = vadd.f32 %v10716_v36, %v5484_v25  ;;  %v5464_v29 = vmul.f32 %v7301_v61, %v10602_v37 }
 0xd0f   : > { %v5503_v14 = vadd.f32 %v10716_v36, %v5485_v39 }
 0xd10   : > { %v7303_v10 = vpop.eup %7302  ;;  %v6041_v12 = vpack.c.bf16 %v5502_v5, %v5501_v0  ;;  %v5486_v18 = vmul.f32 %v10697_v35, %v5464_v29 }
 0xd11   : > { %v5466_v31 = vmul.f32 %v7303_v10, %v10609_v45  ;;  %v7305_v17 = vpop.eup %7304 }
 0xd12   : > { %6059 = vst [vmem:[#allocation18 + $0x10] sm:$0xff] %v6041_v12   ;;  %v5504_v33 = vadd.f32 %v10716_v36, %v5486_v18  ;;  %v5468_v47 = vmul.f32 %v7305_v17, %v10612_v60  ;;  %v7307_v42 = vpop.eup %7306 }
 0xd13   : > { %v5487_v8 = vmul.f32 %v10697_v35, %v5466_v31  ;;  %v5470_v45 = vmul.f32 %v7307_v42, %v10619_v30 }
 0xd14   : > { %v6046_v62 = vpack.c.bf16 %v5504_v33, %v5503_v14  ;;  %v5488_v37 = vmul.f32 %v10697_v35, %v5468_v47 }
 0xd15   : > { %v5505_v16 = vadd.f32 %v10716_v36, %v5487_v8  ;;  %v5489_v49 = vmul.f32 %v10697_v35, %v5470_v45 }
 0xd16   : > { %6060 = vst [vmem:[#allocation18 + $0x18] sm:$0xff] %v6046_v62   ;;  %v5506_v34 = vadd.f32 %v10716_v36, %v5488_v37 }
 0xd17   : > { %v5507_v11 = vadd.f32 %v10716_v36, %v5489_v49 }
 0xd18   : > { %v6051_v32 = vpack.c.bf16 %v5506_v34, %v5505_v16 }
 0xd19   : > { %v7309_v57 = vpop.eup %7308 }
 0xd1a   : > { %6061 = vst [vmem:[#allocation18 + $0x20] sm:$0xff] %v6051_v32   ;;  %v5472_v51 = vmul.f32 %v7309_v57, %v10622_v4 }
 0xd1c   : > { %v5490_v60 = vmul.f32 %v10697_v35, %v5472_v51 }
 0xd1e   : > { %v5508_v1 = vadd.f32 %v10716_v36, %v5490_v60 }
 0xd20   : > { %v6056_v6 = vpack.c.bf16 %v5508_v1, %v5507_v11 }
 0xd22   : > { %6062 = vst [vmem:[#allocation18 + $0x28] sm:$0xff] %v6056_v6  }
 0xd23 PF: > { %p6695_p12 = scmp.eq.s32.totalorder %s7938_s22, 1  ;;  %s7663_s15 = smov [#allocation18]  }
 0xd24   : > { %s5575_s4 = sshll.u32 %s7663_s15, 4  ;;  %s5576_s4 = int_to_ptr.vmem [resolvable:$true] %s5575_s4 }
 0xd25   : > { %s7560_s13 = scalar_lea.vmem %s5576_s4, 768  ;;  %p7567_p6 = scmp.lt.s32.totalorder %s5576_s4, %s5576_s4 }
 0xd26   : > { %p7561_p2 = scmp.ne.s32.totalorder %s5576_s4, %s7560_s13  ;;  %p7568_p8 = scmp.lt.s32.totalorder %s7560_s13, %s7560_s13 }
 0xd28   : > { %p7562_p9 = pnand %p7561_p2, %p6695_p12  ;;  %p7569_p0 = por %p7568_p8, %p7567_p6 }
 0xd2a   : > { %p7563_p13 = pneg %p7562_p9 }
 0xd2c   : > { %p7570_p7 = pnand %p7569_p0, %p7563_p13 }
 0xd2e   : > { %7573 = shalt.err (!%p7570_p7)
}
 0xd2f   : > { %s7664_s25 = smov 4   ;;  %s11091_s3 = sld [smem:[#allocation85_spill]] }
 0xd35   : > { %6660 = dma.vmem_to_hbm [thread:$0]  (%p6695_p12), %s5576_s4, 768, %s11091_s3, [#allocation5], %s7661_s10, %s7661_s10, %s7664_s25  }
 0xd36   : > { %7621 = dma.done.wait (%p6695_p12), [#allocation5], 768  }
 0xd37   : > { %7623 = vsyncadd (%p6695_p12), [#allocation5], 4294966528 }
 0xd38 PF: > { %s11092_s21 = sld [smem:[#allocation26_spill]]  ;;  %s11095_s18 = smov %s7630_s19 }
 0xd39   : > { %s11093_s20 = sld [smem:[#allocation25_spill]] }
 0xd3a   : > { %s11094_s17 = sld [smem:[#allocation27_spill]] }
 0xd3e   : > { %p36_p1 = scmp.ge.s32.totalorder %s11092_s21, 4  }
 0xd3f   : > { %s11096_s19 = smov %s11093_s20 }
 0xd40   : > { %s11097_s20 = smov %s11094_s17  ;;  %38 = sbr.rel (!%p36_p1) target bundleno = 24 (0x18), region = 225 }
 0xd45   :  { %5591 = vsyncpa [#allocation4], 1 }
 0xd46   :  { %5593 = vsyncpa [#allocation4 + $0x1], 1 }
 0xd47   :  { %5594 = vsyncpa [#allocation7], 1 }
 0xd48   :  { %5596 = vsyncpa [#allocation7 + $0x1], 1 }
 0xd49   :  { %5597 = vsyncpa [#allocation10], 1 }
 0xd4a   :  { %5599 = vsyncpa [#allocation10 + $0x1], 1 }
 0xd4b   :  { %5600 = vsyncpa [#allocation13], 1 }
 0xd4c   :  { %5602 = vsyncpa [#allocation13 + $0x1], 1 }
 0xd4d   :  { %5603 = vsyncpa [#allocation16], 1 }
 0xd4e   :  { %5605 = vsyncpa [#allocation16 + $0x1], 1 }
 0xd4f   :  { %5606 = vsyncpa [#allocation5], 1 }
 0xd50   :  { %5608 = vsyncpa [#allocation5 + $0x1], 1 }

</bundles_post_ra>
